<compile_context>
chip_gen: v7x
topology: tpu7x:2x2x1
jax: 0.10.0
libtpu: 0.0.40
codegen_flags: <defaults>
</compile_context>

<pallas_src>
import functools
import numpy as np
import jax
import jax.numpy as jnp
from jax import lax
from jax.experimental import pallas as pl
from jax.experimental.pallas import tpu as pltpu

EMBED = 16
HEADS = 2
HEAD_DIM = EMBED // HEADS
FFN = 2048                      # PyTorch TransformerEncoderLayer default dim_feedforward
NUM_LAYERS = 2
LN_EPS = 1e-5
_TARGET_BLOCK_ROWS = 512        # rows (tokens) per grid step when tiling large batches


def _layer_norm(x, w, b):
    mean = jnp.mean(x, axis=-1, keepdims=True)
    var = jnp.mean((x - mean) ** 2, axis=-1, keepdims=True)
    return (x - mean) * lax.rsqrt(var + LN_EPS) * w + b


def _autoencoder_kernel(
    x_ref,                                   # (R, 2)   R = rows in this block (mult. of S)
    enc_w_ref, enc_b_ref,                    # (2, E), (1, E)
    wq_ref, bq_ref,                          # (L, H, E, Hd), (L, H, 1, Hd)  (scale folded in)
    wk_ref, bk_ref,                          # (L, H, E, Hd), (L, H, 1, Hd)
    wv_ref, bv_ref,                          # (L, H, E, Hd), (L, H, 1, Hd)
    wo_ref, bo_ref,                          # (L, H, Hd, E), (L, 1, E)
    ln1_w_ref, ln1_b_ref,                    # (L, 1, E)
    ff1_w_ref, ff1_b_ref,                    # (L, E, FFN) bf16, (L, 1, FFN) f32
    ff2_w_ref, ff2_b_ref,                    # (L, FFN, E) bf16, (L, 1, E) f32
    ln2_w_ref, ln2_b_ref,                    # (L, 1, E)
    dec_w_ref, dec_b_ref,                    # (E, 2), (1, 2)
    o_ref,                                   # (R, 2)
    *, seq_len,
):
    R = x_ref.shape[0]
    nb = R // seq_len                        # number of independent sequences in this block
    L = wq_ref.shape[0]
    H = wq_ref.shape[1]

    x = x_ref[...]                                                        # (R, 2)  f32
    # encoder: Linear(2 -> E)
    x = jnp.dot(x, enc_w_ref[...], preferred_element_type=jnp.float32) + enc_b_ref[...]

    for l in range(L):
        # ---- multi-head self-attention (post-norm), batched over sequences ----
        attn = None
        for h in range(H):                  # unrolled (H=2); separate per-head weights,
            qh = jnp.dot(x, wq_ref[l, h],   # so no lane slicing / concat is needed.
                         preferred_element_type=jnp.float32) + bq_ref[l, h]   # (R, Hd)
            kh = jnp.dot(x, wk_ref[l, h],
                         preferred_element_type=jnp.float32) + bk_ref[l, h]
            vh = jnp.dot(x, wv_ref[l, h],
                         preferred_element_type=jnp.float32) + bv_ref[l, h]
            qh = qh.reshape(nb, seq_len, HEAD_DIM)
            kh = kh.reshape(nb, seq_len, HEAD_DIM)
            vh = vh.reshape(nb, seq_len, HEAD_DIM)
            s = jnp.einsum("bqd,bkd->bqk", qh, kh,
                           preferred_element_type=jnp.float32)            # (nb, S, S)
            s = s - jnp.max(s, axis=-1, keepdims=True)
            p = jnp.exp(s)
            p = p / jnp.sum(p, axis=-1, keepdims=True)
            oh = jnp.einsum("bqk,bkd->bqd", p, vh,
                            preferred_element_type=jnp.float32)           # (nb, S, Hd)
            oh = oh.reshape(R, HEAD_DIM)
            proj = jnp.dot(oh, wo_ref[l, h], preferred_element_type=jnp.float32)  # (R, E)
            attn = proj if attn is None else attn + proj
        attn = attn + bo_ref[l]
        x = _layer_norm(x + attn, ln1_w_ref[l], ln1_b_ref[l])

        # ---- feed-forward (bf16 MXU operands, f32 accumulation / elementwise) ----
        h1 = jnp.dot(x.astype(jnp.bfloat16), ff1_w_ref[l],
                     preferred_element_type=jnp.float32) + ff1_b_ref[l]   # (R, FFN)
        h1 = jnp.maximum(h1, 0.0)                                         # ReLU
        ff = jnp.dot(h1.astype(jnp.bfloat16), ff2_w_ref[l],
                     preferred_element_type=jnp.float32) + ff2_b_ref[l]   # (R, E)
        x = _layer_norm(x + ff, ln2_w_ref[l], ln2_b_ref[l])
        # TODO(synk): dropout (p=0.1) omitted — inference / eval semantics.

    # decoder: Linear(E -> 2), single store for the whole block
    y = jnp.dot(x, dec_w_ref[...], preferred_element_type=jnp.float32) + dec_b_ref[...]
    o_ref[...] = y.astype(o_ref.dtype)


def _weight_spec(shape):
    nd = len(shape)
    return pl.BlockSpec(shape, lambda i, _nd=nd: (0,) * _nd)   # constant block -> resident


def _choose_block_rows(batch, seq):
    """Rows per grid step: whole sequences, <= _TARGET_BLOCK_ROWS, sublane-aligned."""
    total = batch * seq
    if total <= _TARGET_BLOCK_ROWS:
        return total
    candidates = [d * seq for d in range(1, batch + 1)
                  if batch % d == 0 and d * seq <= _TARGET_BLOCK_ROWS and (d * seq) % 8 == 0]
    return max(candidates) if candidates else total


def make_params(key):
    """Model parameters in a PyTorch-like layout (f32)."""
    ks = jax.random.split(key, 12)
    s = 0.1
    L, E = NUM_LAYERS, EMBED
    return {
        "enc_w": jax.random.normal(ks[0], (2, E), jnp.float32) * s,
        "enc_b": jax.random.normal(ks[1], (E,), jnp.float32) * s,
        "in_w": jax.random.normal(ks[2], (L, E, 3 * E), jnp.float32) * s,
        "in_b": jax.random.normal(ks[3], (L, 3 * E), jnp.float32) * s,
        "out_w": jax.random.normal(ks[4], (L, E, E), jnp.float32) * s,
        "out_b": jax.random.normal(ks[5], (L, E), jnp.float32) * s,
        "ln1_w": jnp.ones((L, E), jnp.float32),
        "ln1_b": jnp.zeros((L, E), jnp.float32),
        "ff1_w": jax.random.normal(ks[6], (L, E, FFN), jnp.float32) * s,
        "ff1_b": jax.random.normal(ks[7], (L, FFN), jnp.float32) * s,
        "ff2_w": jax.random.normal(ks[8], (L, FFN, E), jnp.float32) * s,
        "ff2_b": jax.random.normal(ks[9], (L, E), jnp.float32) * s,
        "ln2_w": jnp.ones((L, E), jnp.float32),
        "ln2_b": jnp.zeros((L, E), jnp.float32),
        "dec_w": jax.random.normal(ks[10], (E, 2), jnp.float32) * s,
        "dec_b": jax.random.normal(ks[11], (2,), jnp.float32) * s,
    }


def prepare_kernel_params(p):
    """Host-side weight prep: split qkv + heads, fold softmax scale, cast FFN to bf16."""
    L, E, H, Hd = NUM_LAYERS, EMBED, HEADS, HEAD_DIM
    sm_scale = 1.0 / (Hd ** 0.5)
    in_w, in_b = p["in_w"], p["in_b"]
    wq, wk, wv = in_w[:, :, :E], in_w[:, :, E:2 * E], in_w[:, :, 2 * E:]
    bq, bk, bv = in_b[:, :E], in_b[:, E:2 * E], in_b[:, 2 * E:]

    def split_w(w):                      # (L, E, E) -> (L, H, E, Hd)
        return jnp.transpose(w.reshape(L, E, H, Hd), (0, 2, 1, 3))

    def split_b(b):                      # (L, E) -> (L, H, 1, Hd)
        return b.reshape(L, H, Hd)[:, :, None, :]

    return {
        "enc_w": p["enc_w"],
        "enc_b": p["enc_b"][None, :],
        "wq": split_w(wq) * sm_scale,
        "bq": split_b(bq) * sm_scale,
        "wk": split_w(wk),
        "bk": split_b(bk),
        "wv": split_w(wv),
        "bv": split_b(bv),
        "wo": p["out_w"].reshape(L, H, Hd, E),     # out-proj rows per head
        "bo": p["out_b"][:, None, :],
        "ln1_w": p["ln1_w"][:, None, :],
        "ln1_b": p["ln1_b"][:, None, :],
        "ff1_w": p["ff1_w"].astype(jnp.bfloat16),
        "ff1_b": p["ff1_b"][:, None, :],
        "ff2_w": p["ff2_w"].astype(jnp.bfloat16),
        "ff2_b": p["ff2_b"][:, None, :],
        "ln2_w": p["ln2_w"][:, None, :],
        "ln2_b": p["ln2_b"][:, None, :],
        "dec_w": p["dec_w"],
        "dec_b": p["dec_b"][None, :],
    }


_PARAM_ORDER = ["enc_w", "enc_b", "wq", "bq", "wk", "bk", "wv", "bv", "wo", "bo",
                "ln1_w", "ln1_b", "ff1_w", "ff1_b", "ff2_w", "ff2_b",
                "ln2_w", "ln2_b", "dec_w", "dec_b"]


@jax.jit
def shape_autoencoder_forward(points, kparams):
    """points: (S, B, 2) float32 (PyTorch batch_first=False). Returns (S, B, 2)."""
    S, B, _ = points.shape
    R = B * S
    block_rows = _choose_block_rows(B, S)
    n_blocks = R // block_rows
    x = jnp.transpose(points, (1, 0, 2)).reshape(R, 2).astype(jnp.float32)
    weights = [kparams[name] for name in _PARAM_ORDER]

    kernel = functools.partial(_autoencoder_kernel, seq_len=S)
    in_specs = [pl.BlockSpec((block_rows, 2), lambda i: (i, 0))]
    in_specs += [_weight_spec(w.shape) for w in weights]

    out = pl.pallas_call(
        kernel,
        out_shape=jax.ShapeDtypeStruct((R, 2), jnp.float32),
        grid=(n_blocks,),                          # row-blocks of whole sequences
        in_specs=in_specs,
        out_specs=pl.BlockSpec((block_rows, 2), lambda i: (i, 0)),
        compiler_params=pltpu.CompilerParams(dimension_semantics=("parallel",)),
    )(x, *weights)
    return jnp.transpose(out.reshape(B, S, 2), (1, 0, 2))


def reference_forward(points, p, bf16_ffn=True):
    """Pure-JAX reference (PyTorch semantics). bf16_ffn emulates the kernel's FFN precision."""
    x = jnp.einsum("sbi,ie->sbe", points, p["enc_w"]) + p["enc_b"]
    scale = 1.0 / (HEAD_DIM ** 0.5)
    for l in range(NUM_LAYERS):
        qkv = jnp.einsum("sbe,ef->sbf", x, p["in_w"][l]) + p["in_b"][l]
        q, k, v = qkv[..., :EMBED], qkv[..., EMBED:2 * EMBED], qkv[..., 2 * EMBED:]
        outs = []
        for h in range(HEADS):
            lo, hi = h * HEAD_DIM, (h + 1) * HEAD_DIM
            s = jnp.einsum("sbd,tbd->bst", q[..., lo:hi] * scale, k[..., lo:hi])
            pa = jax.nn.softmax(s, axis=-1)
            outs.append(jnp.einsum("bst,tbd->sbd", pa, v[..., lo:hi]))
        attn = jnp.concatenate(outs, axis=-1)
        attn = jnp.einsum("sbe,ef->sbf", attn, p["out_w"][l]) + p["out_b"][l]
        x = _layer_norm(x + attn, p["ln1_w"][l], p["ln1_b"][l])
        w1, w2 = p["ff1_w"][l], p["ff2_w"][l]
        if bf16_ffn:
            h1 = jnp.einsum("sbe,ef->sbf", x.astype(jnp.bfloat16), w1.astype(jnp.bfloat16),
                            preferred_element_type=jnp.float32) + p["ff1_b"][l]
            h1 = jax.nn.relu(h1)
            h2 = jnp.einsum("sbf,fe->sbe", h1.astype(jnp.bfloat16), w2.astype(jnp.bfloat16),
                            preferred_element_type=jnp.float32) + p["ff2_b"][l]
        else:
            h1 = jax.nn.relu(jnp.einsum("sbe,ef->sbf", x, w1) + p["ff1_b"][l])
            h2 = jnp.einsum("sbf,fe->sbe", h1, w2) + p["ff2_b"][l]
        x = _layer_norm(x + h2, p["ln2_w"][l], p["ln2_b"][l])
    return jnp.einsum("sbe,eo->sbo", x, p["dec_w"]) + p["dec_b"]


if __name__ == "__main__":
    key = jax.random.PRNGKey(0)
    pkey, xkey = jax.random.split(key)
    model_params = make_params(pkey)
    kparams = prepare_kernel_params(model_params)

    S, B = 8, 2
    points = jax.random.normal(xkey, (S, B, 2), jnp.float32)   # (seq, batch, 2)

    out = jax.block_until_ready(shape_autoencoder_forward(points, kparams))

    ref = jax.block_until_ready(reference_forward(points, model_params, bf16_ffn=True))
    assert out.shape == (S, B, 2)
    np.testing.assert_allclose(np.asarray(out), np.asarray(ref), rtol=1e-2, atol=1e-2)

    print("KERNEL_OK")
</pallas_src>

<mosaic_0001>
module attributes {stable_mosaic.version = 11 : i64} {
  func.func @_autoencoder_kernel(%arg0: i32, %arg1: memref<16x2xf32, #tpu.memory_space<vmem>>, %arg2: memref<2x16xf32, #tpu.memory_space<vmem>>, %arg3: memref<1x16xf32, #tpu.memory_space<vmem>>, %arg4: memref<2x2x16x8xf32, #tpu.memory_space<vmem>>, %arg5: memref<2x2x1x8xf32, #tpu.memory_space<vmem>>, %arg6: memref<2x2x16x8xf32, #tpu.memory_space<vmem>>, %arg7: memref<2x2x1x8xf32, #tpu.memory_space<vmem>>, %arg8: memref<2x2x16x8xf32, #tpu.memory_space<vmem>>, %arg9: memref<2x2x1x8xf32, #tpu.memory_space<vmem>>, %arg10: memref<2x2x8x16xf32, #tpu.memory_space<vmem>>, %arg11: memref<2x1x16xf32, #tpu.memory_space<vmem>>, %arg12: memref<2x1x16xf32, #tpu.memory_space<vmem>>, %arg13: memref<2x1x16xf32, #tpu.memory_space<vmem>>, %arg14: memref<2x16x2048xbf16, #tpu.memory_space<vmem>>, %arg15: memref<2x1x2048xf32, #tpu.memory_space<vmem>>, %arg16: memref<2x2048x16xbf16, #tpu.memory_space<vmem>>, %arg17: memref<2x1x16xf32, #tpu.memory_space<vmem>>, %arg18: memref<2x1x16xf32, #tpu.memory_space<vmem>>, %arg19: memref<2x1x16xf32, #tpu.memory_space<vmem>>, %arg20: memref<16x2xf32, #tpu.memory_space<vmem>>, %arg21: memref<1x2xf32, #tpu.memory_space<vmem>>, %arg22: memref<16x2xf32, #tpu.memory_space<vmem>>) attributes {dimension_semantics = [#tpu.dimension_semantics<parallel>], iteration_bounds = array<i64: 1>, scalar_prefetch = 0 : i64, scratch_operands = 0 : i64, tpu.core_type = #tpu.core_type<tc>, window_params = [{transform_indices = @transform_0, window_bounds = array<i64: 16, 2>}, {pipeline_mode = #tpu.pipeline_mode<synchronous>, transform_indices = @transform_1, window_bounds = array<i64: 2, 16>}, {pipeline_mode = #tpu.pipeline_mode<synchronous>, transform_indices = @transform_2, window_bounds = array<i64: 1, 16>}, {pipeline_mode = #tpu.pipeline_mode<synchronous>, transform_indices = @transform_3, window_bounds = array<i64: 2, 2, 16, 8>}, {pipeline_mode = #tpu.pipeline_mode<synchronous>, transform_indices = @transform_4, window_bounds = array<i64: 2, 2, 1, 8>}, {pipeline_mode = #tpu.pipeline_mode<synchronous>, transform_indices = @transform_5, window_bounds = array<i64: 2, 2, 16, 8>}, {pipeline_mode = #tpu.pipeline_mode<synchronous>, transform_indices = @transform_6, window_bounds = array<i64: 2, 2, 1, 8>}, {pipeline_mode = #tpu.pipeline_mode<synchronous>, transform_indices = @transform_7, window_bounds = array<i64: 2, 2, 16, 8>}, {pipeline_mode = #tpu.pipeline_mode<synchronous>, transform_indices = @transform_8, window_bounds = array<i64: 2, 2, 1, 8>}, {pipeline_mode = #tpu.pipeline_mode<synchronous>, transform_indices = @transform_9, window_bounds = array<i64: 2, 2, 8, 16>}, {pipeline_mode = #tpu.pipeline_mode<synchronous>, transform_indices = @transform_10, window_bounds = array<i64: 2, 1, 16>}, {pipeline_mode = #tpu.pipeline_mode<synchronous>, transform_indices = @transform_11, window_bounds = array<i64: 2, 1, 16>}, {pipeline_mode = #tpu.pipeline_mode<synchronous>, transform_indices = @transform_12, window_bounds = array<i64: 2, 1, 16>}, {pipeline_mode = #tpu.pipeline_mode<synchronous>, transform_indices = @transform_13, window_bounds = array<i64: 2, 16, 2048>}, {pipeline_mode = #tpu.pipeline_mode<synchronous>, transform_indices = @transform_14, window_bounds = array<i64: 2, 1, 2048>}, {pipeline_mode = #tpu.pipeline_mode<synchronous>, transform_indices = @transform_15, window_bounds = array<i64: 2, 2048, 16>}, {pipeline_mode = #tpu.pipeline_mode<synchronous>, transform_indices = @transform_16, window_bounds = array<i64: 2, 1, 16>}, {pipeline_mode = #tpu.pipeline_mode<synchronous>, transform_indices = @transform_17, window_bounds = array<i64: 2, 1, 16>}, {pipeline_mode = #tpu.pipeline_mode<synchronous>, transform_indices = @transform_18, window_bounds = array<i64: 2, 1, 16>}, {pipeline_mode = #tpu.pipeline_mode<synchronous>, transform_indices = @transform_19, window_bounds = array<i64: 16, 2>}, {pipeline_mode = #tpu.pipeline_mode<synchronous>, transform_indices = @transform_20, window_bounds = array<i64: 1, 2>}, {transform_indices = @transform_21, window_bounds = array<i64: 16, 2>}]} {
    %c0 = arith.constant 0 : index
    %c0_0 = arith.constant 0 : index
    %0 = vector.load %arg1[%c0, %c0_0] : memref<16x2xf32, #tpu.memory_space<vmem>>, vector<16x2xf32>
    %c0_1 = arith.constant 0 : index
    %c0_2 = arith.constant 0 : index
    %1 = vector.load %arg2[%c0_1, %c0_2] : memref<2x16xf32, #tpu.memory_space<vmem>>, vector<2x16xf32>
    %cst = arith.constant dense<0.000000e+00> : vector<16x16xf32>
    %2 = tpu.matmul %0, %1, %cst {dimension_numbers = #tpu.dot_dimension_numbers<[1], [0], [0], [1], [0, 0, 1, 1], [], []>} : vector<16x2xf32>, vector<2x16xf32>, vector<16x16xf32> -> vector<16x16xf32>
    %c0_3 = arith.constant 0 : index
    %c0_4 = arith.constant 0 : index
    %3 = vector.load %arg3[%c0_3, %c0_4] : memref<1x16xf32, #tpu.memory_space<vmem>>, vector<1x16xf32>
    %4 = vector.broadcast %3 : vector<1x16xf32> to vector<16x16xf32>
    %5 = arith.addf %2, %4 : vector<16x16xf32>
    %c0_5 = arith.constant 0 : index
    %c0_6 = arith.constant 0 : index
    %c0_7 = arith.constant 0 : index
    %c0_8 = arith.constant 0 : index
    %6 = vector.load %arg4[%c0_5, %c0_6, %c0_7, %c0_8] : memref<2x2x16x8xf32, #tpu.memory_space<vmem>>, vector<1x1x16x8xf32>
    %7 = vector.shape_cast %6 : vector<1x1x16x8xf32> to vector<16x8xf32>
    %cst_9 = arith.constant dense<0.000000e+00> : vector<16x8xf32>
    %8 = tpu.matmul %5, %7, %cst_9 {dimension_numbers = #tpu.dot_dimension_numbers<[1], [0], [0], [1], [0, 0, 1, 1], [], []>} : vector<16x16xf32>, vector<16x8xf32>, vector<16x8xf32> -> vector<16x8xf32>
    %c0_10 = arith.constant 0 : index
    %c0_11 = arith.constant 0 : index
    %c0_12 = arith.constant 0 : index
    %c0_13 = arith.constant 0 : index
    %9 = vector.load %arg5[%c0_10, %c0_11, %c0_12, %c0_13] : memref<2x2x1x8xf32, #tpu.memory_space<vmem>>, vector<1x1x1x8xf32>
    %10 = vector.shape_cast %9 : vector<1x1x1x8xf32> to vector<1x8xf32>
    %11 = vector.broadcast %10 : vector<1x8xf32> to vector<16x8xf32>
    %12 = arith.addf %8, %11 : vector<16x8xf32>
    %c0_14 = arith.constant 0 : index
    %c0_15 = arith.constant 0 : index
    %c0_16 = arith.constant 0 : index
    %c0_17 = arith.constant 0 : index
    %13 = vector.load %arg6[%c0_14, %c0_15, %c0_16, %c0_17] : memref<2x2x16x8xf32, #tpu.memory_space<vmem>>, vector<1x1x16x8xf32>
    %14 = vector.shape_cast %13 : vector<1x1x16x8xf32> to vector<16x8xf32>
    %cst_18 = arith.constant dense<0.000000e+00> : vector<16x8xf32>
    %15 = tpu.matmul %5, %14, %cst_18 {dimension_numbers = #tpu.dot_dimension_numbers<[1], [0], [0], [1], [0, 0, 1, 1], [], []>} : vector<16x16xf32>, vector<16x8xf32>, vector<16x8xf32> -> vector<16x8xf32>
    %c0_19 = arith.constant 0 : index
    %c0_20 = arith.constant 0 : index
    %c0_21 = arith.constant 0 : index
    %c0_22 = arith.constant 0 : index
    %16 = vector.load %arg7[%c0_19, %c0_20, %c0_21, %c0_22] : memref<2x2x1x8xf32, #tpu.memory_space<vmem>>, vector<1x1x1x8xf32>
    %17 = vector.shape_cast %16 : vector<1x1x1x8xf32> to vector<1x8xf32>
    %18 = vector.broadcast %17 : vector<1x8xf32> to vector<16x8xf32>
    %19 = arith.addf %15, %18 : vector<16x8xf32>
    %c0_23 = arith.constant 0 : index
    %c0_24 = arith.constant 0 : index
    %c0_25 = arith.constant 0 : index
    %c0_26 = arith.constant 0 : index
    %20 = vector.load %arg8[%c0_23, %c0_24, %c0_25, %c0_26] : memref<2x2x16x8xf32, #tpu.memory_space<vmem>>, vector<1x1x16x8xf32>
    %21 = vector.shape_cast %20 : vector<1x1x16x8xf32> to vector<16x8xf32>
    %cst_27 = arith.constant dense<0.000000e+00> : vector<16x8xf32>
    %22 = tpu.matmul %5, %21, %cst_27 {dimension_numbers = #tpu.dot_dimension_numbers<[1], [0], [0], [1], [0, 0, 1, 1], [], []>} : vector<16x16xf32>, vector<16x8xf32>, vector<16x8xf32> -> vector<16x8xf32>
    %c0_28 = arith.constant 0 : index
    %c0_29 = arith.constant 0 : index
    %c0_30 = arith.constant 0 : index
    %c0_31 = arith.constant 0 : index
    %23 = vector.load %arg9[%c0_28, %c0_29, %c0_30, %c0_31] : memref<2x2x1x8xf32, #tpu.memory_space<vmem>>, vector<1x1x1x8xf32>
    %24 = vector.shape_cast %23 : vector<1x1x1x8xf32> to vector<1x8xf32>
    %25 = vector.broadcast %24 : vector<1x8xf32> to vector<16x8xf32>
    %26 = arith.addf %22, %25 : vector<16x8xf32>
    %27 = vector.shape_cast %12 : vector<16x8xf32> to vector<2x8x8xf32>
    %28 = vector.shape_cast %19 : vector<16x8xf32> to vector<2x8x8xf32>
    %29 = vector.shape_cast %26 : vector<16x8xf32> to vector<2x8x8xf32>
    "tpu.trace_start"() <{level = 10 : i32, message = "bqd,bkd->bqk"}> : () -> ()
    %cst_32 = arith.constant dense<0.000000e+00> : vector<2x8x8xf32>
    %30 = tpu.matmul %27, %28, %cst_32 {dimension_numbers = #tpu.dot_dimension_numbers<[2], [2], [1], [1], [0, 0, 0, 1, 1, 1], [0], [0]>} : vector<2x8x8xf32>, vector<2x8x8xf32>, vector<2x8x8xf32> -> vector<2x8x8xf32>
    "tpu.trace_stop"() : () -> ()
    %cst_33 = arith.constant dense<0xFF800000> : vector<2x8xf32>
    %31 = vector.multi_reduction <maximumf>, %30, %cst_33 [2] : vector<2x8x8xf32> to vector<2x8xf32>
    %32 = vector.shape_cast %31 : vector<2x8xf32> to vector<2x8x1xf32>
    %33 = vector.broadcast %32 : vector<2x8x1xf32> to vector<2x8x8xf32>
    %34 = arith.subf %30, %33 : vector<2x8x8xf32>
    %35 = math.exp %34 : vector<2x8x8xf32>
    %cst_34 = arith.constant dense<0.000000e+00> : vector<2x8xf32>
    %36 = vector.multi_reduction <add>, %35, %cst_34 [2] : vector<2x8x8xf32> to vector<2x8xf32>
    %37 = vector.shape_cast %36 : vector<2x8xf32> to vector<2x8x1xf32>
    %38 = vector.broadcast %37 : vector<2x8x1xf32> to vector<2x8x8xf32>
    %39 = arith.divf %35, %38 : vector<2x8x8xf32>
    "tpu.trace_start"() <{level = 10 : i32, message = "bqk,bkd->bqd"}> : () -> ()
    %cst_35 = arith.constant dense<0.000000e+00> : vector<2x8x8xf32>
    %40 = tpu.matmul %39, %29, %cst_35 {dimension_numbers = #tpu.dot_dimension_numbers<[2], [1], [1], [2], [0, 0, 0, 1, 1, 2], [0], [0]>} : vector<2x8x8xf32>, vector<2x8x8xf32>, vector<2x8x8xf32> -> vector<2x8x8xf32>
    "tpu.trace_stop"() : () -> ()
    %41 = vector.shape_cast %40 : vector<2x8x8xf32> to vector<16x8xf32>
    %c0_36 = arith.constant 0 : index
    %c0_37 = arith.constant 0 : index
    %c0_38 = arith.constant 0 : index
    %c0_39 = arith.constant 0 : index
    %42 = vector.load %arg10[%c0_36, %c0_37, %c0_38, %c0_39] : memref<2x2x8x16xf32, #tpu.memory_space<vmem>>, vector<1x1x8x16xf32>
    %43 = vector.shape_cast %42 : vector<1x1x8x16xf32> to vector<8x16xf32>
    %cst_40 = arith.constant dense<0.000000e+00> : vector<16x16xf32>
    %44 = tpu.matmul %41, %43, %cst_40 {dimension_numbers = #tpu.dot_dimension_numbers<[1], [0], [0], [1], [0, 0, 1, 1], [], []>} : vector<16x8xf32>, vector<8x16xf32>, vector<16x16xf32> -> vector<16x16xf32>
    %c0_41 = arith.constant 0 : index
    %c1 = arith.constant 1 : index
    %c0_42 = arith.constant 0 : index
    %c0_43 = arith.constant 0 : index
    %45 = vector.load %arg4[%c0_41, %c1, %c0_42, %c0_43] : memref<2x2x16x8xf32, #tpu.memory_space<vmem>>, vector<1x1x16x8xf32>
    %46 = vector.shape_cast %45 : vector<1x1x16x8xf32> to vector<16x8xf32>
    %cst_44 = arith.constant dense<0.000000e+00> : vector<16x8xf32>
    %47 = tpu.matmul %5, %46, %cst_44 {dimension_numbers = #tpu.dot_dimension_numbers<[1], [0], [0], [1], [0, 0, 1, 1], [], []>} : vector<16x16xf32>, vector<16x8xf32>, vector<16x8xf32> -> vector<16x8xf32>
    %c0_45 = arith.constant 0 : index
    %c1_46 = arith.constant 1 : index
    %c0_47 = arith.constant 0 : index
    %c0_48 = arith.constant 0 : index
    %48 = vector.load %arg5[%c0_45, %c1_46, %c0_47, %c0_48] : memref<2x2x1x8xf32, #tpu.memory_space<vmem>>, vector<1x1x1x8xf32>
    %49 = vector.shape_cast %48 : vector<1x1x1x8xf32> to vector<1x8xf32>
    %50 = vector.broadcast %49 : vector<1x8xf32> to vector<16x8xf32>
    %51 = arith.addf %47, %50 : vector<16x8xf32>
    %c0_49 = arith.constant 0 : index
    %c1_50 = arith.constant 1 : index
    %c0_51 = arith.constant 0 : index
    %c0_52 = arith.constant 0 : index
    %52 = vector.load %arg6[%c0_49, %c1_50, %c0_51, %c0_52] : memref<2x2x16x8xf32, #tpu.memory_space<vmem>>, vector<1x1x16x8xf32>
    %53 = vector.shape_cast %52 : vector<1x1x16x8xf32> to vector<16x8xf32>
    %cst_53 = arith.constant dense<0.000000e+00> : vector<16x8xf32>
    %54 = tpu.matmul %5, %53, %cst_53 {dimension_numbers = #tpu.dot_dimension_numbers<[1], [0], [0], [1], [0, 0, 1, 1], [], []>} : vector<16x16xf32>, vector<16x8xf32>, vector<16x8xf32> -> vector<16x8xf32>
    %c0_54 = arith.constant 0 : index
    %c1_55 = arith.constant 1 : index
    %c0_56 = arith.constant 0 : index
    %c0_57 = arith.constant 0 : index
    %55 = vector.load %arg7[%c0_54, %c1_55, %c0_56, %c0_57] : memref<2x2x1x8xf32, #tpu.memory_space<vmem>>, vector<1x1x1x8xf32>
    %56 = vector.shape_cast %55 : vector<1x1x1x8xf32> to vector<1x8xf32>
    %57 = vector.broadcast %56 : vector<1x8xf32> to vector<16x8xf32>
    %58 = arith.addf %54, %57 : vector<16x8xf32>
    %c0_58 = arith.constant 0 : index
    %c1_59 = arith.constant 1 : index
    %c0_60 = arith.constant 0 : index
    %c0_61 = arith.constant 0 : index
    %59 = vector.load %arg8[%c0_58, %c1_59, %c0_60, %c0_61] : memref<2x2x16x8xf32, #tpu.memory_space<vmem>>, vector<1x1x16x8xf32>
    %60 = vector.shape_cast %59 : vector<1x1x16x8xf32> to vector<16x8xf32>
    %cst_62 = arith.constant dense<0.000000e+00> : vector<16x8xf32>
    %61 = tpu.matmul %5, %60, %cst_62 {dimension_numbers = #tpu.dot_dimension_numbers<[1], [0], [0], [1], [0, 0, 1, 1], [], []>} : vector<16x16xf32>, vector<16x8xf32>, vector<16x8xf32> -> vector<16x8xf32>
    %c0_63 = arith.constant 0 : index
    %c1_64 = arith.constant 1 : index
    %c0_65 = arith.constant 0 : index
    %c0_66 = arith.constant 0 : index
    %62 = vector.load %arg9[%c0_63, %c1_64, %c0_65, %c0_66] : memref<2x2x1x8xf32, #tpu.memory_space<vmem>>, vector<1x1x1x8xf32>
    %63 = vector.shape_cast %62 : vector<1x1x1x8xf32> to vector<1x8xf32>
    %64 = vector.broadcast %63 : vector<1x8xf32> to vector<16x8xf32>
    %65 = arith.addf %61, %64 : vector<16x8xf32>
    %66 = vector.shape_cast %51 : vector<16x8xf32> to vector<2x8x8xf32>
    %67 = vector.shape_cast %58 : vector<16x8xf32> to vector<2x8x8xf32>
    %68 = vector.shape_cast %65 : vector<16x8xf32> to vector<2x8x8xf32>
    "tpu.trace_start"() <{level = 10 : i32, message = "bqd,bkd->bqk"}> : () -> ()
    %cst_67 = arith.constant dense<0.000000e+00> : vector<2x8x8xf32>
    %69 = tpu.matmul %66, %67, %cst_67 {dimension_numbers = #tpu.dot_dimension_numbers<[2], [2], [1], [1], [0, 0, 0, 1, 1, 1], [0], [0]>} : vector<2x8x8xf32>, vector<2x8x8xf32>, vector<2x8x8xf32> -> vector<2x8x8xf32>
    "tpu.trace_stop"() : () -> ()
    %cst_68 = arith.constant dense<0xFF800000> : vector<2x8xf32>
    %70 = vector.multi_reduction <maximumf>, %69, %cst_68 [2] : vector<2x8x8xf32> to vector<2x8xf32>
    %71 = vector.shape_cast %70 : vector<2x8xf32> to vector<2x8x1xf32>
    %72 = vector.broadcast %71 : vector<2x8x1xf32> to vector<2x8x8xf32>
    %73 = arith.subf %69, %72 : vector<2x8x8xf32>
    %74 = math.exp %73 : vector<2x8x8xf32>
    %cst_69 = arith.constant dense<0.000000e+00> : vector<2x8xf32>
    %75 = vector.multi_reduction <add>, %74, %cst_69 [2] : vector<2x8x8xf32> to vector<2x8xf32>
    %76 = vector.shape_cast %75 : vector<2x8xf32> to vector<2x8x1xf32>
    %77 = vector.broadcast %76 : vector<2x8x1xf32> to vector<2x8x8xf32>
    %78 = arith.divf %74, %77 : vector<2x8x8xf32>
    "tpu.trace_start"() <{level = 10 : i32, message = "bqk,bkd->bqd"}> : () -> ()
    %cst_70 = arith.constant dense<0.000000e+00> : vector<2x8x8xf32>
    %79 = tpu.matmul %78, %68, %cst_70 {dimension_numbers = #tpu.dot_dimension_numbers<[2], [1], [1], [2], [0, 0, 0, 1, 1, 2], [0], [0]>} : vector<2x8x8xf32>, vector<2x8x8xf32>, vector<2x8x8xf32> -> vector<2x8x8xf32>
    "tpu.trace_stop"() : () -> ()
    %80 = vector.shape_cast %79 : vector<2x8x8xf32> to vector<16x8xf32>
    %c0_71 = arith.constant 0 : index
    %c1_72 = arith.constant 1 : index
    %c0_73 = arith.constant 0 : index
    %c0_74 = arith.constant 0 : index
    %81 = vector.load %arg10[%c0_71, %c1_72, %c0_73, %c0_74] : memref<2x2x8x16xf32, #tpu.memory_space<vmem>>, vector<1x1x8x16xf32>
    %82 = vector.shape_cast %81 : vector<1x1x8x16xf32> to vector<8x16xf32>
    %cst_75 = arith.constant dense<0.000000e+00> : vector<16x16xf32>
    %83 = tpu.matmul %80, %82, %cst_75 {dimension_numbers = #tpu.dot_dimension_numbers<[1], [0], [0], [1], [0, 0, 1, 1], [], []>} : vector<16x8xf32>, vector<8x16xf32>, vector<16x16xf32> -> vector<16x16xf32>
    %84 = arith.addf %44, %83 : vector<16x16xf32>
    %c0_76 = arith.constant 0 : index
    %c0_77 = arith.constant 0 : index
    %c0_78 = arith.constant 0 : index
    %85 = vector.load %arg11[%c0_76, %c0_77, %c0_78] : memref<2x1x16xf32, #tpu.memory_space<vmem>>, vector<1x1x16xf32>
    %86 = vector.shape_cast %85 : vector<1x1x16xf32> to vector<1x16xf32>
    %87 = vector.broadcast %86 : vector<1x16xf32> to vector<16x16xf32>
    %88 = arith.addf %84, %87 : vector<16x16xf32>
    %89 = arith.addf %5, %88 : vector<16x16xf32>
    %c0_79 = arith.constant 0 : index
    %c0_80 = arith.constant 0 : index
    %c0_81 = arith.constant 0 : index
    %90 = vector.load %arg12[%c0_79, %c0_80, %c0_81] : memref<2x1x16xf32, #tpu.memory_space<vmem>>, vector<1x1x16xf32>
    %91 = vector.shape_cast %90 : vector<1x1x16xf32> to vector<1x16xf32>
    %c0_82 = arith.constant 0 : index
    %c0_83 = arith.constant 0 : index
    %c0_84 = arith.constant 0 : index
    %92 = vector.load %arg13[%c0_82, %c0_83, %c0_84] : memref<2x1x16xf32, #tpu.memory_space<vmem>>, vector<1x1x16xf32>
    %93 = vector.shape_cast %92 : vector<1x1x16xf32> to vector<1x16xf32>
    %cst_85 = arith.constant dense<0.000000e+00> : vector<16xf32>
    %94 = vector.multi_reduction <add>, %89, %cst_85 [1] : vector<16x16xf32> to vector<16xf32>
    %95 = vector.shape_cast %94 : vector<16xf32> to vector<16x1xf32>
    %cst_86 = arith.constant 1.600000e+01 : f32
    %96 = vector.broadcast %cst_86 : f32 to vector<16x1xf32>
    %97 = arith.divf %95, %96 : vector<16x1xf32>
    %98 = vector.broadcast %97 : vector<16x1xf32> to vector<16x16xf32>
    %99 = arith.subf %89, %98 : vector<16x16xf32>
    %100 = arith.mulf %99, %99 : vector<16x16xf32>
    %cst_87 = arith.constant dense<0.000000e+00> : vector<16xf32>
    %101 = vector.multi_reduction <add>, %100, %cst_87 [1] : vector<16x16xf32> to vector<16xf32>
    %102 = vector.shape_cast %101 : vector<16xf32> to vector<16x1xf32>
    %cst_88 = arith.constant 1.600000e+01 : f32
    %103 = vector.broadcast %cst_88 : f32 to vector<16x1xf32>
    %104 = arith.divf %102, %103 : vector<16x1xf32>
    %105 = vector.broadcast %97 : vector<16x1xf32> to vector<16x16xf32>
    %106 = arith.subf %89, %105 : vector<16x16xf32>
    %cst_89 = arith.constant 9.99999974E-6 : f32
    %107 = vector.broadcast %cst_89 : f32 to vector<16x1xf32>
    %108 = arith.addf %104, %107 : vector<16x1xf32>
    %109 = math.rsqrt %108 : vector<16x1xf32>
    %110 = vector.broadcast %109 : vector<16x1xf32> to vector<16x16xf32>
    %111 = arith.mulf %106, %110 : vector<16x16xf32>
    %112 = vector.broadcast %91 : vector<1x16xf32> to vector<16x16xf32>
    %113 = arith.mulf %111, %112 : vector<16x16xf32>
    %114 = vector.broadcast %93 : vector<1x16xf32> to vector<16x16xf32>
    %115 = arith.addf %113, %114 : vector<16x16xf32>
    %116 = arith.truncf %115 : vector<16x16xf32> to vector<16x16xbf16>
    %c0_90 = arith.constant 0 : index
    %c0_91 = arith.constant 0 : index
    %c0_92 = arith.constant 0 : index
    %117 = vector.load %arg14[%c0_90, %c0_91, %c0_92] : memref<2x16x2048xbf16, #tpu.memory_space<vmem>>, vector<1x16x2048xbf16>
    %118 = vector.shape_cast %117 : vector<1x16x2048xbf16> to vector<16x2048xbf16>
    %cst_93 = arith.constant dense<0.000000e+00> : vector<16x2048xf32>
    %119 = tpu.matmul %116, %118, %cst_93 {dimension_numbers = #tpu.dot_dimension_numbers<[1], [0], [0], [1], [0, 0, 1, 1], [], []>} : vector<16x16xbf16>, vector<16x2048xbf16>, vector<16x2048xf32> -> vector<16x2048xf32>
    %c0_94 = arith.constant 0 : index
    %c0_95 = arith.constant 0 : index
    %c0_96 = arith.constant 0 : index
    %120 = vector.load %arg15[%c0_94, %c0_95, %c0_96] : memref<2x1x2048xf32, #tpu.memory_space<vmem>>, vector<1x1x2048xf32>
    %121 = vector.shape_cast %120 : vector<1x1x2048xf32> to vector<1x2048xf32>
    %122 = vector.broadcast %121 : vector<1x2048xf32> to vector<16x2048xf32>
    %123 = arith.addf %119, %122 : vector<16x2048xf32>
    %cst_97 = arith.constant 0.000000e+00 : f32
    %124 = vector.broadcast %cst_97 : f32 to vector<16x2048xf32>
    %125 = arith.maximumf %123, %124 : vector<16x2048xf32>
    %126 = arith.truncf %125 : vector<16x2048xf32> to vector<16x2048xbf16>
    %c0_98 = arith.constant 0 : index
    %c0_99 = arith.constant 0 : index
    %c0_100 = arith.constant 0 : index
    %127 = vector.load %arg16[%c0_98, %c0_99, %c0_100] : memref<2x2048x16xbf16, #tpu.memory_space<vmem>>, vector<1x2048x16xbf16>
    %128 = vector.shape_cast %127 : vector<1x2048x16xbf16> to vector<2048x16xbf16>
    %cst_101 = arith.constant dense<0.000000e+00> : vector<16x16xf32>
    %129 = tpu.matmul %126, %128, %cst_101 {dimension_numbers = #tpu.dot_dimension_numbers<[1], [0], [0], [1], [0, 0, 1, 1], [], []>} : vector<16x2048xbf16>, vector<2048x16xbf16>, vector<16x16xf32> -> vector<16x16xf32>
    %c0_102 = arith.constant 0 : index
    %c0_103 = arith.constant 0 : index
    %c0_104 = arith.constant 0 : index
    %130 = vector.load %arg17[%c0_102, %c0_103, %c0_104] : memref<2x1x16xf32, #tpu.memory_space<vmem>>, vector<1x1x16xf32>
    %131 = vector.shape_cast %130 : vector<1x1x16xf32> to vector<1x16xf32>
    %132 = vector.broadcast %131 : vector<1x16xf32> to vector<16x16xf32>
    %133 = arith.addf %129, %132 : vector<16x16xf32>
    %134 = arith.addf %115, %133 : vector<16x16xf32>
    %c0_105 = arith.constant 0 : index
    %c0_106 = arith.constant 0 : index
    %c0_107 = arith.constant 0 : index
    %135 = vector.load %arg18[%c0_105, %c0_106, %c0_107] : memref<2x1x16xf32, #tpu.memory_space<vmem>>, vector<1x1x16xf32>
    %136 = vector.shape_cast %135 : vector<1x1x16xf32> to vector<1x16xf32>
    %c0_108 = arith.constant 0 : index
    %c0_109 = arith.constant 0 : index
    %c0_110 = arith.constant 0 : index
    %137 = vector.load %arg19[%c0_108, %c0_109, %c0_110] : memref<2x1x16xf32, #tpu.memory_space<vmem>>, vector<1x1x16xf32>
    %138 = vector.shape_cast %137 : vector<1x1x16xf32> to vector<1x16xf32>
    %cst_111 = arith.constant dense<0.000000e+00> : vector<16xf32>
    %139 = vector.multi_reduction <add>, %134, %cst_111 [1] : vector<16x16xf32> to vector<16xf32>
    %140 = vector.shape_cast %139 : vector<16xf32> to vector<16x1xf32>
    %cst_112 = arith.constant 1.600000e+01 : f32
    %141 = vector.broadcast %cst_112 : f32 to vector<16x1xf32>
    %142 = arith.divf %140, %141 : vector<16x1xf32>
    %143 = vector.broadcast %142 : vector<16x1xf32> to vector<16x16xf32>
    %144 = arith.subf %134, %143 : vector<16x16xf32>
    %145 = arith.mulf %144, %144 : vector<16x16xf32>
    %cst_113 = arith.constant dense<0.000000e+00> : vector<16xf32>
    %146 = vector.multi_reduction <add>, %145, %cst_113 [1] : vector<16x16xf32> to vector<16xf32>
    %147 = vector.shape_cast %146 : vector<16xf32> to vector<16x1xf32>
    %cst_114 = arith.constant 1.600000e+01 : f32
    %148 = vector.broadcast %cst_114 : f32 to vector<16x1xf32>
    %149 = arith.divf %147, %148 : vector<16x1xf32>
    %150 = vector.broadcast %142 : vector<16x1xf32> to vector<16x16xf32>
    %151 = arith.subf %134, %150 : vector<16x16xf32>
    %cst_115 = arith.constant 9.99999974E-6 : f32
    %152 = vector.broadcast %cst_115 : f32 to vector<16x1xf32>
    %153 = arith.addf %149, %152 : vector<16x1xf32>
    %154 = math.rsqrt %153 : vector<16x1xf32>
    %155 = vector.broadcast %154 : vector<16x1xf32> to vector<16x16xf32>
    %156 = arith.mulf %151, %155 : vector<16x16xf32>
    %157 = vector.broadcast %136 : vector<1x16xf32> to vector<16x16xf32>
    %158 = arith.mulf %156, %157 : vector<16x16xf32>
    %159 = vector.broadcast %138 : vector<1x16xf32> to vector<16x16xf32>
    %160 = arith.addf %158, %159 : vector<16x16xf32>
    %c1_116 = arith.constant 1 : index
    %c0_117 = arith.constant 0 : index
    %c0_118 = arith.constant 0 : index
    %c0_119 = arith.constant 0 : index
    %161 = vector.load %arg4[%c1_116, %c0_117, %c0_118, %c0_119] : memref<2x2x16x8xf32, #tpu.memory_space<vmem>>, vector<1x1x16x8xf32>
    %162 = vector.shape_cast %161 : vector<1x1x16x8xf32> to vector<16x8xf32>
    %cst_120 = arith.constant dense<0.000000e+00> : vector<16x8xf32>
    %163 = tpu.matmul %160, %162, %cst_120 {dimension_numbers = #tpu.dot_dimension_numbers<[1], [0], [0], [1], [0, 0, 1, 1], [], []>} : vector<16x16xf32>, vector<16x8xf32>, vector<16x8xf32> -> vector<16x8xf32>
    %c1_121 = arith.constant 1 : index
    %c0_122 = arith.constant 0 : index
    %c0_123 = arith.constant 0 : index
    %c0_124 = arith.constant 0 : index
    %164 = vector.load %arg5[%c1_121, %c0_122, %c0_123, %c0_124] : memref<2x2x1x8xf32, #tpu.memory_space<vmem>>, vector<1x1x1x8xf32>
    %165 = vector.shape_cast %164 : vector<1x1x1x8xf32> to vector<1x8xf32>
    %166 = vector.broadcast %165 : vector<1x8xf32> to vector<16x8xf32>
    %167 = arith.addf %163, %166 : vector<16x8xf32>
    %c1_125 = arith.constant 1 : index
    %c0_126 = arith.constant 0 : index
    %c0_127 = arith.constant 0 : index
    %c0_128 = arith.constant 0 : index
    %168 = vector.load %arg6[%c1_125, %c0_126, %c0_127, %c0_128] : memref<2x2x16x8xf32, #tpu.memory_space<vmem>>, vector<1x1x16x8xf32>
    %169 = vector.shape_cast %168 : vector<1x1x16x8xf32> to vector<16x8xf32>
    %cst_129 = arith.constant dense<0.000000e+00> : vector<16x8xf32>
    %170 = tpu.matmul %160, %169, %cst_129 {dimension_numbers = #tpu.dot_dimension_numbers<[1], [0], [0], [1], [0, 0, 1, 1], [], []>} : vector<16x16xf32>, vector<16x8xf32>, vector<16x8xf32> -> vector<16x8xf32>
    %c1_130 = arith.constant 1 : index
    %c0_131 = arith.constant 0 : index
    %c0_132 = arith.constant 0 : index
    %c0_133 = arith.constant 0 : index
    %171 = vector.load %arg7[%c1_130, %c0_131, %c0_132, %c0_133] : memref<2x2x1x8xf32, #tpu.memory_space<vmem>>, vector<1x1x1x8xf32>
    %172 = vector.shape_cast %171 : vector<1x1x1x8xf32> to vector<1x8xf32>
    %173 = vector.broadcast %172 : vector<1x8xf32> to vector<16x8xf32>
    %174 = arith.addf %170, %173 : vector<16x8xf32>
    %c1_134 = arith.constant 1 : index
    %c0_135 = arith.constant 0 : index
    %c0_136 = arith.constant 0 : index
    %c0_137 = arith.constant 0 : index
    %175 = vector.load %arg8[%c1_134, %c0_135, %c0_136, %c0_137] : memref<2x2x16x8xf32, #tpu.memory_space<vmem>>, vector<1x1x16x8xf32>
    %176 = vector.shape_cast %175 : vector<1x1x16x8xf32> to vector<16x8xf32>
    %cst_138 = arith.constant dense<0.000000e+00> : vector<16x8xf32>
    %177 = tpu.matmul %160, %176, %cst_138 {dimension_numbers = #tpu.dot_dimension_numbers<[1], [0], [0], [1], [0, 0, 1, 1], [], []>} : vector<16x16xf32>, vector<16x8xf32>, vector<16x8xf32> -> vector<16x8xf32>
    %c1_139 = arith.constant 1 : index
    %c0_140 = arith.constant 0 : index
    %c0_141 = arith.constant 0 : index
    %c0_142 = arith.constant 0 : index
    %178 = vector.load %arg9[%c1_139, %c0_140, %c0_141, %c0_142] : memref<2x2x1x8xf32, #tpu.memory_space<vmem>>, vector<1x1x1x8xf32>
    %179 = vector.shape_cast %178 : vector<1x1x1x8xf32> to vector<1x8xf32>
    %180 = vector.broadcast %179 : vector<1x8xf32> to vector<16x8xf32>
    %181 = arith.addf %177, %180 : vector<16x8xf32>
    %182 = vector.shape_cast %167 : vector<16x8xf32> to vector<2x8x8xf32>
    %183 = vector.shape_cast %174 : vector<16x8xf32> to vector<2x8x8xf32>
    %184 = vector.shape_cast %181 : vector<16x8xf32> to vector<2x8x8xf32>
    "tpu.trace_start"() <{level = 10 : i32, message = "bqd,bkd->bqk"}> : () -> ()
    %cst_143 = arith.constant dense<0.000000e+00> : vector<2x8x8xf32>
    %185 = tpu.matmul %182, %183, %cst_143 {dimension_numbers = #tpu.dot_dimension_numbers<[2], [2], [1], [1], [0, 0, 0, 1, 1, 1], [0], [0]>} : vector<2x8x8xf32>, vector<2x8x8xf32>, vector<2x8x8xf32> -> vector<2x8x8xf32>
    "tpu.trace_stop"() : () -> ()
    %cst_144 = arith.constant dense<0xFF800000> : vector<2x8xf32>
    %186 = vector.multi_reduction <maximumf>, %185, %cst_144 [2] : vector<2x8x8xf32> to vector<2x8xf32>
    %187 = vector.shape_cast %186 : vector<2x8xf32> to vector<2x8x1xf32>
    %188 = vector.broadcast %187 : vector<2x8x1xf32> to vector<2x8x8xf32>
    %189 = arith.subf %185, %188 : vector<2x8x8xf32>
    %190 = math.exp %189 : vector<2x8x8xf32>
    %cst_145 = arith.constant dense<0.000000e+00> : vector<2x8xf32>
    %191 = vector.multi_reduction <add>, %190, %cst_145 [2] : vector<2x8x8xf32> to vector<2x8xf32>
    %192 = vector.shape_cast %191 : vector<2x8xf32> to vector<2x8x1xf32>
    %193 = vector.broadcast %192 : vector<2x8x1xf32> to vector<2x8x8xf32>
    %194 = arith.divf %190, %193 : vector<2x8x8xf32>
    "tpu.trace_start"() <{level = 10 : i32, message = "bqk,bkd->bqd"}> : () -> ()
    %cst_146 = arith.constant dense<0.000000e+00> : vector<2x8x8xf32>
    %195 = tpu.matmul %194, %184, %cst_146 {dimension_numbers = #tpu.dot_dimension_numbers<[2], [1], [1], [2], [0, 0, 0, 1, 1, 2], [0], [0]>} : vector<2x8x8xf32>, vector<2x8x8xf32>, vector<2x8x8xf32> -> vector<2x8x8xf32>
    "tpu.trace_stop"() : () -> ()
    %196 = vector.shape_cast %195 : vector<2x8x8xf32> to vector<16x8xf32>
    %c1_147 = arith.constant 1 : index
    %c0_148 = arith.constant 0 : index
    %c0_149 = arith.constant 0 : index
    %c0_150 = arith.constant 0 : index
    %197 = vector.load %arg10[%c1_147, %c0_148, %c0_149, %c0_150] : memref<2x2x8x16xf32, #tpu.memory_space<vmem>>, vector<1x1x8x16xf32>
    %198 = vector.shape_cast %197 : vector<1x1x8x16xf32> to vector<8x16xf32>
    %cst_151 = arith.constant dense<0.000000e+00> : vector<16x16xf32>
    %199 = tpu.matmul %196, %198, %cst_151 {dimension_numbers = #tpu.dot_dimension_numbers<[1], [0], [0], [1], [0, 0, 1, 1], [], []>} : vector<16x8xf32>, vector<8x16xf32>, vector<16x16xf32> -> vector<16x16xf32>
    %c1_152 = arith.constant 1 : index
    %c1_153 = arith.constant 1 : index
    %c0_154 = arith.constant 0 : index
    %c0_155 = arith.constant 0 : index
    %200 = vector.load %arg4[%c1_152, %c1_153, %c0_154, %c0_155] : memref<2x2x16x8xf32, #tpu.memory_space<vmem>>, vector<1x1x16x8xf32>
    %201 = vector.shape_cast %200 : vector<1x1x16x8xf32> to vector<16x8xf32>
    %cst_156 = arith.constant dense<0.000000e+00> : vector<16x8xf32>
    %202 = tpu.matmul %160, %201, %cst_156 {dimension_numbers = #tpu.dot_dimension_numbers<[1], [0], [0], [1], [0, 0, 1, 1], [], []>} : vector<16x16xf32>, vector<16x8xf32>, vector<16x8xf32> -> vector<16x8xf32>
    %c1_157 = arith.constant 1 : index
    %c1_158 = arith.constant 1 : index
    %c0_159 = arith.constant 0 : index
    %c0_160 = arith.constant 0 : index
    %203 = vector.load %arg5[%c1_157, %c1_158, %c0_159, %c0_160] : memref<2x2x1x8xf32, #tpu.memory_space<vmem>>, vector<1x1x1x8xf32>
    %204 = vector.shape_cast %203 : vector<1x1x1x8xf32> to vector<1x8xf32>
    %205 = vector.broadcast %204 : vector<1x8xf32> to vector<16x8xf32>
    %206 = arith.addf %202, %205 : vector<16x8xf32>
    %c1_161 = arith.constant 1 : index
    %c1_162 = arith.constant 1 : index
    %c0_163 = arith.constant 0 : index
    %c0_164 = arith.constant 0 : index
    %207 = vector.load %arg6[%c1_161, %c1_162, %c0_163, %c0_164] : memref<2x2x16x8xf32, #tpu.memory_space<vmem>>, vector<1x1x16x8xf32>
    %208 = vector.shape_cast %207 : vector<1x1x16x8xf32> to vector<16x8xf32>
    %cst_165 = arith.constant dense<0.000000e+00> : vector<16x8xf32>
    %209 = tpu.matmul %160, %208, %cst_165 {dimension_numbers = #tpu.dot_dimension_numbers<[1], [0], [0], [1], [0, 0, 1, 1], [], []>} : vector<16x16xf32>, vector<16x8xf32>, vector<16x8xf32> -> vector<16x8xf32>
    %c1_166 = arith.constant 1 : index
    %c1_167 = arith.constant 1 : index
    %c0_168 = arith.constant 0 : index
    %c0_169 = arith.constant 0 : index
    %210 = vector.load %arg7[%c1_166, %c1_167, %c0_168, %c0_169] : memref<2x2x1x8xf32, #tpu.memory_space<vmem>>, vector<1x1x1x8xf32>
    %211 = vector.shape_cast %210 : vector<1x1x1x8xf32> to vector<1x8xf32>
    %212 = vector.broadcast %211 : vector<1x8xf32> to vector<16x8xf32>
    %213 = arith.addf %209, %212 : vector<16x8xf32>
    %c1_170 = arith.constant 1 : index
    %c1_171 = arith.constant 1 : index
    %c0_172 = arith.constant 0 : index
    %c0_173 = arith.constant 0 : index
    %214 = vector.load %arg8[%c1_170, %c1_171, %c0_172, %c0_173] : memref<2x2x16x8xf32, #tpu.memory_space<vmem>>, vector<1x1x16x8xf32>
    %215 = vector.shape_cast %214 : vector<1x1x16x8xf32> to vector<16x8xf32>
    %cst_174 = arith.constant dense<0.000000e+00> : vector<16x8xf32>
    %216 = tpu.matmul %160, %215, %cst_174 {dimension_numbers = #tpu.dot_dimension_numbers<[1], [0], [0], [1], [0, 0, 1, 1], [], []>} : vector<16x16xf32>, vector<16x8xf32>, vector<16x8xf32> -> vector<16x8xf32>
    %c1_175 = arith.constant 1 : index
    %c1_176 = arith.constant 1 : index
    %c0_177 = arith.constant 0 : index
    %c0_178 = arith.constant 0 : index
    %217 = vector.load %arg9[%c1_175, %c1_176, %c0_177, %c0_178] : memref<2x2x1x8xf32, #tpu.memory_space<vmem>>, vector<1x1x1x8xf32>
    %218 = vector.shape_cast %217 : vector<1x1x1x8xf32> to vector<1x8xf32>
    %219 = vector.broadcast %218 : vector<1x8xf32> to vector<16x8xf32>
    %220 = arith.addf %216, %219 : vector<16x8xf32>
    %221 = vector.shape_cast %206 : vector<16x8xf32> to vector<2x8x8xf32>
    %222 = vector.shape_cast %213 : vector<16x8xf32> to vector<2x8x8xf32>
    %223 = vector.shape_cast %220 : vector<16x8xf32> to vector<2x8x8xf32>
    "tpu.trace_start"() <{level = 10 : i32, message = "bqd,bkd->bqk"}> : () -> ()
    %cst_179 = arith.constant dense<0.000000e+00> : vector<2x8x8xf32>
    %224 = tpu.matmul %221, %222, %cst_179 {dimension_numbers = #tpu.dot_dimension_numbers<[2], [2], [1], [1], [0, 0, 0, 1, 1, 1], [0], [0]>} : vector<2x8x8xf32>, vector<2x8x8xf32>, vector<2x8x8xf32> -> vector<2x8x8xf32>
    "tpu.trace_stop"() : () -> ()
    %cst_180 = arith.constant dense<0xFF800000> : vector<2x8xf32>
    %225 = vector.multi_reduction <maximumf>, %224, %cst_180 [2] : vector<2x8x8xf32> to vector<2x8xf32>
    %226 = vector.shape_cast %225 : vector<2x8xf32> to vector<2x8x1xf32>
    %227 = vector.broadcast %226 : vector<2x8x1xf32> to vector<2x8x8xf32>
    %228 = arith.subf %224, %227 : vector<2x8x8xf32>
    %229 = math.exp %228 : vector<2x8x8xf32>
    %cst_181 = arith.constant dense<0.000000e+00> : vector<2x8xf32>
    %230 = vector.multi_reduction <add>, %229, %cst_181 [2] : vector<2x8x8xf32> to vector<2x8xf32>
    %231 = vector.shape_cast %230 : vector<2x8xf32> to vector<2x8x1xf32>
    %232 = vector.broadcast %231 : vector<2x8x1xf32> to vector<2x8x8xf32>
    %233 = arith.divf %229, %232 : vector<2x8x8xf32>
    "tpu.trace_start"() <{level = 10 : i32, message = "bqk,bkd->bqd"}> : () -> ()
    %cst_182 = arith.constant dense<0.000000e+00> : vector<2x8x8xf32>
    %234 = tpu.matmul %233, %223, %cst_182 {dimension_numbers = #tpu.dot_dimension_numbers<[2], [1], [1], [2], [0, 0, 0, 1, 1, 2], [0], [0]>} : vector<2x8x8xf32>, vector<2x8x8xf32>, vector<2x8x8xf32> -> vector<2x8x8xf32>
    "tpu.trace_stop"() : () -> ()
    %235 = vector.shape_cast %234 : vector<2x8x8xf32> to vector<16x8xf32>
    %c1_183 = arith.constant 1 : index
    %c1_184 = arith.constant 1 : index
    %c0_185 = arith.constant 0 : index
    %c0_186 = arith.constant 0 : index
    %236 = vector.load %arg10[%c1_183, %c1_184, %c0_185, %c0_186] : memref<2x2x8x16xf32, #tpu.memory_space<vmem>>, vector<1x1x8x16xf32>
    %237 = vector.shape_cast %236 : vector<1x1x8x16xf32> to vector<8x16xf32>
    %cst_187 = arith.constant dense<0.000000e+00> : vector<16x16xf32>
    %238 = tpu.matmul %235, %237, %cst_187 {dimension_numbers = #tpu.dot_dimension_numbers<[1], [0], [0], [1], [0, 0, 1, 1], [], []>} : vector<16x8xf32>, vector<8x16xf32>, vector<16x16xf32> -> vector<16x16xf32>
    %239 = arith.addf %199, %238 : vector<16x16xf32>
    %c1_188 = arith.constant 1 : index
    %c0_189 = arith.constant 0 : index
    %c0_190 = arith.constant 0 : index
    %240 = vector.load %arg11[%c1_188, %c0_189, %c0_190] : memref<2x1x16xf32, #tpu.memory_space<vmem>>, vector<1x1x16xf32>
    %241 = vector.shape_cast %240 : vector<1x1x16xf32> to vector<1x16xf32>
    %242 = vector.broadcast %241 : vector<1x16xf32> to vector<16x16xf32>
    %243 = arith.addf %239, %242 : vector<16x16xf32>
    %244 = arith.addf %160, %243 : vector<16x16xf32>
    %c1_191 = arith.constant 1 : index
    %c0_192 = arith.constant 0 : index
    %c0_193 = arith.constant 0 : index
    %245 = vector.load %arg12[%c1_191, %c0_192, %c0_193] : memref<2x1x16xf32, #tpu.memory_space<vmem>>, vector<1x1x16xf32>
    %246 = vector.shape_cast %245 : vector<1x1x16xf32> to vector<1x16xf32>
    %c1_194 = arith.constant 1 : index
    %c0_195 = arith.constant 0 : index
    %c0_196 = arith.constant 0 : index
    %247 = vector.load %arg13[%c1_194, %c0_195, %c0_196] : memref<2x1x16xf32, #tpu.memory_space<vmem>>, vector<1x1x16xf32>
    %248 = vector.shape_cast %247 : vector<1x1x16xf32> to vector<1x16xf32>
    %cst_197 = arith.constant dense<0.000000e+00> : vector<16xf32>
    %249 = vector.multi_reduction <add>, %244, %cst_197 [1] : vector<16x16xf32> to vector<16xf32>
    %250 = vector.shape_cast %249 : vector<16xf32> to vector<16x1xf32>
    %cst_198 = arith.constant 1.600000e+01 : f32
    %251 = vector.broadcast %cst_198 : f32 to vector<16x1xf32>
    %252 = arith.divf %250, %251 : vector<16x1xf32>
    %253 = vector.broadcast %252 : vector<16x1xf32> to vector<16x16xf32>
    %254 = arith.subf %244, %253 : vector<16x16xf32>
    %255 = arith.mulf %254, %254 : vector<16x16xf32>
    %cst_199 = arith.constant dense<0.000000e+00> : vector<16xf32>
    %256 = vector.multi_reduction <add>, %255, %cst_199 [1] : vector<16x16xf32> to vector<16xf32>
    %257 = vector.shape_cast %256 : vector<16xf32> to vector<16x1xf32>
    %cst_200 = arith.constant 1.600000e+01 : f32
    %258 = vector.broadcast %cst_200 : f32 to vector<16x1xf32>
    %259 = arith.divf %257, %258 : vector<16x1xf32>
    %260 = vector.broadcast %252 : vector<16x1xf32> to vector<16x16xf32>
    %261 = arith.subf %244, %260 : vector<16x16xf32>
    %cst_201 = arith.constant 9.99999974E-6 : f32
    %262 = vector.broadcast %cst_201 : f32 to vector<16x1xf32>
    %263 = arith.addf %259, %262 : vector<16x1xf32>
    %264 = math.rsqrt %263 : vector<16x1xf32>
    %265 = vector.broadcast %264 : vector<16x1xf32> to vector<16x16xf32>
    %266 = arith.mulf %261, %265 : vector<16x16xf32>
    %267 = vector.broadcast %246 : vector<1x16xf32> to vector<16x16xf32>
    %268 = arith.mulf %266, %267 : vector<16x16xf32>
    %269 = vector.broadcast %248 : vector<1x16xf32> to vector<16x16xf32>
    %270 = arith.addf %268, %269 : vector<16x16xf32>
    %271 = arith.truncf %270 : vector<16x16xf32> to vector<16x16xbf16>
    %c1_202 = arith.constant 1 : index
    %c0_203 = arith.constant 0 : index
    %c0_204 = arith.constant 0 : index
    %272 = vector.load %arg14[%c1_202, %c0_203, %c0_204] : memref<2x16x2048xbf16, #tpu.memory_space<vmem>>, vector<1x16x2048xbf16>
    %273 = vector.shape_cast %272 : vector<1x16x2048xbf16> to vector<16x2048xbf16>
    %cst_205 = arith.constant dense<0.000000e+00> : vector<16x2048xf32>
    %274 = tpu.matmul %271, %273, %cst_205 {dimension_numbers = #tpu.dot_dimension_numbers<[1], [0], [0], [1], [0, 0, 1, 1], [], []>} : vector<16x16xbf16>, vector<16x2048xbf16>, vector<16x2048xf32> -> vector<16x2048xf32>
    %c1_206 = arith.constant 1 : index
    %c0_207 = arith.constant 0 : index
    %c0_208 = arith.constant 0 : index
    %275 = vector.load %arg15[%c1_206, %c0_207, %c0_208] : memref<2x1x2048xf32, #tpu.memory_space<vmem>>, vector<1x1x2048xf32>
    %276 = vector.shape_cast %275 : vector<1x1x2048xf32> to vector<1x2048xf32>
    %277 = vector.broadcast %276 : vector<1x2048xf32> to vector<16x2048xf32>
    %278 = arith.addf %274, %277 : vector<16x2048xf32>
    %cst_209 = arith.constant 0.000000e+00 : f32
    %279 = vector.broadcast %cst_209 : f32 to vector<16x2048xf32>
    %280 = arith.maximumf %278, %279 : vector<16x2048xf32>
    %281 = arith.truncf %280 : vector<16x2048xf32> to vector<16x2048xbf16>
    %c1_210 = arith.constant 1 : index
    %c0_211 = arith.constant 0 : index
    %c0_212 = arith.constant 0 : index
    %282 = vector.load %arg16[%c1_210, %c0_211, %c0_212] : memref<2x2048x16xbf16, #tpu.memory_space<vmem>>, vector<1x2048x16xbf16>
    %283 = vector.shape_cast %282 : vector<1x2048x16xbf16> to vector<2048x16xbf16>
    %cst_213 = arith.constant dense<0.000000e+00> : vector<16x16xf32>
    %284 = tpu.matmul %281, %283, %cst_213 {dimension_numbers = #tpu.dot_dimension_numbers<[1], [0], [0], [1], [0, 0, 1, 1], [], []>} : vector<16x2048xbf16>, vector<2048x16xbf16>, vector<16x16xf32> -> vector<16x16xf32>
    %c1_214 = arith.constant 1 : index
    %c0_215 = arith.constant 0 : index
    %c0_216 = arith.constant 0 : index
    %285 = vector.load %arg17[%c1_214, %c0_215, %c0_216] : memref<2x1x16xf32, #tpu.memory_space<vmem>>, vector<1x1x16xf32>
    %286 = vector.shape_cast %285 : vector<1x1x16xf32> to vector<1x16xf32>
    %287 = vector.broadcast %286 : vector<1x16xf32> to vector<16x16xf32>
    %288 = arith.addf %284, %287 : vector<16x16xf32>
    %289 = arith.addf %270, %288 : vector<16x16xf32>
    %c1_217 = arith.constant 1 : index
    %c0_218 = arith.constant 0 : index
    %c0_219 = arith.constant 0 : index
    %290 = vector.load %arg18[%c1_217, %c0_218, %c0_219] : memref<2x1x16xf32, #tpu.memory_space<vmem>>, vector<1x1x16xf32>
    %291 = vector.shape_cast %290 : vector<1x1x16xf32> to vector<1x16xf32>
    %c1_220 = arith.constant 1 : index
    %c0_221 = arith.constant 0 : index
    %c0_222 = arith.constant 0 : index
    %292 = vector.load %arg19[%c1_220, %c0_221, %c0_222] : memref<2x1x16xf32, #tpu.memory_space<vmem>>, vector<1x1x16xf32>
    %293 = vector.shape_cast %292 : vector<1x1x16xf32> to vector<1x16xf32>
    %cst_223 = arith.constant dense<0.000000e+00> : vector<16xf32>
    %294 = vector.multi_reduction <add>, %289, %cst_223 [1] : vector<16x16xf32> to vector<16xf32>
    %295 = vector.shape_cast %294 : vector<16xf32> to vector<16x1xf32>
    %cst_224 = arith.constant 1.600000e+01 : f32
    %296 = vector.broadcast %cst_224 : f32 to vector<16x1xf32>
    %297 = arith.divf %295, %296 : vector<16x1xf32>
    %298 = vector.broadcast %297 : vector<16x1xf32> to vector<16x16xf32>
    %299 = arith.subf %289, %298 : vector<16x16xf32>
    %300 = arith.mulf %299, %299 : vector<16x16xf32>
    %cst_225 = arith.constant dense<0.000000e+00> : vector<16xf32>
    %301 = vector.multi_reduction <add>, %300, %cst_225 [1] : vector<16x16xf32> to vector<16xf32>
    %302 = vector.shape_cast %301 : vector<16xf32> to vector<16x1xf32>
    %cst_226 = arith.constant 1.600000e+01 : f32
    %303 = vector.broadcast %cst_226 : f32 to vector<16x1xf32>
    %304 = arith.divf %302, %303 : vector<16x1xf32>
    %305 = vector.broadcast %297 : vector<16x1xf32> to vector<16x16xf32>
    %306 = arith.subf %289, %305 : vector<16x16xf32>
    %cst_227 = arith.constant 9.99999974E-6 : f32
    %307 = vector.broadcast %cst_227 : f32 to vector<16x1xf32>
    %308 = arith.addf %304, %307 : vector<16x1xf32>
    %309 = math.rsqrt %308 : vector<16x1xf32>
    %310 = vector.broadcast %309 : vector<16x1xf32> to vector<16x16xf32>
    %311 = arith.mulf %306, %310 : vector<16x16xf32>
    %312 = vector.broadcast %291 : vector<1x16xf32> to vector<16x16xf32>
    %313 = arith.mulf %311, %312 : vector<16x16xf32>
    %314 = vector.broadcast %293 : vector<1x16xf32> to vector<16x16xf32>
    %315 = arith.addf %313, %314 : vector<16x16xf32>
    %c0_228 = arith.constant 0 : index
    %c0_229 = arith.constant 0 : index
    %316 = vector.load %arg20[%c0_228, %c0_229] : memref<16x2xf32, #tpu.memory_space<vmem>>, vector<16x2xf32>
    %cst_230 = arith.constant dense<0.000000e+00> : vector<16x2xf32>
    %317 = tpu.matmul %315, %316, %cst_230 {dimension_numbers = #tpu.dot_dimension_numbers<[1], [0], [0], [1], [0, 0, 1, 1], [], []>} : vector<16x16xf32>, vector<16x2xf32>, vector<16x2xf32> -> vector<16x2xf32>
    %c0_231 = arith.constant 0 : index
    %c0_232 = arith.constant 0 : index
    %318 = vector.load %arg21[%c0_231, %c0_232] : memref<1x2xf32, #tpu.memory_space<vmem>>, vector<1x2xf32>
    %319 = vector.broadcast %318 : vector<1x2xf32> to vector<16x2xf32>
    %320 = arith.addf %317, %319 : vector<16x2xf32>
    %c0_233 = arith.constant 0 : index
    %c0_234 = arith.constant 0 : index
    %321 = vector.load %arg22[%c0_233, %c0_234] : memref<16x2xf32, #tpu.memory_space<vmem>>, vector<16x2xf32>
    tpu.vector_store %arg22[%c0_233, %c0_234], %320 {strides = array<i32>} : memref<16x2xf32, #tpu.memory_space<vmem>>, vector<16x2xf32>,
    return
  }
  func.func @transform_0(%arg0: i32) -> (i32, i32) {
    %c0_i32 = arith.constant 0 : i32
    %c0_i32_0 = arith.constant 0 : i32
    return %arg0, %c0_i32 : i32, i32
  }
  func.func @transform_1(%arg0: i32) -> (i32, i32) {
    %c0_i32 = arith.constant 0 : i32
    %c0_i32_0 = arith.constant 0 : i32
    %c0_i32_1 = arith.constant 0 : i32
    return %c0_i32, %c0_i32_0 : i32, i32
  }
  func.func @transform_2(%arg0: i32) -> (i32, i32) {
    %c0_i32 = arith.constant 0 : i32
    %c0_i32_0 = arith.constant 0 : i32
    %c0_i32_1 = arith.constant 0 : i32
    return %c0_i32, %c0_i32_0 : i32, i32
  }
  func.func @transform_3(%arg0: i32) -> (i32, i32, i32, i32) {
    %c0_i32 = arith.constant 0 : i32
    %c0_i32_0 = arith.constant 0 : i32
    %c0_i32_1 = arith.constant 0 : i32
    %c0_i32_2 = arith.constant 0 : i32
    %c0_i32_3 = arith.constant 0 : i32
    return %c0_i32, %c0_i32_0, %c0_i32_1, %c0_i32_2 : i32, i32, i32, i32
  }
  func.func @transform_4(%arg0: i32) -> (i32, i32, i32, i32) {
    %c0_i32 = arith.constant 0 : i32
    %c0_i32_0 = arith.constant 0 : i32
    %c0_i32_1 = arith.constant 0 : i32
    %c0_i32_2 = arith.constant 0 : i32
    %c0_i32_3 = arith.constant 0 : i32
    return %c0_i32, %c0_i32_0, %c0_i32_1, %c0_i32_2 : i32, i32, i32, i32
  }
  func.func @transform_5(%arg0: i32) -> (i32, i32, i32, i32) {
    %c0_i32 = arith.constant 0 : i32
    %c0_i32_0 = arith.constant 0 : i32
    %c0_i32_1 = arith.constant 0 : i32
    %c0_i32_2 = arith.constant 0 : i32
    %c0_i32_3 = arith.constant 0 : i32
    return %c0_i32, %c0_i32_0, %c0_i32_1, %c0_i32_2 : i32, i32, i32, i32
  }
  func.func @transform_6(%arg0: i32) -> (i32, i32, i32, i32) {
    %c0_i32 = arith.constant 0 : i32
    %c0_i32_0 = arith.constant 0 : i32
    %c0_i32_1 = arith.constant 0 : i32
    %c0_i32_2 = arith.constant 0 : i32
    %c0_i32_3 = arith.constant 0 : i32
    return %c0_i32, %c0_i32_0, %c0_i32_1, %c0_i32_2 : i32, i32, i32, i32
  }
  func.func @transform_7(%arg0: i32) -> (i32, i32, i32, i32) {
    %c0_i32 = arith.constant 0 : i32
    %c0_i32_0 = arith.constant 0 : i32
    %c0_i32_1 = arith.constant 0 : i32
    %c0_i32_2 = arith.constant 0 : i32
    %c0_i32_3 = arith.constant 0 : i32
    return %c0_i32, %c0_i32_0, %c0_i32_1, %c0_i32_2 : i32, i32, i32, i32
  }
  func.func @transform_8(%arg0: i32) -> (i32, i32, i32, i32) {
    %c0_i32 = arith.constant 0 : i32
    %c0_i32_0 = arith.constant 0 : i32
    %c0_i32_1 = arith.constant 0 : i32
    %c0_i32_2 = arith.constant 0 : i32
    %c0_i32_3 = arith.constant 0 : i32
    return %c0_i32, %c0_i32_0, %c0_i32_1, %c0_i32_2 : i32, i32, i32, i32
  }
  func.func @transform_9(%arg0: i32) -> (i32, i32, i32, i32) {
    %c0_i32 = arith.constant 0 : i32
    %c0_i32_0 = arith.constant 0 : i32
    %c0_i32_1 = arith.constant 0 : i32
    %c0_i32_2 = arith.constant 0 : i32
    %c0_i32_3 = arith.constant 0 : i32
    return %c0_i32, %c0_i32_0, %c0_i32_1, %c0_i32_2 : i32, i32, i32, i32
  }
  func.func @transform_10(%arg0: i32) -> (i32, i32, i32) {
    %c0_i32 = arith.constant 0 : i32
    %c0_i32_0 = arith.constant 0 : i32
    %c0_i32_1 = arith.constant 0 : i32
    %c0_i32_2 = arith.constant 0 : i32
    return %c0_i32, %c0_i32_0, %c0_i32_1 : i32, i32, i32
  }
  func.func @transform_11(%arg0: i32) -> (i32, i32, i32) {
    %c0_i32 = arith.constant 0 : i32
    %c0_i32_0 = arith.constant 0 : i32
    %c0_i32_1 = arith.constant 0 : i32
    %c0_i32_2 = arith.constant 0 : i32
    return %c0_i32, %c0_i32_0, %c0_i32_1 : i32, i32, i32
  }
  func.func @transform_12(%arg0: i32) -> (i32, i32, i32) {
    %c0_i32 = arith.constant 0 : i32
    %c0_i32_0 = arith.constant 0 : i32
    %c0_i32_1 = arith.constant 0 : i32
    %c0_i32_2 = arith.constant 0 : i32
    return %c0_i32, %c0_i32_0, %c0_i32_1 : i32, i32, i32
  }
  func.func @transform_13(%arg0: i32) -> (i32, i32, i32) {
    %c0_i32 = arith.constant 0 : i32
    %c0_i32_0 = arith.constant 0 : i32
    %c0_i32_1 = arith.constant 0 : i32
    %c0_i32_2 = arith.constant 0 : i32
    return %c0_i32, %c0_i32_0, %c0_i32_1 : i32, i32, i32
  }
  func.func @transform_14(%arg0: i32) -> (i32, i32, i32) {
    %c0_i32 = arith.constant 0 : i32
    %c0_i32_0 = arith.constant 0 : i32
    %c0_i32_1 = arith.constant 0 : i32
    %c0_i32_2 = arith.constant 0 : i32
    return %c0_i32, %c0_i32_0, %c0_i32_1 : i32, i32, i32
  }
  func.func @transform_15(%arg0: i32) -> (i32, i32, i32) {
    %c0_i32 = arith.constant 0 : i32
    %c0_i32_0 = arith.constant 0 : i32
    %c0_i32_1 = arith.constant 0 : i32
    %c0_i32_2 = arith.constant 0 : i32
    return %c0_i32, %c0_i32_0, %c0_i32_1 : i32, i32, i32
  }
  func.func @transform_16(%arg0: i32) -> (i32, i32, i32) {
    %c0_i32 = arith.constant 0 : i32
    %c0_i32_0 = arith.constant 0 : i32
    %c0_i32_1 = arith.constant 0 : i32
    %c0_i32_2 = arith.constant 0 : i32
    return %c0_i32, %c0_i32_0, %c0_i32_1 : i32, i32, i32
  }
  func.func @transform_17(%arg0: i32) -> (i32, i32, i32) {
    %c0_i32 = arith.constant 0 : i32
    %c0_i32_0 = arith.constant 0 : i32
    %c0_i32_1 = arith.constant 0 : i32
    %c0_i32_2 = arith.constant 0 : i32
    return %c0_i32, %c0_i32_0, %c0_i32_1 : i32, i32, i32
  }
  func.func @transform_18(%arg0: i32) -> (i32, i32, i32) {
    %c0_i32 = arith.constant 0 : i32
    %c0_i32_0 = arith.constant 0 : i32
    %c0_i32_1 = arith.constant 0 : i32
    %c0_i32_2 = arith.constant 0 : i32
    return %c0_i32, %c0_i32_0, %c0_i32_1 : i32, i32, i32
  }
  func.func @transform_19(%arg0: i32) -> (i32, i32) {
    %c0_i32 = arith.constant 0 : i32
    %c0_i32_0 = arith.constant 0 : i32
    %c0_i32_1 = arith.constant 0 : i32
    return %c0_i32, %c0_i32_0 : i32, i32
  }
  func.func @transform_20(%arg0: i32) -> (i32, i32) {
    %c0_i32 = arith.constant 0 : i32
    %c0_i32_0 = arith.constant 0 : i32
    %c0_i32_1 = arith.constant 0 : i32
    return %c0_i32, %c0_i32_0 : i32, i32
  }
  func.func @transform_21(%arg0: i32) -> (i32, i32) {
    %c0_i32 = arith.constant 0 : i32
    %c0_i32_0 = arith.constant 0 : i32
    return %arg0, %c0_i32 : i32, i32
  }
}

</mosaic_0001>

<bundles_post_ra>
// kernel: shape_autoencoder_forward.1
= control target key start
LH: loop header
LB: loop body
LE: loop exit
PB: predicated region body
PF: predicated region fallthrough
CT: control target
= control target key end

     0   :  { %vm86_vm0 = vcmask 1041408   ;;  %vm79_vm1 = vcmask 15360   ;;  %vm174_vm2 = vcmask 130048   ;;  %v8705_v17 = vmov 0.0   ;;  %s10243_s1 = inlined_call_operand.vmem [shape: f32[2,16], index: 1, kind: input, shape index: {}]   ;;  %s10244_s0 = inlined_call_operand.vmem [shape: f32[16,2], index: 0, kind: input, shape index: {}]   ;;  %s10245_s3 = inlined_call_operand.vmem [shape: f32[2,2,16,8], index: 3, kind: input, shape index: {}]   ;;  %s10246_s5 = inlined_call_operand.vmem [shape: f32[2,2,16,8], index: 5, kind: input, shape index: {}]   ;;  %s10247_s7 = inlined_call_operand.vmem [shape: f32[2,2,16,8], index: 7, kind: input, shape index: {}]   ;;  %s10248_s2 = inlined_call_operand.vmem [shape: f32[1,16], index: 2, kind: input, shape index: {}]   ;;  %s10249_s6 = inlined_call_operand.vmem [shape: f32[2,2,1,8], index: 6, kind: input, shape index: {}]   ;;  %s10250_s4 = inlined_call_operand.vmem [shape: f32[2,2,1,8], index: 4, kind: input, shape index: {}]   ;;  %s10251_s8 = inlined_call_operand.vmem [shape: f32[2,2,1,8], index: 8, kind: input, shape index: {}]   ;;  %s10252_s9 = inlined_call_operand.vmem [shape: f32[2,2,8,16], index: 9, kind: input, shape index: {}]   ;;  %s10253_s10 = inlined_call_operand.vmem [shape: f32[2,1,16], index: 10, kind: input, shape index: {}]   ;;  %s10254_s13 = inlined_call_operand.vmem [shape: bf16[2,16,2048], index: 13, kind: input, shape index: {}]   ;;  %s10255_s15 = inlined_call_operand.vmem [shape: bf16[2,2048,16], index: 15, kind: input, shape index: {}]   ;;  %s10256_s11 = inlined_call_operand.vmem [shape: f32[2,1,16], index: 11, kind: input, shape index: {}]   ;;  %s10257_s12 = inlined_call_operand.vmem [shape: f32[2,1,16], index: 12, kind: input, shape index: {}]   ;;  %s10258_s14 = inlined_call_operand.vmem [shape: f32[2,1,2048], index: 14, kind: input, shape index: {}]   ;;  %s10259_s16 = inlined_call_operand.vmem [shape: f32[2,1,16], index: 16, kind: input, shape index: {}]   ;;  %s10260_s17 = inlined_call_operand.vmem [shape: f32[2,1,16], index: 17, kind: input, shape index: {}]   ;;  %s10261_s18 = inlined_call_operand.vmem [shape: f32[2,1,16], index: 18, kind: input, shape index: {}]   ;;  %s10262_s19 = inlined_call_operand.vmem [shape: f32[16,2], index: 19, kind: input, shape index: {}]   ;;  %s10263_s20 = inlined_call_operand.vmem [shape: f32[1,2], index: 20, kind: input, shape index: {}]   ;;  %s10264_s21 = inlined_call_operand.vmem [shape: f32[16,2], index: 21, kind: output, shape index: {}]  }
   0x1   :  { %10269 = sst [smem:[#allocation2_spill]] %s10243_s1  ;;  %vm8706_vm3 = vmmov 0   ;;  %v7001_v18 = vld [vmem:[%s10249_s6] ss:$0 sm:$0xff]  ;;  %vm424_vm4 = vcmask 64512  }
   0x2   :  { %10270 = sst [smem:[#allocation3_spill]] %s10244_s0  ;;  %s10275_s26 = sld [smem:[#allocation2_spill]]  ;;  %v6998_v21 = vld [vmem:[%s10250_s4] ss:$0 sm:$0xff] }
   0x3   :  { %10271 = sst [smem:[#allocation4_spill]] %s10245_s3  ;;  %s10276_s28 = sld [smem:[#allocation3_spill]]  ;;  %v7004_v26 = vld [vmem:[%s10251_s8] ss:$0 sm:$0xff] }
   0x4   :  { %10272 = sst [smem:[#allocation5_spill]] %s10246_s5 }
   0x5   :  { %10273 = sst [smem:[#allocation6_spill]] %s10247_s7  ;;  %s10278_s3 = sld [smem:[#allocation5_spill]] }
   0x6   :  { %10274 = sst [smem:[#allocation7_spill]] %s10248_s2  ;;  %s10277_s2 = sld [smem:[#allocation4_spill]] }
   0x7   :  { %s10280_s22 = sld [smem:[#allocation7_spill]] }
   0x8   :  { %v71_v0 = vld [vmem:[%s10275_s26] sm:$0x3] }
   0x9   :  { %v69_v1 = vld [vmem:[%s10276_s28] sm:$0xff]  ;;  %v70_v2 = vld [vmem:[%s10276_s28 + $0x8] sm:$0xff]  ;;  %8146 = vmatprep.subr.msk.mxu0 %vm86_vm0, %v71_v0  ;;  %s10279_s28 = sld [smem:[#allocation6_spill]] }
   0xa   :  { %8148 = vmatprep.mubr.msk.f32.mxu0 %vm79_vm1, %v69_v1  ;;  %8147 = vmatpush3.msk.msra.mxu0 %vm86_vm0, %v71_v0 }
   0xb   :  { %8149 = vmatmul.mubr.msk.f32.vlgmr.msra.gmra.mrb[0].mxu0 %vm79_vm1, %v70_v2  ;;  %v256_v5 = vld [vmem:[%s10278_s3] sm:$0xff]  ;;  %v257_v7 = vld [vmem:[%s10278_s3 + $0x8] sm:$0xff]  ;;  %v7019_v49 = vld [vmem:[%s10278_s3 + $0x10] sm:$0xff] }
   0xc   :  { %v165_v3 = vld [vmem:[%s10277_s2] sm:$0xff]  ;;  %v166_v4 = vld [vmem:[%s10277_s2 + $0x8] sm:$0xff]  ;;  %v8346_v8 = vpack.c.bf16 %v257_v7, %v256_v5  ;;  %v7020_v50 = vld [vmem:[%s10278_s3 + $0x18] sm:$0xff] }
   0xd   :  { %v8342_v6 = vpack.c.bf16 %v166_v4, %v165_v3  ;;  %v6994_v12 = vld [vmem:[%s10280_s22] ss:$0 sm:$0xff]  ;;  %v8358_v51 = vpack.c.bf16 %v7020_v50, %v7019_v49  ;;  %v7013_v52 = vld [vmem:[%s10277_s2 + $0x10] sm:$0xff]  ;;  %v7014_v53 = vld [vmem:[%s10277_s2 + $0x18] sm:$0xff] }
   0xe   :  { %8347 = vmatprep.subr.bf16.mxu0 %v8346_v8  ;;  %v8354_v54 = vpack.c.bf16 %v7014_v53, %v7013_v52  ;;  %v7022_v2 = vld [vmem:[%s10249_s6 + $0x1] ss:$0 sm:$0xff]  ;;  %v7042_v50 = vld [vmem:[%s10253_s10] ss:$0 sm:$0xff] }
   0xf   :  { %8343 = vmatprep.subr.bf16.mxu1 %v8342_v6  ;;  %v340_v9 = vld [vmem:[%s10279_s28] sm:$0xff]  ;;  %v341_v10 = vld [vmem:[%s10279_s28 + $0x8] sm:$0xff]  ;;  %8349 = vmatpush3.bf16.msra.mxu0 %v8346_v8  ;;  %v7025_v59 = vld [vmem:[%s10279_s28 + $0x10] sm:$0xff] }
  0x10   :  { %8345 = vmatpush3.bf16.msra.mxu1 %v8342_v6  ;;  %v8350_v11 = vpack.c.bf16 %v341_v10, %v340_v9  ;;  %8172 = vmatprep.subr.mxu0 %v8705_v17  ;;  %v7026_v60 = vld [vmem:[%s10279_s28 + $0x18] sm:$0xff]  ;;  %v7016_v9 = vld [vmem:[%s10250_s4 + $0x1] ss:$0 sm:$0xff] }
  0x11   :  { %v8362_v63 = vpack.c.bf16 %v7026_v60, %v7025_v59 }
  0x12   :  { %8351 = vmatprep.subr.bf16.mxu1 %v8350_v11 }
  0xde   :  { %v8150_v13 = vpop.f32.mrb[0].mxu0 }
  0xdf   :  { %v156_v14 = vpop.f32.mrb[1].mxu0  ;;  %v8852_v16 = vadd.f32 %v8150_v13, %v6994_v12 }
  0xe0   :  { %v8850_v15 = vadd.f32 %v6994_v12, %v156_v14  ;;  %v7028_v14 = vld [vmem:[%s10251_s8 + $0x1] ss:$0 sm:$0xff] }
  0xe2   :  { %8155 = vmatprep.mubr.msk.f32.mxu1 %vm174_vm2, %v8850_v15  ;;  %8162 = vmatprep.mubr.msk.f32.mxu0 %vm174_vm2, %v8850_v15 }
  0xe3   :  { %8156 = vmatmul.mubr.msk.f32.vlgmr.msra.gmra.mrb[0].mxu1 %vm174_vm2, %v8852_v16  ;;  %8163 = vmatmul.mubr.msk.f32.vlgmr.msra.gmra.mrb[2].mxu0 %vm174_vm2, %v8852_v16 }
  0xe4   :  { %8353 = vmatpush3.bf16.msra.mxu1 %v8350_v11  ;;  %8169 = vmatprep.mubr.msk.f32.mxu1 %vm174_vm2, %v8850_v15 }
  0xe5   :  { %8177 = vmatprep.subr.mxu1 %v8705_v17  ;;  %8174 = vmatprep.mubr.msk.f32.mxu0 %vm8706_vm3, %v8705_v17 }
  0xe7   :  { %8170 = vmatmul.mubr.msk.f32.vlgmr.msra.gmra.mrb[2].mxu1 %vm174_vm2, %v8852_v16 }
  0xe8   :  { %8179 = vmatprep.mubr.msk.f32.mxu1 %vm8706_vm3, %v8705_v17 }
 0x1b6   :  { %v8157_v19 = vpop.f32.mrb[0].mxu1  ;;  %v8164_v20 = vpop.f32.mrb[2].mxu0 }
 0x1b7   :  { %v337_v22 = vadd.f32 %v8164_v20, %v7001_v18  ;;  %v247_v23 = vpop.f32.mrb[1].mxu1  ;;  %v331_v24 = vpop.f32.mrb[3].mxu0  ;;  %v253_v27 = vadd.f32 %v8157_v19, %v6998_v21 }
 0x1b8   :  { %v332_v25 = vadd.f32 %v7001_v18, %v331_v24  ;;  %v248_v29 = vadd.f32 %v6998_v21, %v247_v23 }
 0x1b9   :  { %8178 = vmatpush3.xpose.msk.msra.mxu1 %vm424_vm4, %v337_v22 }
 0x1ba   :  { %v8171_v28 = vpop.f32.mrb[2].mxu1  ;;  %8173 = vmatpush3.xpose.msk.msra.mxu0 %vm424_vm4, %v332_v25  ;;  %8187 = vmatprep.subr.mxu1 %v8705_v17 }
 0x1bb   :  { %v421_v30 = vadd.f32 %v8171_v28, %v7004_v26  ;;  %v415_v31 = vpop.f32.mrb[3].mxu1  ;;  %8182 = vmatprep.subr.mxu0 %v8705_v17 }
 0x1bc   :  { %v416_v32 = vadd.f32 %v7004_v26, %v415_v31  ;;  %8180 = vmatmul.mubr.msk.f32.vlgmr.msra.gmra.mrb[4].mxu1 %vm424_vm4, %v253_v27 }
 0x1bd   :  { %8175 = vmatmul.mubr.msk.f32.vlgmr.msra.gmra.mrb[4].mxu0 %vm424_vm4, %v248_v29  ;;  %8188 = vmatpush3.msra.mxu1 %v421_v30 }
 0x1be   :  { %8183 = vmatpush3.msra.mxu0 %v416_v32  ;;  %8189 = vmatprep.mubr.msk.f32.mxu1 %vm8706_vm3, %v8705_v17 }
 0x1bf   :  { %8184 = vmatprep.mubr.msk.f32.mxu0 %vm8706_vm3, %v8705_v17  ;;  %8359 = vmatprep.subr.bf16.mxu1 %v8358_v51 }
 0x1c0   :  { %8355 = vmatprep.subr.bf16.mxu0 %v8354_v54 }
 0x28f   :  { %v573_v33 = vpop.f32.mrb[4].mxu1 }
 0x290   :  { %v497_v34 = vpop.f32.mrb[4].mxu0  ;;  %v8181_v35 = vpop.f32.mrb[5].mxu1  ;;  %v580_v36 = vsel %vm424_vm4, %v573_v33, -inf }
 0x291   :  { %581 = vmax.xlane.f32.xlu0 %v580_v36  ;;  %v8176_v37 = vpop.f32.mrb[5].mxu0  ;;  %v577_v38 = vsel %vm424_vm4, %v497_v34, -inf }
 0x295   :  { %578 = vmax.xlane.f32.xlu0 %v577_v38  ;;  %v7037_v38 = vld [vmem:[%s10252_s9 + $0x8] sm:$0xff] }
 0x31e   :  { %v582_v39 = vpop.xlane.xlu0 %581 }
 0x31f   :  { %v584_v40 = vsub.f32 %v573_v33, %v582_v39 }
 0x321   :  { %v587_v41 = vmul.f32 1.442695, %v584_v40 }
 0x322   :  { %v579_v42 = vpop.xlane.xlu0 %578 }
 0x323   :  { %8657 = vpow2.f32 %v587_v41  ;;  %v583_v43 = vsub.f32 %v497_v34, %v579_v42 }
 0x325   :  { %v585_v44 = vmul.f32 1.442695, %v583_v43 }
 0x327   :  { %8659 = vpow2.f32 %v585_v44 }
 0x32d   :  { %v8658_v45 = vpop.eup %8657 }
 0x32e   :  { %v592_v46 = vsel %vm424_vm4, %v8658_v45, 0.0 }
 0x32f   :  { %593 = vadd.xlane.f32.xlu1 %v592_v46 }
 0x331   :  { %v8660_v47 = vpop.eup %8659 }
 0x332   :  { %v589_v48 = vsel %vm424_vm4, %v8660_v47, 0.0 }
 0x333   :  { %590 = vadd.xlane.f32.xlu1 %v589_v48 }
 0x3bc   :  { %v594_v55 = vpop.xlane.xlu1 %593 }
 0x3bd   :  { %8661 = vrcp.f32 %v594_v55 }
 0x3c0   :  { %v591_v56 = vpop.xlane.xlu1 %590 }
 0x3c1   :  { %8663 = vrcp.f32 %v591_v56 }
 0x3c7   :  { %v8662_v57 = vpop.eup %8661 }
 0x3c8   :  { %v598_v58 = vmul.f32 %v8662_v57, %v8658_v45  ;;  %v745_v45 = vld [vmem:[%s10252_s9] sm:$0xff] }
 0x3ca   :  { %8190 = vmatmul.mubr.msk.f32.vlgmr.msra.gmra.mrb[6].mxu1 %vm424_vm4, %v598_v58 }
 0x3cb   :  { %v8664_v61 = vpop.eup %8663  ;;  %8361 = vmatpush3.bf16.msra.mxu1 %v8358_v51  ;;  %8203 = vmatprep.mubr.msk.f32.mxu1 %vm174_vm2, %v8850_v15 }
 0x3cc   :  { %v596_v62 = vmul.f32 %v8664_v61, %v8660_v47  ;;  %8213 = vmatprep.subr.mxu1 %v8705_v17 }
 0x3ce   :  { %8185 = vmatmul.mubr.msk.f32.vlgmr.msra.gmra.mrb[6].mxu0 %vm424_vm4, %v596_v62  ;;  %8204 = vmatmul.mubr.msk.f32.vlgmr.msra.gmra.mrb[8].mxu1 %vm174_vm2, %v8852_v16 }
 0x3cf   :  { %8357 = vmatpush3.bf16.msra.mxu0 %v8354_v54  ;;  %8196 = vmatprep.mubr.msk.f32.mxu0 %vm174_vm2, %v8850_v15 }
 0x3d0   :  { %8363 = vmatprep.subr.bf16.mxu0 %v8362_v63  ;;  %8215 = vmatprep.mubr.msk.f32.mxu1 %vm8706_vm3, %v8705_v17 }
 0x3d2   :  { %8197 = vmatmul.mubr.msk.f32.vlgmr.msra.gmra.mrb[8].mxu0 %vm174_vm2, %v8852_v16 }
 0x3d3   :  { %8365 = vmatpush3.bf16.msra.mxu0 %v8362_v63  ;;  %8210 = vmatprep.mubr.msk.f32.mxu0 %vm174_vm2, %v8850_v15 }
 0x3d4   :  { %8218 = vmatprep.subr.mxu0 %v8705_v17 }
 0x3d6   :  { %8211 = vmatmul.mubr.msk.f32.vlgmr.msra.gmra.mrb[10].mxu0 %vm174_vm2, %v8852_v16 }
 0x3d7   :  { %8220 = vmatprep.mubr.msk.f32.mxu0 %vm8706_vm3, %v8705_v17 }
 0x49d   :  { %v8933_v0 = vpop.f32.mrb[6].mxu1 }
 0x49e   :  { %v8191_v1 = vpop.f32.mrb[7].mxu1 }
 0x4a1   :  { %v8938_v3 = vpop.f32.mrb[6].mxu0  ;;  %v8205_v4 = vpop.f32.mrb[8].mxu1 }
 0x4a2   :  { %v915_v5 = vadd.f32 %v8205_v4, %v7022_v2  ;;  %v8186_v6 = vpop.f32.mrb[7].mxu0  ;;  %v909_v7 = vpop.f32.mrb[9].mxu1  ;;  %v1553_v4 = vld [vmem:[%s10254_s13 + $0x40] sm:$0xff] }
 0x4a3   :  { %v910_v8 = vadd.f32 %v7022_v2, %v909_v7  ;;  %v1554_v7 = vld [vmem:[%s10254_s13 + $0x48] sm:$0xff] }
 0x4a4   :  { %8219 = vmatpush3.xpose.msk.msra.mxu0 %vm424_vm4, %v915_v5  ;;  %v1546_v5 = vld [vmem:[%s10254_s13 + $0x8] sm:$0xff] }
 0x4a5   :  { %v8198_v10 = vpop.f32.mrb[8].mxu0  ;;  %8214 = vmatpush3.xpose.msk.msra.mxu1 %vm424_vm4, %v910_v8  ;;  %8228 = vmatprep.subr.mxu0 %v8705_v17 }
 0x4a6   :  { %v829_v11 = vadd.f32 %v8198_v10, %v7016_v9  ;;  %v823_v12 = vpop.f32.mrb[9].mxu0  ;;  %8223 = vmatprep.subr.mxu1 %v8705_v17  ;;  %v7048_v10 = vcombine.high %v1546_v5, %v1554_v7 }
 0x4a7   :  { %v824_v13 = vadd.f32 %v7016_v9, %v823_v12  ;;  %v7047_v9 = vcombine.low %v1546_v5, %v1554_v7  ;;  %v1547_v12 = vld [vmem:[%s10254_s13 + $0x10] sm:$0xff]  ;;  %v8416_v5 = vld [vmem:[%s10255_s15 + $0x98] sm:$0xff]   ;;  %v8418_v7 = vld [vmem:[%s10255_s15 + $0xe0] sm:$0xff]  }
 0x4a8   :  { %8221 = vmatmul.mubr.msk.f32.vlgmr.msra.gmra.mrb[12].mxu0 %vm424_vm4, %v829_v11  ;;  %v8707_v11 = vmov 0  }
 0x4a9   :  { %v8212_v18 = vpop.f32.mrb[10].mxu0  ;;  %8216 = vmatmul.mubr.msk.f32.vlgmr.msra.gmra.mrb[10].mxu1 %vm424_vm4, %v824_v13  ;;  %8230 = vmatprep.mubr.msk.f32.mxu0 %vm8706_vm3, %v8705_v17  ;;  %v1555_v13 = vld [vmem:[%s10254_s13 + $0x50] sm:$0xff] }
 0x4aa   :  { %v1001_v19 = vadd.f32 %v8212_v18, %v7028_v14  ;;  %v995_v20 = vpop.f32.mrb[11].mxu0  ;;  %8225 = vmatprep.mubr.msk.f32.mxu1 %vm8706_vm3, %v8705_v17  ;;  %v7049_v18 = vcombine.low %v1547_v12, %v1555_v13 }
 0x4ab   :  { %v996_v21 = vadd.f32 %v7028_v14, %v995_v20  ;;  %v1548_v14 = vld [vmem:[%s10254_s13 + $0x18] sm:$0xff] }
 0x4ac   :  { %8229 = vmatpush3.msra.mxu0 %v1001_v19  ;;  %v7050_v19 = vcombine.high %v1547_v12, %v1555_v13  ;;  %v1556_v20 = vld [vmem:[%s10254_s13 + $0x58] sm:$0xff]  ;;  %v8422_v12 = vld [vmem:[%s10255_s15 + $0xe8] sm:$0xff]  }
 0x4ad   :  { %8224 = vmatpush3.msra.mxu1 %v996_v21  ;;  %v7051_v21 = vcombine.low %v1548_v14, %v1556_v20  ;;  %v8423_v13 = vld [vmem:[%s10255_s15 + $0x28] sm:$0xff]  }
 0x4ae   :  { %8233 = vmatprep.subr.mxu1 %v7037_v38 }
 0x57b   :  { %v1152_v22 = vpop.f32.mrb[12].mxu0 }
 0x57c   :  { %v1076_v23 = vpop.f32.mrb[10].mxu1  ;;  %v8222_v24 = vpop.f32.mrb[13].mxu0  ;;  %v1159_v25 = vsel %vm424_vm4, %v1152_v22, -inf }
 0x57d   :  { %1160 = vmax.xlane.f32.xlu1 %v1159_v25  ;;  %v8217_v26 = vpop.f32.mrb[11].mxu1  ;;  %v1156_v27 = vsel %vm424_vm4, %v1076_v23, -inf }
 0x57e   :  { %1157 = vmax.xlane.f32.xlu0 %v1156_v27 }
 0x60a   :  { %v1161_v28 = vpop.xlane.xlu1 %1160 }
 0x60b   :  { %v1163_v29 = vsub.f32 %v1152_v22, %v1161_v28  ;;  %v1158_v30 = vpop.xlane.xlu0 %1157  ;;  %v7052_v22 = vcombine.high %v1548_v14, %v1556_v20  ;;  %v8424_v14 = vld [vmem:[%s10255_s15 + $0xa8] sm:$0xff]   ;;  %v8427_v20 = vld [vmem:[%s10255_s15 + $0x30] sm:$0xff]  }
 0x60c   :  { %v1162_v31 = vsub.f32 %v1076_v23, %v1158_v30 }
 0x60d   :  { %v1166_v32 = vmul.f32 1.442695, %v1163_v29  ;;  %v7043_v29 = vld [vmem:[%s10256_s11] ss:$0 sm:$0xff] }
 0x60e   :  { %v1164_v33 = vmul.f32 1.442695, %v1162_v31  ;;  %v7044_v31 = vld [vmem:[%s10257_s12] ss:$0 sm:$0xff] }
 0x60f   :  { %8665 = vpow2.f32 %v1166_v32 }
 0x610   :  { %8667 = vpow2.f32 %v1164_v33 }
 0x619   :  { %v8666_v34 = vpop.eup %8665 }
 0x61a   :  { %v8668_v35 = vpop.eup %8667  ;;  %v1171_v36 = vsel %vm424_vm4, %v8666_v34, 0.0 }
 0x61b   :  { %1172 = vadd.xlane.f32.xlu1 %v1171_v36  ;;  %v1168_v37 = vsel %vm424_vm4, %v8668_v35, 0.0 }
 0x61c   :  { %1169 = vadd.xlane.f32.xlu0 %v1168_v37  ;;  %v1549_v37 = vld [vmem:[%s10254_s13 + $0x20] sm:$0xff] }
 0x6a8   :  { %v1173_v39 = vpop.xlane.xlu1 %1172 }
 0x6a9   :  { %8669 = vrcp.f32 %v1173_v39  ;;  %v1170_v40 = vpop.xlane.xlu0 %1169  ;;  %v1550_v39 = vld [vmem:[%s10254_s13 + $0x28] sm:$0xff] }
 0x6aa   :  { %8671 = vrcp.f32 %v1170_v40  ;;  %v1558_v40 = vld [vmem:[%s10254_s13 + $0x68] sm:$0xff] }
 0x6b3   :  { %v8670_v41 = vpop.eup %8669 }
 0x6b4   :  { %v8672_v42 = vpop.eup %8671  ;;  %v1177_v43 = vmul.f32 %v8670_v41, %v8666_v34 }
 0x6b5   :  { %v1175_v44 = vmul.f32 %v8672_v42, %v8668_v35 }
 0x6b6   :  { %8231 = vmatmul.mubr.msk.f32.vlgmr.msra.gmra.mrb[14].mxu0 %vm424_vm4, %v1177_v43 }
 0x6b7   :  { %8226 = vmatmul.mubr.msk.f32.vlgmr.msra.gmra.mrb[12].mxu1 %vm424_vm4, %v1175_v44  ;;  %1760 = vmatprep.mubr.bf16.mxu0 %v8707_v11 }
 0x6b8   :  { %8234 = vmatpush3.msra.mxu1 %v7037_v38  ;;  %v1557_v38 = vld [vmem:[%s10254_s13 + $0x60] sm:$0xff] }
 0x6b9   :  { %8238 = vmatprep.subr.mxu1 %v745_v45  ;;  %v7054_v44 = vcombine.high %v1549_v37, %v1557_v38 }
 0x789   :  { %v1320_v46 = vpop.f32.mrb[14].mxu0 }
 0x78a   :  { %v1247_v47 = vpop.f32.mrb[12].mxu1  ;;  %v8232_v48 = vpop.f32.mrb[15].mxu0 }
 0x78b   :  { %v8227_v49 = vpop.f32.mrb[13].mxu1  ;;  %8235 = vmatprep.mubr.msk.f32.mxu1 %vm424_vm4, %v1247_v47  ;;  %v1559_v47 = vld [vmem:[%s10254_s13 + $0x70] sm:$0xff]  ;;  %v1552_v48 = vld [vmem:[%s10254_s13 + $0x38] sm:$0xff] }
 0x78c   :  { %8236 = vmatmul.mubr.msk.f32.vlgmr.msra.gmra.mrb[14].mxu1 %vm424_vm4, %v1320_v46  ;;  %v1551_v46 = vld [vmem:[%s10254_s13 + $0x30] sm:$0xff]  ;;  %v1560_v49 = vld [vmem:[%s10254_s13 + $0x78] sm:$0xff] }
 0x78d   :  { %8239 = vmatpush3.msra.mxu1 %v745_v45  ;;  %8240 = vmatprep.mubr.msk.f32.mxu1 %vm424_vm4, %v8938_v3  ;;  %v7056_v45 = vcombine.high %v1550_v39, %v1558_v40 }
 0x78e   :  { %1771 = vmatprep.subr.bf16.mxu1 %v7048_v10  ;;  %v8421_v10 = vld [vmem:[%s10255_s15 + $0x68] sm:$0xff]  }
 0x794   :  { %8241 = vmatmul.mubr.msk.f32.vlgmr.msra.gmra.mrb[14].mxu1 %vm424_vm4, %v8933_v0 }
 0x795   :  { %1772 = vmatpush1.bf16.msra.mxu1 %v7047_v9  ;;  %1803 = vmatprep.mubr.bf16.mxu1 %v8707_v11  ;;  %v8420_v9 = vld [vmem:[%s10255_s15 + $0xa0] sm:$0xff]  }
 0x796   :  { %1857 = vmatprep.subr.bf16.mxu1 %v7052_v22  ;;  %v8429_v22 = vld [vmem:[%s10255_s15 + $0x78] sm:$0xff]  }
 0x867   :  { %v8242_v51 = vpop.f32.mrb[14].mxu1 }
 0x868   :  { %v1496_v52 = vadd.f32 %v8242_v51, %v7042_v50  ;;  %v1479_v53 = vpop.f32.mrb[15].mxu1  ;;  %v7055_v51 = vcombine.low %v1550_v39, %v1558_v40 }
 0x869   :  { %v1495_v54 = vadd.f32 %v7042_v50, %v1479_v53  ;;  %v7053_v50 = vcombine.low %v1549_v37, %v1557_v38  ;;  %v7060_v53 = vcombine.high %v1552_v48, %v1560_v49 }
 0x86a   :  { %v1498_v55 = vadd.f32 %v1496_v52, %v8852_v16  ;;  %v7058_v52 = vcombine.high %v1551_v46, %v1559_v47 }
 0x86b   :  { %v1497_v56 = vadd.f32 %v1495_v54, %v8850_v15  ;;  %v1545_v15 = vld [vmem:[%s10254_s13] sm:$0xff]  ;;  %v7057_v54 = vcombine.low %v1551_v46, %v1559_v47 }
 0x86c   :  { %v1504_v57 = vsel %vm174_vm2, %v1498_v55, 0.0  ;;  %v7046_v6 = vcombine.high %v1545_v15, %v1553_v4  ;;  %v7045_v8 = vcombine.low %v1545_v15, %v1553_v4  ;;  %v8414_v15 = vld [vmem:[%s10255_s15 + $0xd8] sm:$0xff]  }
 0x86d   :  { %1505 = vadd.xlane.f32.xlu1 %v1504_v57  ;;  %v1501_v58 = vsel %vm174_vm2, %v1497_v56, 0.0  ;;  %v8402_v57 = vld [vmem:[%s10255_s15 + $0xc0] sm:$0xff]   ;;  %v8415_v4 = vld [vmem:[%s10255_s15 + $0x18] sm:$0xff]  }
 0x86e   :  { %1502 = vadd.xlane.f32.xlu0 %v1501_v58  ;;  %1728 = vmatprep.subr.bf16.mxu0 %v7046_v6  ;;  %v8403_v58 = vld [vmem:[%s10255_s15] sm:$0xff]  }
 0x86f   :  { %1729 = vmatpush1.bf16.msra.mxu0 %v7045_v8  ;;  %v8417_v6 = vld [vmem:[%s10255_s15 + $0x60] sm:$0xff]  }
 0x870   :  { %1814 = vmatprep.subr.bf16.mxu0 %v7050_v19  ;;  %v8419_v8 = vld [vmem:[%s10255_s15 + $0x20] sm:$0xff]   ;;  %v8426_v19 = vld [vmem:[%s10255_s15 + $0xf0] sm:$0xff]  }
 0x8fa   :  { %v1506_v59 = vpop.xlane.xlu1 %1505 }
 0x8fb   :  { %v1509_v60 = vmul.f32 0.0625, %v1506_v59  ;;  %v1503_v61 = vpop.xlane.xlu0 %1502  ;;  %v8404_v59 = vld [vmem:[%s10255_s15 + $0x80] sm:$0xff]  }
 0x8fc   :  { %v1508_v62 = vmul.f32 0.0625, %v1503_v61  ;;  %v8406_v61 = vld [vmem:[%s10255_s15 + $0xc8] sm:$0xff]  }
 0x8fd   :  { %v1511_v63 = vsub.f32 %v1498_v55, %v1509_v60  ;;  %v7059_v55 = vcombine.low %v1552_v48, %v1560_v49  ;;  %v8405_v60 = vld [vmem:[%s10255_s15 + $0x48] sm:$0xff]  }
 0x8fe   :  { %v1510_v0 = vsub.f32 %v1497_v56, %v1508_v62  ;;  %v8401_v56 = vld [vmem:[%s10255_s15 + $0x40] sm:$0xff]   ;;  %v8407_v62 = vld [vmem:[%s10255_s15 + $0x8] sm:$0xff]  }
 0x8ff   :  { %v1513_v1 = vmul.f32 %v1511_v63, %v1511_v63 }
 0x900   :  { %v1512_v2 = vmul.f32 %v1510_v0, %v1510_v0 }
 0x901   :  { %v1517_v3 = vsel %vm174_vm2, %v1513_v1, 0.0  ;;  %v8410_v1 = vld [vmem:[%s10255_s15 + $0xd0] sm:$0xff]  }
 0x902   :  { %1518 = vadd.xlane.f32.xlu1 %v1517_v3  ;;  %v1514_v16 = vsel %vm174_vm2, %v1512_v2, 0.0  ;;  %v8411_v2 = vld [vmem:[%s10255_s15 + $0x10] sm:$0xff]  }
 0x903   :  { %1515 = vadd.xlane.f32.xlu0 %v1514_v16  ;;  %v8412_v3 = vld [vmem:[%s10255_s15 + $0x90] sm:$0xff]   ;;  %v8413_v16 = vld [vmem:[%s10255_s15 + $0x58] sm:$0xff]  }
 0x98f   :  { %v1519_v23 = vpop.xlane.xlu1 %1518 }
 0x990   :  { %v1521_v24 = vmul.f32 0.0625, %v1519_v23  ;;  %v1516_v25 = vpop.xlane.xlu0 %1515  ;;  %v8430_v23 = vld [vmem:[%s10255_s15 + $0xf8] sm:$0xff]  }
 0x991   :  { %v1520_v26 = vmul.f32 0.0625, %v1516_v25  ;;  %v8432_v25 = vld [vmem:[%s10255_s15 + $0xb8] sm:$0xff]  }
 0x992   :  { %v1523_v27 = vadd.f32 1e-05, %v1521_v24  ;;  %v8431_v24 = vld [vmem:[%s10255_s15 + $0x38] sm:$0xff]  }
 0x993   :  { %v1522_v28 = vadd.f32 1e-05, %v1520_v26  ;;  %v8433_v26 = vld [vmem:[%s10255_s15 + $0x140] sm:$0xff]  }
 0x994   :  { %8673 = vrsqrt.f32 %v1523_v27  ;;  %v8434_v27 = vld [vmem:[%s10255_s15 + $0x1c0] sm:$0xff]  }
 0x995   :  { %8675 = vrsqrt.f32 %v1522_v28  ;;  %v1565_v28 = vlaneseq }
 0x99e   :  { %v8674_v30 = vpop.eup %8673 }
 0x99f   :  { %v8676_v32 = vpop.eup %8675  ;;  %v1527_v33 = vmul.f32 %v8674_v30, %v1511_v63  ;;  %v8408_v63 = vld [vmem:[%s10255_s15 + $0x88] sm:$0xff]  }
 0x9a0   :  { %v1526_v34 = vmul.f32 %v8676_v32, %v1510_v0  ;;  %v8409_v0 = vld [vmem:[%s10255_s15 + $0x50] sm:$0xff]   ;;  %v1561_v32 = vld [vmem:[%s10258_s14] sm:$0xff] }
 0x9a1   :  { %v1535_v35 = vmul.f32 %v7043_v29, %v1527_v33 }
 0x9a2   :  { %v1534_v36 = vmul.f32 %v7043_v29, %v1526_v34  ;;  %v1566_v29 = vshrl.u32 %v1565_v28, 7 }
 0x9a3   :  { %v9027_v41 = vadd.f32 %v7044_v31, %v1535_v35 }
 0x9a4   :  { %v9029_v42 = vadd.f32 %v7044_v31, %v1534_v36  ;;  %v9161_v30 = vsub.s32 0, %v1566_v29  ;;  %v9163_v31 = vsub.s32 2, %v1566_v29  ;;  %v9168_v33 = vsub.s32 1, %v1566_v29 }
 0x9a5   :  { %v9170_v34 = vsub.s32 3, %v1566_v29  ;;  %v9176_v39 = vsub.s32 4, %v1566_v29  ;;  %v9178_v40 = vsub.s32 6, %v1566_v29  ;;  %v9182_v46 = vsub.s32 7, %v1566_v29 }
 0x9a6   :  { %v1544_v43 = vpack.c.bf16 %v9027_v41, %v9029_v42  ;;  %v1568_v35 = vrot.slane %v1561_v32, %v9161_v30  ;;  %v1576_v36 = vrot.slane %v1561_v32, %v9163_v31  ;;  %v1572_v37 = vrot.slane %v1561_v32, %v9168_v33 }
 0x9a7   :  { %v1580_v38 = vrot.slane %v1561_v32, %v9170_v34 }
 0x9a8   :  { %7061 = vmatmul.mubr.msk.bf16.vlgmr.msra.gmra.mrb[16].mxu0 %vm174_vm2, %v1544_v43  ;;  %7062 = vmatmul.mubr.msk.bf16.vlgmr.msra.gmra.mrb[16].mxu1 %vm174_vm2, %v1544_v43 }
 0x9a9   :  { %1815 = vmatpush1.bf16.msra.mxu0 %v7049_v18  ;;  %1858 = vmatpush1.bf16.msra.mxu1 %v7051_v21  ;;  %v8425_v18 = vld [vmem:[%s10255_s15 + $0x70] sm:$0xff]  }
 0x9aa   :  { %1846 = vmatprep.mubr.bf16.mxu0 %v8707_v11  ;;  %1889 = vmatprep.mubr.bf16.mxu1 %v8707_v11  ;;  %v8428_v21 = vld [vmem:[%s10255_s15 + $0xb0] sm:$0xff]  }
 0x9ab   :  { %1900 = vmatprep.subr.bf16.mxu0 %v7054_v44  ;;  %1943 = vmatprep.subr.bf16.mxu1 %v7056_v45  ;;  %v9180_v45 = vsub.s32 5, %v1566_v29 }
 0x9b0   :  { %7063 = vmatmul.mubr.msk.bf16.vlgmr.msra.gmra.mrb[20].mxu0 %vm174_vm2, %v1544_v43  ;;  %7064 = vmatmul.mubr.msk.bf16.vlgmr.msra.gmra.mrb[20].mxu1 %vm174_vm2, %v1544_v43 }
 0x9b1   :  { %1901 = vmatpush1.bf16.msra.mxu0 %v7053_v50  ;;  %1944 = vmatpush1.bf16.msra.mxu1 %v7055_v51 }
 0x9b2   :  { %1932 = vmatprep.mubr.bf16.mxu0 %v8707_v11  ;;  %1975 = vmatprep.mubr.bf16.mxu1 %v8707_v11 }
 0x9b3   :  { %1986 = vmatprep.subr.bf16.mxu0 %v7058_v52  ;;  %2029 = vmatprep.subr.bf16.mxu1 %v7060_v53 }
 0x9b8   :  { %7065 = vmatmul.mubr.msk.bf16.vlgmr.msra.gmra.mrb[24].mxu0 %vm174_vm2, %v1544_v43  ;;  %7066 = vmatmul.mubr.msk.bf16.vlgmr.msra.gmra.mrb[24].mxu1 %vm174_vm2, %v1544_v43 }
 0x9b9   :  { %1987 = vmatpush1.bf16.msra.mxu0 %v7057_v54  ;;  %2030 = vmatpush1.bf16.msra.mxu1 %v7059_v55 }
 0x9ba   :  { %2018 = vmatprep.mubr.bf16.mxu0 %v8707_v11  ;;  %2061 = vmatprep.mubr.bf16.mxu1 %v8707_v11 }
 0x9bb   :  { %7744 = vmatprep.subr.bf16.mxu0 %v8401_v56  ;;  %7766 = vmatprep.subr.bf16.mxu1 %v8402_v57 }
 0x9c0   :  { %7067 = vmatmul.mubr.msk.bf16.vlgmr.msra.gmra.mrb[28].mxu0 %vm174_vm2, %v1544_v43  ;;  %7068 = vmatmul.mubr.msk.bf16.vlgmr.msra.gmra.mrb[28].mxu1 %vm174_vm2, %v1544_v43 }
 0x9c1   :  { %7745 = vmatpush3.bf16.msra.mxu0 %v8403_v58  ;;  %7767 = vmatpush3.bf16.msra.mxu1 %v8404_v59  ;;  %v1584_v59 = vrot.slane %v1561_v32, %v9176_v39 }
 0x9c2   :  { %7746 = vmatprep.subr.bf16.mxu0 %v8405_v60  ;;  %7768 = vmatprep.subr.bf16.mxu1 %v8406_v61  ;;  %v1592_v60 = vrot.slane %v1561_v32, %v9178_v40 }
 0x9c5   :  { %7747 = vmatpush3.bf16.msra.mxu0 %v8407_v62  ;;  %7769 = vmatpush3.bf16.msra.mxu1 %v8408_v63  ;;  %v1588_v63 = vrot.slane %v1561_v32, %v9180_v45 }
 0x9c6   :  { %7748 = vmatprep.subr.bf16.mxu0 %v8409_v0  ;;  %7770 = vmatprep.subr.bf16.mxu1 %v8410_v1  ;;  %v1596_v0 = vrot.slane %v1561_v32, %v9182_v46 }
 0x9c9   :  { %7749 = vmatpush3.bf16.msra.mxu0 %v8411_v2  ;;  %7771 = vmatpush3.bf16.msra.mxu1 %v8412_v3 }
 0x9ca   :  { %7750 = vmatprep.subr.bf16.mxu0 %v8413_v16  ;;  %7772 = vmatprep.subr.bf16.mxu1 %v8414_v15 }
 0x9cd   :  { %7751 = vmatpush3.bf16.msra.mxu0 %v8415_v4  ;;  %7773 = vmatpush3.bf16.msra.mxu1 %v8416_v5 }
 0x9ce   :  { %7752 = vmatprep.subr.bf16.mxu0 %v8417_v6  ;;  %7774 = vmatprep.subr.bf16.mxu1 %v8418_v7  ;;  %v9191_v7 = vld [vmem:[%s10258_s14 + $0x8] sm:$0xff] }
 0x9d1   :  { %7753 = vmatpush3.bf16.msra.mxu0 %v8419_v8  ;;  %7775 = vmatpush3.bf16.msra.mxu1 %v8420_v9 }
 0x9d2   :  { %7754 = vmatprep.subr.bf16.mxu0 %v8421_v10  ;;  %7776 = vmatprep.subr.bf16.mxu1 %v8422_v12 }
 0x9d5   :  { %7755 = vmatpush3.bf16.msra.mxu0 %v8423_v13  ;;  %7777 = vmatpush3.bf16.msra.mxu1 %v8424_v14 }
 0x9d6   :  { %7756 = vmatprep.subr.bf16.mxu0 %v8425_v18  ;;  %7778 = vmatprep.subr.bf16.mxu1 %v8426_v19  ;;  %v8435_v18 = vld [vmem:[%s10255_s15 + $0x100] sm:$0xff]  }
 0x9d7   :  { %v8436_v19 = vld [vmem:[%s10255_s15 + $0x180] sm:$0xff]  }
 0x9d9   :  { %7757 = vmatpush3.bf16.msra.mxu0 %v8427_v20  ;;  %7779 = vmatpush3.bf16.msra.mxu1 %v8428_v21 }
 0x9da   :  { %7758 = vmatprep.subr.bf16.mxu0 %v8429_v22  ;;  %7780 = vmatprep.subr.bf16.mxu1 %v8430_v23 }
 0x9dd   :  { %7759 = vmatpush3.bf16.msra.mxu0 %v8431_v24  ;;  %7781 = vmatpush3.bf16.msra.mxu1 %v8432_v25  ;;  %v8437_v24 = vld [vmem:[%s10255_s15 + $0x148] sm:$0xff]  }
 0x9de   :  { %7788 = vmatprep.subr.bf16.mxu0 %v8433_v26  ;;  %7810 = vmatprep.subr.bf16.mxu1 %v8434_v27  ;;  %v8438_v25 = vld [vmem:[%s10255_s15 + $0x1c8] sm:$0xff]   ;;  %v1600_v26 = vrot.slane %v9191_v7, %v9161_v30 }
 0xa7b   :  { %v1762_v43 = vpop.f32.mrb[16].mxu0  ;;  %v1805_v44 = vpop.f32.mrb[16].mxu1 }
 0xa7c   :  { %v1763_v47 = vadd.f32 %v1762_v43, %v1568_v35  ;;  %v1806_v48 = vadd.f32 %v1805_v44, %v1576_v36  ;;  %v1764_v49 = vpop.f32.mrb[17].mxu0  ;;  %v1807_v50 = vpop.f32.mrb[17].mxu1  ;;  %v1604_v44 = vrot.slane %v9191_v7, %v9168_v33 }
 0xa7d   :  { %v1765_v51 = vadd.f32 %v1764_v49, %v1572_v37  ;;  %v1808_v52 = vadd.f32 %v1807_v50, %v1580_v38  ;;  %v1766_v53 = vpop.f32.mrb[18].mxu0  ;;  %v1809_v54 = vpop.f32.mrb[18].mxu1  ;;  %v8439_v49 = vld [vmem:[%s10255_s15 + $0x108] sm:$0xff]  }
 0xa7e   :  { %v1767_v55 = vadd.f32 %v1766_v53, %v1568_v35  ;;  %v1810_v56 = vadd.f32 %v1809_v54, %v1576_v36  ;;  %v1768_v57 = vpop.f32.mrb[19].mxu0  ;;  %v1811_v58 = vpop.f32.mrb[19].mxu1  ;;  %v2072_v1 = vmax.f32 %v1763_v47, 0.0  ;;  %v2074_v2 = vmax.f32 %v1806_v48, 0.0  ;;  %v8440_v50 = vld [vmem:[%s10255_s15 + $0x188] sm:$0xff]  }
 0xa7f   :  { %v1769_v61 = vadd.f32 %v1768_v57, %v1572_v37  ;;  %v1812_v62 = vadd.f32 %v1811_v58, %v1580_v38  ;;  %v2073_v15 = vmax.f32 %v1765_v51, 0.0  ;;  %v2075_v4 = vmax.f32 %v1808_v52, 0.0  ;;  %v8442_v57 = vld [vmem:[%s10255_s15 + $0x1d0] sm:$0xff]  }
 0xa80   :  { %v2088_v3 = vmax.f32 %v1767_v55, 0.0  ;;  %v2090_v16 = vmax.f32 %v1810_v56, 0.0  ;;  %v1608_v35 = vrot.slane %v9191_v7, %v9163_v31  ;;  %v1612_v51 = vrot.slane %v9191_v7, %v9170_v34  ;;  %v8441_v56 = vld [vmem:[%s10255_s15 + $0x150] sm:$0xff]  }
 0xa81   :  { %v2089_v5 = vmax.f32 %v1769_v61, 0.0  ;;  %v2091_v6 = vmax.f32 %v1812_v62, 0.0 }
 0xa82   :  { %v2104_v8 = vpack.c.bf16 %v2088_v3, %v2072_v1  ;;  %v2106_v9 = vpack.c.bf16 %v2090_v16, %v2074_v2  ;;  %v8443_v16 = vld [vmem:[%s10255_s15 + $0x110] sm:$0xff]  }
 0xa83   :  { %v2105_v10 = vpack.c.bf16 %v2089_v5, %v2073_v15  ;;  %v2107_v12 = vpack.c.bf16 %v2091_v6, %v2075_v4  ;;  %v1848_v13 = vpop.f32.mrb[20].mxu0  ;;  %v1891_v14 = vpop.f32.mrb[20].mxu1  ;;  %v8444_v15 = vld [vmem:[%s10255_s15 + $0x190] sm:$0xff]  }
 0xa84   :  { %v1849_v20 = vadd.f32 %v1848_v13, %v1584_v59  ;;  %v1892_v21 = vadd.f32 %v1891_v14, %v1592_v60  ;;  %v1850_v22 = vpop.f32.mrb[21].mxu0  ;;  %v1893_v23 = vpop.f32.mrb[21].mxu1 }
 0xa85   :  { %v1851_v27 = vadd.f32 %v1850_v22, %v1588_v63  ;;  %v1894_v28 = vadd.f32 %v1893_v23, %v1596_v0  ;;  %v1852_v29 = vpop.f32.mrb[22].mxu0  ;;  %v1895_v32 = vpop.f32.mrb[22].mxu1  ;;  %3183 = vmatprep.mubr.bf16.mxu0 %v2105_v10  ;;  %3224 = vmatprep.mubr.bf16.mxu1 %v2107_v12  ;;  %v8446_v10 = vld [vmem:[%s10255_s15 + $0x1d8] sm:$0xff]  }
 0xa86   :  { %v1853_v36 = vadd.f32 %v1852_v29, %v1584_v59  ;;  %v1896_v37 = vadd.f32 %v1895_v32, %v1592_v60  ;;  %v1854_v38 = vpop.f32.mrb[23].mxu0  ;;  %v1897_v43 = vpop.f32.mrb[23].mxu1  ;;  %3184 = vmatmul.mubr.bf16.vlgmr.msra.gmra.mrb[32].mxu0 %v2104_v8  ;;  %3225 = vmatmul.mubr.bf16.vlgmr.msra.gmra.mrb[32].mxu1 %v2106_v9  ;;  %v2076_v52 = vmax.f32 %v1849_v20, 0.0  ;;  %v2078_v53 = vmax.f32 %v1892_v21, 0.0  ;;  %v8445_v9 = vld [vmem:[%s10255_s15 + $0x158] sm:$0xff]  }
 0xa87   :  { %v1855_v47 = vadd.f32 %v1854_v38, %v1588_v63  ;;  %v1898_v48 = vadd.f32 %v1897_v43, %v1596_v0  ;;  %7789 = vmatpush3.bf16.msra.mxu0 %v8435_v18  ;;  %7811 = vmatpush3.bf16.msra.mxu1 %v8436_v19  ;;  %v2077_v58 = vmax.f32 %v1851_v27, 0.0  ;;  %v2079_v59 = vmax.f32 %v1894_v28, 0.0  ;;  %v8447_v29 = vld [vmem:[%s10255_s15 + $0x118] sm:$0xff]   ;;  %v8449_v43 = vld [vmem:[%s10255_s15 + $0x160] sm:$0xff]  }
 0xa88   :  { %v2092_v54 = vmax.f32 %v1853_v36, 0.0  ;;  %v2094_v55 = vmax.f32 %v1896_v37, 0.0  ;;  %7790 = vmatprep.subr.bf16.mxu0 %v8437_v24  ;;  %7812 = vmatprep.subr.bf16.mxu1 %v8438_v25  ;;  %v1616_v19 = vrot.slane %v9191_v7, %v9176_v39  ;;  %v1624_v24 = vrot.slane %v9191_v7, %v9178_v40 }
 0xa89   :  { %v2093_v60 = vmax.f32 %v1855_v47, 0.0  ;;  %v2095_v61 = vmax.f32 %v1898_v48, 0.0  ;;  %v1620_v25 = vrot.slane %v9191_v7, %v9180_v45  ;;  %v1628_v32 = vrot.slane %v9191_v7, %v9182_v46 }
 0xa8a   :  { %v9225_v62 = vpack.c.bf16 %v2092_v54, %v2076_v52  ;;  %v9227_v63 = vpack.c.bf16 %v2094_v55, %v2078_v53 }
 0xa8b   :  { %v2109_v0 = vpack.c.bf16 %v2093_v60, %v2077_v58  ;;  %v2111_v1 = vpack.c.bf16 %v2095_v61, %v2079_v59  ;;  %7791 = vmatpush3.bf16.msra.mxu0 %v8439_v49  ;;  %7813 = vmatpush3.bf16.msra.mxu1 %v8440_v50  ;;  %v1934_v2 = vpop.f32.mrb[24].mxu0  ;;  %v1977_v3 = vpop.f32.mrb[24].mxu1 }
 0xa8c   :  { %v1935_v4 = vadd.f32 %v1934_v2, %v1600_v26  ;;  %v1978_v5 = vadd.f32 %v1977_v3, %v1608_v35  ;;  %v1936_v6 = vpop.f32.mrb[25].mxu0  ;;  %v1979_v8 = vpop.f32.mrb[25].mxu1  ;;  %7792 = vmatprep.subr.bf16.mxu0 %v8441_v56  ;;  %7814 = vmatprep.subr.bf16.mxu1 %v8442_v57  ;;  %v8451_v56 = vld [vmem:[%s10255_s15 + $0x120] sm:$0xff]  }
 0xa8d   :  { %v1937_v12 = vadd.f32 %v1936_v6, %v1604_v44  ;;  %v1980_v13 = vadd.f32 %v1979_v8, %v1612_v51  ;;  %v1938_v14 = vpop.f32.mrb[26].mxu0  ;;  %v1981_v18 = vpop.f32.mrb[26].mxu1  ;;  %3265 = vmatprep.mubr.bf16.mxu0 %v2109_v0  ;;  %3306 = vmatprep.mubr.bf16.mxu1 %v2111_v1  ;;  %v8452_v57 = vld [vmem:[%s10255_s15 + $0x1a0] sm:$0xff]   ;;  %v8453_v0 = vld [vmem:[%s10255_s15 + $0x168] sm:$0xff]  }
 0xa8e   :  { %v1939_v20 = vadd.f32 %v1938_v14, %v1600_v26  ;;  %v1982_v21 = vadd.f32 %v1981_v18, %v1608_v35  ;;  %v1940_v22 = vpop.f32.mrb[27].mxu0  ;;  %v1983_v23 = vpop.f32.mrb[27].mxu1  ;;  %v8448_v26 = vld [vmem:[%s10255_s15 + $0x198] sm:$0xff]   ;;  %v2080_v35 = vmax.f32 %v1935_v4, 0.0  ;;  %v2082_v36 = vmax.f32 %v1978_v5, 0.0  ;;  %v8454_v1 = vld [vmem:[%s10255_s15 + $0x1e8] sm:$0xff]  }
 0xa8f   :  { %v1941_v27 = vadd.f32 %v1940_v22, %v1604_v44  ;;  %v1984_v28 = vadd.f32 %v1983_v23, %v1612_v51  ;;  %7793 = vmatpush3.bf16.msra.mxu0 %v8443_v16  ;;  %7815 = vmatpush3.bf16.msra.mxu1 %v8444_v15  ;;  %v8450_v44 = vld [vmem:[%s10255_s15 + $0x1e0] sm:$0xff]   ;;  %v2081_v47 = vmax.f32 %v1937_v12, 0.0  ;;  %v2083_v48 = vmax.f32 %v1980_v13, 0.0  ;;  %v8455_v12 = vld [vmem:[%s10255_s15 + $0x128] sm:$0xff]   ;;  %v8458_v22 = vld [vmem:[%s10255_s15 + $0x1f0] sm:$0xff]  }
 0xa90   :  { %v2096_v37 = vmax.f32 %v1939_v20, 0.0  ;;  %v2098_v38 = vmax.f32 %v1982_v21, 0.0  ;;  %7794 = vmatprep.subr.bf16.mxu0 %v8445_v9  ;;  %7816 = vmatprep.subr.bf16.mxu1 %v8446_v10  ;;  %v8456_v13 = vld [vmem:[%s10255_s15 + $0x1a8] sm:$0xff]  }
 0xa91   :  { %v2097_v49 = vmax.f32 %v1941_v27, 0.0  ;;  %v2099_v50 = vmax.f32 %v1984_v28, 0.0 }
 0xa92   :  { %v9261_v51 = vpack.c.bf16 %v2096_v37, %v2080_v35  ;;  %v9263_v7 = vpack.c.bf16 %v2098_v38, %v2082_v36  ;;  %v8459_v35 = vld [vmem:[%s10255_s15 + $0x130] sm:$0xff]   ;;  %v8461_v37 = vld [vmem:[%s10255_s15 + $0x178] sm:$0xff]  }
 0xa93   :  { %v9265_v52 = vpack.c.bf16 %v2097_v49, %v2081_v47  ;;  %v9267_v53 = vpack.c.bf16 %v2099_v50, %v2083_v48  ;;  %7795 = vmatpush3.bf16.msra.mxu0 %v8447_v29  ;;  %7817 = vmatpush3.bf16.msra.mxu1 %v8448_v26  ;;  %v2020_v54 = vpop.f32.mrb[28].mxu0  ;;  %v2063_v55 = vpop.f32.mrb[28].mxu1  ;;  %v8460_v36 = vld [vmem:[%s10255_s15 + $0x1b0] sm:$0xff]   ;;  %v8462_v38 = vld [vmem:[%s10255_s15 + $0x1f8] sm:$0xff]   ;;  %v8465_v47 = vld [vmem:[%s10255_s15 + $0x240] sm:$0xff]  }
 0xa94   :  { %v2021_v58 = vadd.f32 %v2020_v54, %v1616_v19  ;;  %v2064_v59 = vadd.f32 %v2063_v55, %v1624_v24  ;;  %v2022_v60 = vpop.f32.mrb[29].mxu0  ;;  %v2065_v61 = vpop.f32.mrb[29].mxu1  ;;  %7796 = vmatprep.subr.bf16.mxu0 %v8449_v43  ;;  %7818 = vmatprep.subr.bf16.mxu1 %v8450_v44  ;;  %v8463_v43 = vld [vmem:[%s10255_s15 + $0x138] sm:$0xff]   ;;  %v8466_v48 = vld [vmem:[%s10255_s15 + $0x2c0] sm:$0xff]   ;;  %v8469_v54 = vld [vmem:[%s10255_s15 + $0x248] sm:$0xff]  }
 0xa95   :  { %v2023_v2 = vadd.f32 %v2022_v60, %v1620_v25  ;;  %v2066_v3 = vadd.f32 %v2065_v61, %v1628_v32  ;;  %v2024_v16 = vpop.f32.mrb[30].mxu0  ;;  %v2067_v15 = vpop.f32.mrb[30].mxu1  ;;  %v8464_v44 = vld [vmem:[%s10255_s15 + $0x1b8] sm:$0xff]   ;;  %v8467_v49 = vld [vmem:[%s10255_s15 + $0x200] sm:$0xff]   ;;  %v8470_v55 = vld [vmem:[%s10255_s15 + $0x2c8] sm:$0xff]  }
 0xa96   :  { %v2025_v4 = vadd.f32 %v2024_v16, %v1616_v19  ;;  %v2068_v5 = vadd.f32 %v2067_v15, %v1624_v24  ;;  %v2026_v6 = vpop.f32.mrb[31].mxu0  ;;  %v2069_v8 = vpop.f32.mrb[31].mxu1  ;;  %v2084_v14 = vmax.f32 %v2021_v58, 0.0  ;;  %v2086_v18 = vmax.f32 %v2064_v59, 0.0  ;;  %v8457_v19 = vld [vmem:[%s10255_s15 + $0x170] sm:$0xff]   ;;  %v8468_v50 = vld [vmem:[%s10255_s15 + $0x280] sm:$0xff]  }
 0xa97   :  { %v2027_v9 = vadd.f32 %v2026_v6, %v1620_v25  ;;  %v2070_v10 = vadd.f32 %v2069_v8, %v1628_v32  ;;  %7797 = vmatpush3.bf16.msra.mxu0 %v8451_v56  ;;  %7819 = vmatpush3.bf16.msra.mxu1 %v8452_v57  ;;  %v2085_v23 = vmax.f32 %v2023_v2, 0.0  ;;  %v2087_v24 = vmax.f32 %v2066_v3, 0.0  ;;  %v8471_v56 = vld [vmem:[%s10255_s15 + $0x208] sm:$0xff]   ;;  %v8477_v58 = vld [vmem:[%s10255_s15 + $0x258] sm:$0xff]   ;;  %v8483_v2 = vld [vmem:[%s10255_s15 + $0x220] sm:$0xff]  }
 0xa98   :  { %v2100_v20 = vmax.f32 %v2025_v4, 0.0  ;;  %v2102_v21 = vmax.f32 %v2068_v5, 0.0  ;;  %7798 = vmatprep.subr.bf16.mxu0 %v8453_v0  ;;  %7820 = vmatprep.subr.bf16.mxu1 %v8454_v1  ;;  %v8472_v57 = vld [vmem:[%s10255_s15 + $0x288] sm:$0xff]   ;;  %v8478_v59 = vld [vmem:[%s10255_s15 + $0x2d8] sm:$0xff]   ;;  %v8481_v0 = vld [vmem:[%s10255_s15 + $0x260] sm:$0xff]  }
 0xa99   :  { %v2101_v25 = vmax.f32 %v2027_v9, 0.0  ;;  %v2103_v27 = vmax.f32 %v2070_v10, 0.0  ;;  %v8479_v60 = vld [vmem:[%s10255_s15 + $0x218] sm:$0xff]   ;;  %v8482_v1 = vld [vmem:[%s10255_s15 + $0x2e0] sm:$0xff]   ;;  %v8485_v16 = vld [vmem:[%s10255_s15 + $0x268] sm:$0xff]  }
 0xa9a   :  { %v9293_v28 = vpack.c.bf16 %v2100_v20, %v2084_v14  ;;  %v9295_v29 = vpack.c.bf16 %v2102_v21, %v2086_v18  ;;  %v8480_v61 = vld [vmem:[%s10255_s15 + $0x298] sm:$0xff]   ;;  %v8484_v3 = vld [vmem:[%s10255_s15 + $0x2a0] sm:$0xff]   ;;  %v8486_v15 = vld [vmem:[%s10255_s15 + $0x2e8] sm:$0xff]  }
 0xa9b   :  { %v9297_v26 = vpack.c.bf16 %v2101_v25, %v2085_v23  ;;  %v9299_v32 = vpack.c.bf16 %v2103_v27, %v2087_v24  ;;  %7799 = vmatpush3.bf16.msra.mxu0 %v8455_v12  ;;  %7821 = vmatpush3.bf16.msra.mxu1 %v8456_v13  ;;  %v8487_v4 = vld [vmem:[%s10255_s15 + $0x228] sm:$0xff]   ;;  %v8489_v6 = vld [vmem:[%s10255_s15 + $0x270] sm:$0xff]   ;;  %v8493_v12 = vld [vmem:[%s10255_s15 + $0x278] sm:$0xff]  }
 0xa9c   :  { %7800 = vmatprep.subr.bf16.mxu0 %v8457_v19  ;;  %7822 = vmatprep.subr.bf16.mxu1 %v8458_v22  ;;  %v8488_v5 = vld [vmem:[%s10255_s15 + $0x2a8] sm:$0xff]   ;;  %v8490_v8 = vld [vmem:[%s10255_s15 + $0x2f0] sm:$0xff]   ;;  %v8494_v13 = vld [vmem:[%s10255_s15 + $0x2f8] sm:$0xff]  }
 0xa9d   :  { %v8491_v9 = vld [vmem:[%s10255_s15 + $0x230] sm:$0xff]   ;;  %v8495_v14 = vld [vmem:[%s10255_s15 + $0x238] sm:$0xff]   ;;  %v8497_v20 = vld [vmem:[%s10255_s15 + $0x340] sm:$0xff]  }
 0xa9e   :  { %v8492_v10 = vld [vmem:[%s10255_s15 + $0x2b0] sm:$0xff]   ;;  %v8496_v18 = vld [vmem:[%s10255_s15 + $0x2b8] sm:$0xff]   ;;  %v8498_v21 = vld [vmem:[%s10255_s15 + $0x3c0] sm:$0xff]  }
 0xa9f   :  { %7801 = vmatpush3.bf16.msra.mxu0 %v8459_v35  ;;  %7823 = vmatpush3.bf16.msra.mxu1 %v8460_v36  ;;  %v8499_v19 = vld [vmem:[%s10255_s15 + $0x300] sm:$0xff]   ;;  %v8501_v23 = vld [vmem:[%s10255_s15 + $0x348] sm:$0xff]   ;;  %v8508_v35 = vld [vmem:[%s10255_s15 + $0x390] sm:$0xff]  }
 0xaa0   :  { %7802 = vmatprep.subr.bf16.mxu0 %v8461_v37  ;;  %7824 = vmatprep.subr.bf16.mxu1 %v8462_v38  ;;  %v8500_v22 = vld [vmem:[%s10255_s15 + $0x380] sm:$0xff]   ;;  %v8502_v24 = vld [vmem:[%s10255_s15 + $0x3c8] sm:$0xff]   ;;  %v8510_v36 = vld [vmem:[%s10255_s15 + $0x3d8] sm:$0xff]  }
 0xaa1   :  { %v8503_v25 = vld [vmem:[%s10255_s15 + $0x308] sm:$0xff]   ;;  %v8511_v37 = vld [vmem:[%s10255_s15 + $0x318] sm:$0xff]  }
 0xaa2   :  { %v8504_v27 = vld [vmem:[%s10255_s15 + $0x388] sm:$0xff]   ;;  %v8512_v38 = vld [vmem:[%s10255_s15 + $0x398] sm:$0xff]  }
 0xaa3   :  { %7803 = vmatpush3.bf16.msra.mxu0 %v8463_v43  ;;  %7825 = vmatpush3.bf16.msra.mxu1 %v8464_v44  ;;  %v8513_v43 = vld [vmem:[%s10255_s15 + $0x360] sm:$0xff]  }
 0xaa4   :  { %7832 = vmatprep.subr.bf16.mxu0 %v8465_v47  ;;  %7854 = vmatprep.subr.bf16.mxu1 %v8466_v48  ;;  %v8514_v44 = vld [vmem:[%s10255_s15 + $0x3e0] sm:$0xff]  }
 0xaa5   :  { %v8515_v47 = vld [vmem:[%s10255_s15 + $0x320] sm:$0xff]  }
 0xaa6   :  { %3266 = vmatmul.mubr.bf16.vlgmr.msra.gmra.mrb[36].mxu0 %v9225_v62  ;;  %3307 = vmatmul.mubr.bf16.vlgmr.msra.gmra.mrb[36].mxu1 %v9227_v63  ;;  %v8473_v62 = vld [vmem:[%s10255_s15 + $0x250] sm:$0xff]   ;;  %v8516_v48 = vld [vmem:[%s10255_s15 + $0x3a0] sm:$0xff]  }
 0xaa7   :  { %7833 = vmatpush3.bf16.msra.mxu0 %v8467_v49  ;;  %3347 = vmatprep.mubr.bf16.mxu0 %v9265_v52  ;;  %v8474_v63 = vld [vmem:[%s10255_s15 + $0x2d0] sm:$0xff]   ;;  %v8517_v49 = vld [vmem:[%s10255_s15 + $0x368] sm:$0xff]  }
 0xaa8   :  { %7855 = vmatpush3.bf16.msra.mxu1 %v8468_v50  ;;  %3388 = vmatprep.mubr.bf16.mxu1 %v9267_v53  ;;  %v8475_v52 = vld [vmem:[%s10255_s15 + $0x210] sm:$0xff]   ;;  %v8518_v50 = vld [vmem:[%s10255_s15 + $0x3e8] sm:$0xff]  }
 0xaa9   :  { %7834 = vmatprep.subr.bf16.mxu0 %v8469_v54  ;;  %7856 = vmatprep.subr.bf16.mxu1 %v8470_v55  ;;  %v8476_v53 = vld [vmem:[%s10255_s15 + $0x290] sm:$0xff]   ;;  %v8519_v54 = vld [vmem:[%s10255_s15 + $0x328] sm:$0xff]  }
 0xaaa   :  { %v8520_v55 = vld [vmem:[%s10255_s15 + $0x3a8] sm:$0xff]  }
 0xaab   :  { %7835 = vmatpush3.bf16.msra.mxu0 %v8471_v56  ;;  %v8521_v56 = vld [vmem:[%s10255_s15 + $0x370] sm:$0xff]  }
 0xaac   :  { %7857 = vmatpush3.bf16.msra.mxu1 %v8472_v57  ;;  %7836 = vmatprep.subr.bf16.mxu0 %v8473_v62  ;;  %v8522_v57 = vld [vmem:[%s10255_s15 + $0x3f0] sm:$0xff]  }
 0xaad   :  { %7858 = vmatprep.subr.bf16.mxu1 %v8474_v63  ;;  %v8523_v62 = vld [vmem:[%s10255_s15 + $0x330] sm:$0xff]  }
 0xaae   :  { %v8524_v63 = vld [vmem:[%s10255_s15 + $0x3b0] sm:$0xff]  }
 0xaaf   :  { %7837 = vmatpush3.bf16.msra.mxu0 %v8475_v52  ;;  %v8525_v52 = vld [vmem:[%s10255_s15 + $0x378] sm:$0xff]  }
 0xab0   :  { %7859 = vmatpush3.bf16.msra.mxu1 %v8476_v53  ;;  %7838 = vmatprep.subr.bf16.mxu0 %v8477_v58  ;;  %v8526_v53 = vld [vmem:[%s10255_s15 + $0x3f8] sm:$0xff]  }
 0xab1   :  { %7860 = vmatprep.subr.bf16.mxu1 %v8478_v59  ;;  %v8527_v58 = vld [vmem:[%s10255_s15 + $0x338] sm:$0xff]  }
 0xab2   :  { %v8528_v59 = vld [vmem:[%s10255_s15 + $0x3b8] sm:$0xff]  }
 0xab3   :  { %7839 = vmatpush3.bf16.msra.mxu0 %v8479_v60 }
 0xab4   :  { %7861 = vmatpush3.bf16.msra.mxu1 %v8480_v61  ;;  %7840 = vmatprep.subr.bf16.mxu0 %v8481_v0  ;;  %v7069_v0 = vld [vmem:[%s10259_s16] ss:$0 sm:$0xff] }
 0xab5   :  { %7862 = vmatprep.subr.bf16.mxu1 %v8482_v1 }
 0xab7   :  { %7841 = vmatpush3.bf16.msra.mxu0 %v8483_v2 }
 0xab8   :  { %7863 = vmatpush3.bf16.msra.mxu1 %v8484_v3  ;;  %7842 = vmatprep.subr.bf16.mxu0 %v8485_v16 }
 0xab9   :  { %7864 = vmatprep.subr.bf16.mxu1 %v8486_v15 }
 0xabb   :  { %7843 = vmatpush3.bf16.msra.mxu0 %v8487_v4 }
 0xabc   :  { %7865 = vmatpush3.bf16.msra.mxu1 %v8488_v5  ;;  %7844 = vmatprep.subr.bf16.mxu0 %v8489_v6 }
 0xabd   :  { %7866 = vmatprep.subr.bf16.mxu1 %v8490_v8 }
 0xabf   :  { %7845 = vmatpush3.bf16.msra.mxu0 %v8491_v9 }
 0xac0   :  { %7867 = vmatpush3.bf16.msra.mxu1 %v8492_v10  ;;  %7846 = vmatprep.subr.bf16.mxu0 %v8493_v12 }
 0xac1   :  { %7868 = vmatprep.subr.bf16.mxu1 %v8494_v13 }
 0xac3   :  { %7847 = vmatpush3.bf16.msra.mxu0 %v8495_v14 }
 0xac4   :  { %7869 = vmatpush3.bf16.msra.mxu1 %v8496_v18  ;;  %7876 = vmatprep.subr.bf16.mxu0 %v8497_v20 }
 0xac5   :  { %7898 = vmatprep.subr.bf16.mxu1 %v8498_v21 }
 0xac6   :  { %3348 = vmatmul.mubr.bf16.vlgmr.msra.gmra.mrb[40].mxu0 %v9261_v51  ;;  %v8505_v51 = vld [vmem:[%s10255_s15 + $0x350] sm:$0xff]  }
 0xac7   :  { %3389 = vmatmul.mubr.bf16.vlgmr.msra.gmra.mrb[40].mxu1 %v9263_v7  ;;  %7877 = vmatpush3.bf16.msra.mxu0 %v8499_v19  ;;  %v8506_v7 = vld [vmem:[%s10255_s15 + $0x3d0] sm:$0xff]  }
 0xac8   :  { %3429 = vmatprep.mubr.bf16.mxu0 %v9297_v26  ;;  %7899 = vmatpush3.bf16.msra.mxu1 %v8500_v22  ;;  %v8507_v26 = vld [vmem:[%s10255_s15 + $0x310] sm:$0xff]  }
 0xac9   :  { %3470 = vmatprep.mubr.bf16.mxu1 %v9299_v32  ;;  %7878 = vmatprep.subr.bf16.mxu0 %v8501_v23  ;;  %v8509_v32 = vld [vmem:[%s10255_s15 + $0x358] sm:$0xff]  }
 0xaca   :  { %7900 = vmatprep.subr.bf16.mxu1 %v8502_v24 }
 0xacb   :  { %7879 = vmatpush3.bf16.msra.mxu0 %v8503_v25 }
 0xacc   :  { %7901 = vmatpush3.bf16.msra.mxu1 %v8504_v27  ;;  %7880 = vmatprep.subr.bf16.mxu0 %v8505_v51 }
 0xacd   :  { %7902 = vmatprep.subr.bf16.mxu1 %v8506_v7 }
 0xacf   :  { %7881 = vmatpush3.bf16.msra.mxu0 %v8507_v26 }
 0xad0   :  { %7903 = vmatpush3.bf16.msra.mxu1 %v8508_v35  ;;  %7882 = vmatprep.subr.bf16.mxu0 %v8509_v32 }
 0xad1   :  { %7904 = vmatprep.subr.bf16.mxu1 %v8510_v36 }
 0xad3   :  { %7883 = vmatpush3.bf16.msra.mxu0 %v8511_v37 }
 0xad4   :  { %7905 = vmatpush3.bf16.msra.mxu1 %v8512_v38  ;;  %7884 = vmatprep.subr.bf16.mxu0 %v8513_v43 }
 0xad5   :  { %7906 = vmatprep.subr.bf16.mxu1 %v8514_v44 }
 0xad7   :  { %7885 = vmatpush3.bf16.msra.mxu0 %v8515_v47 }
 0xad8   :  { %7907 = vmatpush3.bf16.msra.mxu1 %v8516_v48  ;;  %7886 = vmatprep.subr.bf16.mxu0 %v8517_v49 }
 0xad9   :  { %7908 = vmatprep.subr.bf16.mxu1 %v8518_v50 }
 0xadb   :  { %7887 = vmatpush3.bf16.msra.mxu0 %v8519_v54 }
 0xadc   :  { %7909 = vmatpush3.bf16.msra.mxu1 %v8520_v55  ;;  %7888 = vmatprep.subr.bf16.mxu0 %v8521_v56 }
 0xadd   :  { %7910 = vmatprep.subr.bf16.mxu1 %v8522_v57 }
 0xadf   :  { %7889 = vmatpush3.bf16.msra.mxu0 %v8523_v62 }
 0xae0   :  { %7911 = vmatpush3.bf16.msra.mxu1 %v8524_v63  ;;  %7890 = vmatprep.subr.bf16.mxu0 %v8525_v52 }
 0xae1   :  { %7912 = vmatprep.subr.bf16.mxu1 %v8526_v53 }
 0xae3   :  { %7891 = vmatpush3.bf16.msra.mxu0 %v8527_v58 }
 0xae4   :  { %7913 = vmatpush3.bf16.msra.mxu1 %v8528_v59 }
 0xae6   :  { %3430 = vmatmul.mubr.bf16.vlgmr.msra.gmra.mrb[44].mxu0 %v9293_v28 }
 0xae7   :  { %3471 = vmatmul.mubr.bf16.vlgmr.msra.gmra.mrb[44].mxu1 %v9295_v29 }
 0xb59   :  { %v7760_v60 = vpop.f32.mrb[32].mxu0  ;;  %v7782_v61 = vpop.f32.mrb[32].mxu1 }
 0xb5a   :  { %v7761_v1 = vpop.f32.mrb[33].mxu0  ;;  %v7783_v2 = vpop.f32.mrb[33].mxu1 }
 0xb5b   :  { %v7762_v3 = vadd.f32 %v7761_v1, %v7760_v60  ;;  %v7784_v16 = vadd.f32 %v7783_v2, %v7782_v61  ;;  %v7763_v15 = vpop.f32.mrb[34].mxu0  ;;  %v7785_v4 = vpop.f32.mrb[34].mxu1 }
 0xb5c   :  { %v7764_v5 = vpop.f32.mrb[35].mxu0  ;;  %v7786_v6 = vpop.f32.mrb[35].mxu1 }
 0xb5d   :  { %v3186_v8 = vadd.f32 %v7762_v3, %v7069_v0  ;;  %v7765_v9 = vadd.f32 %v7764_v5, %v7763_v15  ;;  %v7787_v10 = vadd.f32 %v7786_v6, %v7785_v4 }
 0xb5f   :  { %v3227_v28 = vadd.f32 %v7784_v16, %v3186_v8  ;;  %v3189_v12 = vadd.f32 %v7765_v9, %v7069_v0 }
 0xb61   :  { %v3230_v29 = vadd.f32 %v7787_v10, %v3189_v12 }
 0xb79   :  { %v7804_v13 = vpop.f32.mrb[36].mxu0  ;;  %v7826_v14 = vpop.f32.mrb[36].mxu1 }
 0xb7a   :  { %v7805_v18 = vpop.f32.mrb[37].mxu0  ;;  %v7827_v20 = vpop.f32.mrb[37].mxu1 }
 0xb7b   :  { %v7806_v21 = vadd.f32 %v7805_v18, %v7804_v13  ;;  %v7828_v19 = vadd.f32 %v7827_v20, %v7826_v14  ;;  %v7807_v22 = vpop.f32.mrb[38].mxu0  ;;  %v7829_v23 = vpop.f32.mrb[38].mxu1 }
 0xb7c   :  { %v7808_v24 = vpop.f32.mrb[39].mxu0  ;;  %v7830_v25 = vpop.f32.mrb[39].mxu1 }
 0xb7d   :  { %v3268_v27 = vadd.f32 %v7806_v21, %v3227_v28  ;;  %v7809_v51 = vadd.f32 %v7808_v24, %v7807_v22  ;;  %v7831_v7 = vadd.f32 %v7830_v25, %v7829_v23  ;;  %v7201_v25 = vld [vmem:[%s10277_s2 + $0x28] sm:$0xff] }
 0xb7f   :  { %v3309_v26 = vadd.f32 %v7828_v19, %v3268_v27  ;;  %v3271_v35 = vadd.f32 %v7809_v51, %v3230_v29  ;;  %v7212_v27 = vld [vmem:[%s10279_s28 + $0x20] sm:$0xff] }
 0xb81   :  { %v3312_v32 = vadd.f32 %v7831_v7, %v3271_v35  ;;  %v7213_v7 = vld [vmem:[%s10279_s28 + $0x28] sm:$0xff]  ;;  %v7206_v35 = vld [vmem:[%s10278_s3 + $0x20] sm:$0xff] }
 0xb99   :  { %v7848_v36 = vpop.f32.mrb[40].mxu0 }
 0xb9a   :  { %v7870_v37 = vpop.f32.mrb[40].mxu1  ;;  %v7849_v38 = vpop.f32.mrb[41].mxu0 }
 0xb9b   :  { %v7850_v43 = vadd.f32 %v7849_v38, %v7848_v36  ;;  %v7871_v44 = vpop.f32.mrb[41].mxu1  ;;  %v7851_v47 = vpop.f32.mrb[42].mxu0 }
 0xb9c   :  { %v7872_v48 = vadd.f32 %v7871_v44, %v7870_v37  ;;  %v7873_v49 = vpop.f32.mrb[42].mxu1  ;;  %v7852_v50 = vpop.f32.mrb[43].mxu0 }
 0xb9d   :  { %v3350_v54 = vadd.f32 %v7850_v43, %v3309_v26  ;;  %v7853_v55 = vadd.f32 %v7852_v50, %v7851_v47  ;;  %v7874_v56 = vpop.f32.mrb[43].mxu1  ;;  %v8374_v26 = vpack.c.bf16 %v7213_v7, %v7212_v27  ;;  %v7198_v50 = vld [vmem:[%s10260_s17] ss:$0 sm:$0xff]  ;;  %v7231_v27 = vld [vmem:[%s10278_s3 + $0x30] sm:$0xff] }
 0xb9e   :  { %v7875_v57 = vadd.f32 %v7874_v56, %v7873_v49  ;;  %v7199_v56 = vld [vmem:[%s10261_s18] ss:$0 sm:$0xff] }
 0xb9f   :  { %v3391_v62 = vadd.f32 %v7872_v48, %v3350_v54  ;;  %v3353_v63 = vadd.f32 %v7853_v55, %v3312_v32  ;;  %8375 = vmatprep.subr.bf16.mxu1 %v8374_v26  ;;  %v7207_v32 = vld [vmem:[%s10278_s3 + $0x28] sm:$0xff] }
 0xba0   :  { %8377 = vmatpush3.bf16.msra.mxu1 %v8374_v26  ;;  %v8370_v36 = vpack.c.bf16 %v7207_v32, %v7206_v35  ;;  %v7225_v26 = vld [vmem:[%s10277_s2 + $0x30] sm:$0xff]  ;;  %v7226_v35 = vld [vmem:[%s10277_s2 + $0x38] sm:$0xff] }
 0xba1   :  { %v3394_v52 = vadd.f32 %v7875_v57, %v3353_v63  ;;  %8269 = vmatprep.subr.mxu1 %v8705_v17  ;;  %v8378_v32 = vpack.c.bf16 %v7226_v35, %v7225_v26  ;;  %v7224_v35 = vld [vmem:[%s10252_s9 + $0x10] sm:$0xff] }
 0xbb9   :  { %v7892_v53 = vpop.f32.mrb[44].mxu0 }
 0xbba   :  { %v7914_v58 = vpop.f32.mrb[44].mxu1  ;;  %v7893_v59 = vpop.f32.mrb[45].mxu0 }
 0xbbb   :  { %v7894_v60 = vadd.f32 %v7893_v59, %v7892_v53  ;;  %v7915_v61 = vpop.f32.mrb[45].mxu1  ;;  %v7895_v0 = vpop.f32.mrb[46].mxu0 }
 0xbbc   :  { %v7916_v1 = vadd.f32 %v7915_v61, %v7914_v58  ;;  %v7917_v2 = vpop.f32.mrb[46].mxu1  ;;  %v7896_v3 = vpop.f32.mrb[47].mxu0 }
 0xbbd   :  { %v3432_v16 = vadd.f32 %v7894_v60, %v3391_v62  ;;  %v7897_v15 = vadd.f32 %v7896_v3, %v7895_v0  ;;  %v7918_v4 = vpop.f32.mrb[47].mxu1  ;;  %v7209_v0 = vld [vmem:[%s10249_s6 + $0x2] ss:$0 sm:$0xff] }
 0xbbe   :  { %v7919_v5 = vadd.f32 %v7918_v4, %v7917_v2  ;;  %v7203_v2 = vld [vmem:[%s10250_s4 + $0x2] ss:$0 sm:$0xff] }
 0xbbf   :  { %v3473_v6 = vadd.f32 %v7916_v1, %v3432_v16  ;;  %v3435_v8 = vadd.f32 %v7897_v15, %v3394_v52  ;;  %v7215_v15 = vld [vmem:[%s10251_s8 + $0x2] ss:$0 sm:$0xff] }
 0xbc1   :  { %v3476_v9 = vadd.f32 %v7919_v5, %v3435_v8  ;;  %v3479_v10 = vadd.f32 %v3473_v6, %v9029_v42 }
 0xbc3   :  { %v3483_v28 = vsel %vm174_vm2, %v3479_v10, 0.0  ;;  %v3480_v12 = vadd.f32 %v3476_v9, %v9027_v41  ;;  %v7200_v41 = vld [vmem:[%s10277_s2 + $0x20] sm:$0xff] }
 0xbc4   :  { %3484 = vadd.xlane.f32.xlu0 %v3483_v28  ;;  %v8366_v51 = vpack.c.bf16 %v7201_v25, %v7200_v41 }
 0xbc5   :  { %v3486_v29 = vsel %vm174_vm2, %v3480_v12, 0.0 }
 0xbc6   :  { %3487 = vadd.xlane.f32.xlu1 %v3486_v29  ;;  %8367 = vmatprep.subr.bf16.mxu0 %v8366_v51 }
 0xbc7   :  { %8369 = vmatpush3.bf16.msra.mxu0 %v8366_v51  ;;  %v7232_v51 = vld [vmem:[%s10278_s3 + $0x38] sm:$0xff] }
 0xbc8   :  { %8371 = vmatprep.subr.bf16.mxu0 %v8370_v36  ;;  %v8382_v7 = vpack.c.bf16 %v7232_v51, %v7231_v27 }
 0xc51   :  { %v3485_v13 = vpop.xlane.xlu0 %3484 }
 0xc52   :  { %v3489_v14 = vmul.f32 0.0625, %v3485_v13 }
 0xc53   :  { %v3488_v18 = vpop.xlane.xlu1 %3487 }
 0xc54   :  { %v3491_v20 = vsub.f32 %v3479_v10, %v3489_v14  ;;  %v3490_v21 = vmul.f32 0.0625, %v3488_v18 }
 0xc56   :  { %v3492_v19 = vsub.f32 %v3480_v12, %v3490_v21  ;;  %v3493_v22 = vmul.f32 %v3491_v20, %v3491_v20 }
 0xc58   :  { %v3495_v23 = vsel %vm174_vm2, %v3493_v22, 0.0  ;;  %v3494_v24 = vmul.f32 %v3492_v19, %v3492_v19 }
 0xc59   :  { %3496 = vadd.xlane.f32.xlu0 %v3495_v23 }
 0xc5a   :  { %v3498_v42 = vsel %vm174_vm2, %v3494_v24, 0.0 }
 0xc5b   :  { %3499 = vadd.xlane.f32.xlu1 %v3498_v42 }
 0xce6   :  { %v3497_v37 = vpop.xlane.xlu0 %3496 }
 0xce7   :  { %v3501_v38 = vmul.f32 0.0625, %v3497_v37 }
 0xce8   :  { %v3500_v43 = vpop.xlane.xlu1 %3499 }
 0xce9   :  { %v3503_v44 = vadd.f32 1e-05, %v3501_v38  ;;  %v3502_v47 = vmul.f32 0.0625, %v3500_v43  ;;  %v7237_v38 = vld [vmem:[%s10279_s28 + $0x30] sm:$0xff]  ;;  %v7238_v43 = vld [vmem:[%s10279_s28 + $0x38] sm:$0xff] }
 0xceb   :  { %8677 = vrsqrt.f32 %v3503_v44  ;;  %v3504_v48 = vadd.f32 1e-05, %v3502_v47 }
 0xced   :  { %8679 = vrsqrt.f32 %v3504_v48 }
 0xcf5   :  { %v8678_v49 = vpop.eup %8677 }
 0xcf6   :  { %v3507_v54 = vmul.f32 %v8678_v49, %v3491_v20 }
 0xcf7   :  { %v8680_v55 = vpop.eup %8679 }
 0xcf8   :  { %v3515_v57 = vmul.f32 %v7198_v50, %v3507_v54  ;;  %v3508_v62 = vmul.f32 %v8680_v55, %v3492_v19 }
 0xcfa   :  { %v9555_v63 = vadd.f32 %v7199_v56, %v3515_v57  ;;  %v3516_v52 = vmul.f32 %v7198_v50, %v3508_v62  ;;  %v8386_v50 = vpack.c.bf16 %v7238_v43, %v7237_v38  ;;  %v7234_v62 = vld [vmem:[%s10249_s6 + $0x3] ss:$0 sm:$0xff]  ;;  %v7255_v43 = vld [vmem:[%s10253_s10 + $0x1] ss:$0 sm:$0xff] }
 0xcfc   :  { %v9557_v53 = vadd.f32 %v7199_v56, %v3516_v52  ;;  %8247 = vmatprep.mubr.msk.f32.mxu0 %vm174_vm2, %v9555_v63  ;;  %8261 = vmatprep.mubr.msk.f32.mxu1 %vm174_vm2, %v9555_v63 }
 0xcfe   :  { %8248 = vmatmul.mubr.msk.f32.vlgmr.msra.gmra.mrb[48].mxu0 %vm174_vm2, %v9557_v53  ;;  %8262 = vmatmul.mubr.msk.f32.vlgmr.msra.gmra.mrb[48].mxu1 %vm174_vm2, %v9557_v53 }
 0xcff   :  { %8373 = vmatpush3.bf16.msra.mxu0 %v8370_v36  ;;  %8254 = vmatprep.mubr.msk.f32.mxu0 %vm174_vm2, %v9555_v63 }
 0xd00   :  { %8264 = vmatprep.subr.mxu0 %v8705_v17  ;;  %8271 = vmatprep.mubr.msk.f32.mxu1 %vm8706_vm3, %v8705_v17 }
 0xd02   :  { %8255 = vmatmul.mubr.msk.f32.vlgmr.msra.gmra.mrb[50].mxu0 %vm174_vm2, %v9557_v53 }
 0xd03   :  { %8266 = vmatprep.mubr.msk.f32.mxu0 %vm8706_vm3, %v8705_v17 }
 0xdd1   :  { %v8249_v58 = vpop.f32.mrb[48].mxu0  ;;  %v8263_v59 = vpop.f32.mrb[48].mxu1 }
 0xdd2   :  { %v3608_v60 = vpop.f32.mrb[49].mxu0  ;;  %v3780_v61 = vpop.f32.mrb[49].mxu1  ;;  %v3614_v5 = vadd.f32 %v8249_v58, %v7203_v2  ;;  %v3786_v6 = vadd.f32 %v8263_v59, %v7215_v15 }
 0xdd3   :  { %v3609_v8 = vadd.f32 %v7203_v2, %v3608_v60  ;;  %v3781_v9 = vadd.f32 %v7215_v15, %v3780_v61  ;;  %v7228_v60 = vld [vmem:[%s10250_s4 + $0x3] ss:$0 sm:$0xff] }
 0xdd4   :  { %v7240_v2 = vld [vmem:[%s10251_s8 + $0x3] ss:$0 sm:$0xff] }
 0xdd5   :  { %v8256_v1 = vpop.f32.mrb[50].mxu0 }
 0xdd6   :  { %v3700_v3 = vadd.f32 %v8256_v1, %v7209_v0  ;;  %v3694_v16 = vpop.f32.mrb[51].mxu0 }
 0xdd7   :  { %v3695_v4 = vadd.f32 %v7209_v0, %v3694_v16 }
 0xdd8   :  { %8270 = vmatpush3.xpose.msk.msra.mxu1 %vm424_vm4, %v3700_v3 }
 0xdd9   :  { %8265 = vmatpush3.xpose.msk.msra.mxu0 %vm424_vm4, %v3695_v4  ;;  %8279 = vmatprep.subr.mxu1 %v8705_v17 }
 0xdda   :  { %8274 = vmatprep.subr.mxu0 %v8705_v17 }
 0xddb   :  { %8272 = vmatmul.mubr.msk.f32.vlgmr.msra.gmra.mrb[50].mxu1 %vm424_vm4, %v3614_v5 }
 0xddc   :  { %8267 = vmatmul.mubr.msk.f32.vlgmr.msra.gmra.mrb[52].mxu0 %vm424_vm4, %v3609_v8  ;;  %8280 = vmatpush3.msra.mxu1 %v3786_v6 }
 0xddd   :  { %8275 = vmatpush3.msra.mxu0 %v3781_v9  ;;  %8281 = vmatprep.mubr.msk.f32.mxu1 %vm8706_vm3, %v8705_v17 }
 0xdde   :  { %8276 = vmatprep.mubr.msk.f32.mxu0 %vm8706_vm3, %v8705_v17  ;;  %8383 = vmatprep.subr.bf16.mxu1 %v8382_v7 }
 0xddf   :  { %8379 = vmatprep.subr.bf16.mxu0 %v8378_v32 }
 0xeae   :  { %v3937_v10 = vpop.f32.mrb[50].mxu1 }
 0xeaf   :  { %v3861_v28 = vpop.f32.mrb[52].mxu0  ;;  %v8273_v12 = vpop.f32.mrb[51].mxu1  ;;  %v3944_v29 = vsel %vm424_vm4, %v3937_v10, -inf }
 0xeb0   :  { %3945 = vmax.xlane.f32.xlu0 %v3944_v29  ;;  %v8268_v13 = vpop.f32.mrb[53].mxu0  ;;  %v3941_v14 = vsel %vm424_vm4, %v3861_v28, -inf }
 0xeb1   :  { %3942 = vmax.xlane.f32.xlu1 %v3941_v14 }
 0xf3d   :  { %v3946_v18 = vpop.xlane.xlu0 %3945 }
 0xf3e   :  { %v3948_v20 = vsub.f32 %v3937_v10, %v3946_v18  ;;  %v3943_v21 = vpop.xlane.xlu1 %3942 }
 0xf3f   :  { %v3947_v19 = vsub.f32 %v3861_v28, %v3943_v21 }
 0xf40   :  { %v3951_v22 = vmul.f32 1.442695, %v3948_v20 }
 0xf41   :  { %v3949_v23 = vmul.f32 1.442695, %v3947_v19 }
 0xf42   :  { %8681 = vpow2.f32 %v3951_v22 }
 0xf43   :  { %8683 = vpow2.f32 %v3949_v23 }
 0xf4c   :  { %v8682_v24 = vpop.eup %8681 }
 0xf4d   :  { %v8684_v42 = vpop.eup %8683  ;;  %v3956_v41 = vsel %vm424_vm4, %v8682_v24, 0.0 }
 0xf4e   :  { %3957 = vadd.xlane.f32.xlu0 %v3956_v41  ;;  %v3953_v25 = vsel %vm424_vm4, %v8684_v42, 0.0 }
 0xf4f   :  { %3954 = vadd.xlane.f32.xlu1 %v3953_v25 }
 0xfdb   :  { %v3958_v36 = vpop.xlane.xlu0 %3957 }
 0xfdc   :  { %8685 = vrcp.f32 %v3958_v36  ;;  %v3955_v37 = vpop.xlane.xlu1 %3954 }
 0xfdd   :  { %8687 = vrcp.f32 %v3955_v37 }
 0xfe6   :  { %v8686_v44 = vpop.eup %8685 }
 0xfe7   :  { %v8688_v47 = vpop.eup %8687  ;;  %v3962_v48 = vmul.f32 %v8686_v44, %v8682_v24 }
 0xfe8   :  { %v3960_v49 = vmul.f32 %v8688_v47, %v8684_v42  ;;  %v7249_v42 = vld [vmem:[%s10252_s9 + $0x18] sm:$0xff] }
 0xfe9   :  { %8282 = vmatmul.mubr.msk.f32.vlgmr.msra.gmra.mrb[52].mxu1 %vm424_vm4, %v3962_v48 }
 0xfea   :  { %8277 = vmatmul.mubr.msk.f32.vlgmr.msra.gmra.mrb[54].mxu0 %vm424_vm4, %v3960_v49  ;;  %8385 = vmatpush3.bf16.msra.mxu1 %v8382_v7 }
 0xfeb   :  { %8295 = vmatprep.mubr.msk.f32.mxu1 %vm174_vm2, %v9555_v63  ;;  %8381 = vmatpush3.bf16.msra.mxu0 %v8378_v32 }
 0xfec   :  { %8288 = vmatprep.mubr.msk.f32.mxu0 %vm174_vm2, %v9555_v63  ;;  %8387 = vmatprep.subr.bf16.mxu0 %v8386_v50 }
 0xfed   :  { %8296 = vmatmul.mubr.msk.f32.vlgmr.msra.gmra.mrb[54].mxu1 %vm174_vm2, %v9557_v53  ;;  %8305 = vmatprep.subr.mxu1 %v8705_v17 }
 0xfee   :  { %8289 = vmatmul.mubr.msk.f32.vlgmr.msra.gmra.mrb[56].mxu0 %vm174_vm2, %v9557_v53  ;;  %8307 = vmatprep.mubr.msk.f32.mxu1 %vm8706_vm3, %v8705_v17 }
 0xfef   :  { %8389 = vmatpush3.bf16.msra.mxu0 %v8386_v50  ;;  %8302 = vmatprep.mubr.msk.f32.mxu0 %vm174_vm2, %v9555_v63 }
 0xff0   :  { %8310 = vmatprep.subr.mxu0 %v8705_v17 }
 0xff2   :  { %8303 = vmatmul.mubr.msk.f32.vlgmr.msra.gmra.mrb[58].mxu0 %vm174_vm2, %v9557_v53 }
 0xff3   :  { %8312 = vmatprep.mubr.msk.f32.mxu0 %vm8706_vm3, %v8705_v17 }
0x10bc   :  { %v9637_v54 = vpop.f32.mrb[52].mxu1 }
0x10bd   :  { %v9639_v55 = vpop.f32.mrb[54].mxu0  ;;  %v8283_v56 = vpop.f32.mrb[53].mxu1 }
0x10be   :  { %v8278_v57 = vpop.f32.mrb[55].mxu0 }
0x10c0   :  { %v8297_v52 = vpop.f32.mrb[54].mxu1 }
0x10c1   :  { %v4280_v58 = vadd.f32 %v8297_v52, %v7234_v62  ;;  %v8290_v59 = vpop.f32.mrb[56].mxu0  ;;  %v4274_v61 = vpop.f32.mrb[55].mxu1 }
0x10c2   :  { %v4275_v0 = vadd.f32 %v7234_v62, %v4274_v61  ;;  %v4188_v1 = vpop.f32.mrb[57].mxu0  ;;  %v4194_v3 = vadd.f32 %v8290_v59, %v7228_v60 }
0x10c3   :  { %8311 = vmatpush3.xpose.msk.msra.mxu0 %vm424_vm4, %v4280_v58  ;;  %v4189_v16 = vadd.f32 %v7228_v60, %v4188_v1 }
0x10c4   :  { %8306 = vmatpush3.xpose.msk.msra.mxu1 %vm424_vm4, %v4275_v0  ;;  %8320 = vmatprep.subr.mxu0 %v8705_v17 }
0x10c5   :  { %v8304_v15 = vpop.f32.mrb[58].mxu0  ;;  %8315 = vmatprep.subr.mxu1 %v8705_v17 }
0x10c6   :  { %v4366_v4 = vadd.f32 %v8304_v15, %v7240_v2  ;;  %v4360_v5 = vpop.f32.mrb[59].mxu0  ;;  %8313 = vmatmul.mubr.msk.f32.vlgmr.msra.gmra.mrb[60].mxu0 %vm424_vm4, %v4194_v3  ;;  %v7261_v3 = vld [vmem:[%s10254_s13 + $0x88] sm:$0xff] }
0x10c7   :  { %v4361_v6 = vadd.f32 %v7240_v2, %v4360_v5  ;;  %8308 = vmatmul.mubr.msk.f32.vlgmr.msra.gmra.mrb[56].mxu1 %vm424_vm4, %v4189_v16  ;;  %8322 = vmatprep.mubr.msk.f32.mxu0 %vm8706_vm3, %v8705_v17  ;;  %v7268_v2 = vld [vmem:[%s10254_s13 + $0xc0] sm:$0xff]  ;;  %v7269_v15 = vld [vmem:[%s10254_s13 + $0xc8] sm:$0xff] }
0x10c8   :  { %8321 = vmatpush3.msra.mxu0 %v4366_v4  ;;  %8317 = vmatprep.mubr.msk.f32.mxu1 %vm8706_vm3, %v8705_v17  ;;  %v7280_v5 = vcombine.low %v7261_v3, %v7269_v15 }
0x10c9   :  { %8316 = vmatpush3.msra.mxu1 %v4361_v6  ;;  %v7281_v6 = vcombine.high %v7261_v3, %v7269_v15  ;;  %v8538_v3 = vld [vmem:[%s10255_s15 + $0x4d0] sm:$0xff]  }
0x10ca   :  { %8325 = vmatprep.subr.mxu1 %v7249_v42  ;;  %v8540_v15 = vld [vmem:[%s10255_s15 + $0x490] sm:$0xff]  }
0x1199   :  { %v4517_v8 = vpop.f32.mrb[60].mxu0 }
0x119a   :  { %v4441_v9 = vpop.f32.mrb[56].mxu1  ;;  %v8314_v10 = vpop.f32.mrb[61].mxu0  ;;  %v4524_v28 = vsel %vm424_vm4, %v4517_v8, -inf }
0x119b   :  { %4525 = vmax.xlane.f32.xlu1 %v4524_v28  ;;  %v8309_v12 = vpop.f32.mrb[57].mxu1  ;;  %v4521_v29 = vsel %vm424_vm4, %v4441_v9, -inf  ;;  %v7263_v10 = vld [vmem:[%s10254_s13 + $0x98] sm:$0xff] }
0x119c   :  { %4522 = vmax.xlane.f32.xlu0 %v4521_v29  ;;  %v7271_v29 = vld [vmem:[%s10254_s13 + $0xd8] sm:$0xff] }
0x1228   :  { %v4526_v13 = vpop.xlane.xlu1 %4525 }
0x1229   :  { %v4528_v14 = vsub.f32 %v4517_v8, %v4526_v13  ;;  %v4523_v18 = vpop.xlane.xlu0 %4522  ;;  %v7262_v8 = vld [vmem:[%s10254_s13 + $0x90] sm:$0xff]  ;;  %v7284_v13 = vcombine.low %v7263_v10, %v7271_v29 }
0x122a   :  { %v4527_v20 = vsub.f32 %v4441_v9, %v4523_v18  ;;  %v7270_v9 = vld [vmem:[%s10254_s13 + $0xd0] sm:$0xff] }
0x122b   :  { %v4531_v21 = vmul.f32 1.442695, %v4528_v14  ;;  %v7282_v28 = vcombine.low %v7262_v8, %v7270_v9  ;;  %v7283_v12 = vcombine.high %v7262_v8, %v7270_v9  ;;  %v7285_v14 = vcombine.high %v7263_v10, %v7271_v29  ;;  %v8544_v8 = vld [vmem:[%s10255_s15 + $0x498] sm:$0xff]   ;;  %v8545_v9 = vld [vmem:[%s10255_s15 + $0x460] sm:$0xff]   ;;  %v8549_v29 = vld [vmem:[%s10255_s15 + $0x468] sm:$0xff]  }
0x122c   :  { %v4529_v19 = vmul.f32 1.442695, %v4527_v20  ;;  %v8546_v10 = vld [vmem:[%s10255_s15 + $0x4e0] sm:$0xff]  }
0x122d   :  { %8689 = vpow2.f32 %v4531_v21 }
0x122e   :  { %8691 = vpow2.f32 %v4529_v19 }
0x1237   :  { %v8690_v17 = vpop.eup %8689 }
0x1238   :  { %v8692_v22 = vpop.eup %8691  ;;  %v4536_v23 = vsel %vm424_vm4, %v8690_v17, 0.0 }
0x1239   :  { %4537 = vadd.xlane.f32.xlu1 %v4536_v23  ;;  %v4533_v24 = vsel %vm424_vm4, %v8692_v22, 0.0 }
0x123a   :  { %4534 = vadd.xlane.f32.xlu0 %v4533_v24  ;;  %v7258_v24 = vld [vmem:[%s10256_s11 + $0x1] ss:$0 sm:$0xff] }
0x12c6   :  { %v4538_v41 = vpop.xlane.xlu1 %4537 }
0x12c7   :  { %8693 = vrcp.f32 %v4538_v41  ;;  %v4535_v25 = vpop.xlane.xlu0 %4534 }
0x12c8   :  { %8695 = vrcp.f32 %v4535_v25  ;;  %v7259_v25 = vld [vmem:[%s10257_s12 + $0x1] ss:$0 sm:$0xff] }
0x12d1   :  { %v8694_v27 = vpop.eup %8693 }
0x12d2   :  { %v8696_v51 = vpop.eup %8695  ;;  %v4542_v7 = vmul.f32 %v8694_v27, %v8690_v17 }
0x12d3   :  { %v4540_v26 = vmul.f32 %v8696_v51, %v8692_v22 }
0x12d4   :  { %8323 = vmatmul.mubr.msk.f32.vlgmr.msra.gmra.mrb[62].mxu0 %vm424_vm4, %v4542_v7 }
0x12d5   :  { %8318 = vmatmul.mubr.msk.f32.vlgmr.msra.gmra.mrb[58].mxu1 %vm424_vm4, %v4540_v26  ;;  %5129 = vmatprep.mubr.bf16.mxu0 %v8707_v11 }
0x12d6   :  { %8326 = vmatpush3.msra.mxu1 %v7249_v42 }
0x12d7   :  { %8330 = vmatprep.subr.mxu1 %v7224_v35 }
0x13a7   :  { %v4685_v32 = vpop.f32.mrb[62].mxu0 }
0x13a8   :  { %v4612_v36 = vpop.f32.mrb[58].mxu1  ;;  %v8324_v37 = vpop.f32.mrb[63].mxu0 }
0x13a9   :  { %v8319_v38 = vpop.f32.mrb[59].mxu1  ;;  %8327 = vmatprep.mubr.msk.f32.mxu1 %vm424_vm4, %v4612_v36  ;;  %v7272_v36 = vld [vmem:[%s10254_s13 + $0xe0] sm:$0xff]  ;;  %v7265_v37 = vld [vmem:[%s10254_s13 + $0xa8] sm:$0xff] }
0x13aa   :  { %8328 = vmatmul.mubr.msk.f32.vlgmr.msra.gmra.mrb[60].mxu1 %vm424_vm4, %v4685_v32  ;;  %v7273_v38 = vld [vmem:[%s10254_s13 + $0xe8] sm:$0xff] }
0x13ab   :  { %8331 = vmatpush3.msra.mxu1 %v7224_v35  ;;  %8332 = vmatprep.mubr.msk.f32.mxu1 %vm424_vm4, %v9639_v55  ;;  %v7264_v35 = vld [vmem:[%s10254_s13 + $0xa0] sm:$0xff] }
0x13ac   :  { %5140 = vmatprep.subr.bf16.mxu1 %v7281_v6  ;;  %v8543_v6 = vld [vmem:[%s10255_s15 + $0x418] sm:$0xff]  }
0x13b2   :  { %8333 = vmatmul.mubr.msk.f32.vlgmr.msra.gmra.mrb[60].mxu1 %vm424_vm4, %v9637_v54 }
0x13b3   :  { %5172 = vmatprep.mubr.bf16.mxu1 %v8707_v11  ;;  %5141 = vmatpush1.bf16.msra.mxu1 %v7280_v5  ;;  %v8542_v5 = vld [vmem:[%s10255_s15 + $0x4d8] sm:$0xff]  }
0x13b4   :  { %5226 = vmatprep.subr.bf16.mxu1 %v7285_v14  ;;  %v8551_v14 = vld [vmem:[%s10255_s15 + $0x428] sm:$0xff]  }
0x1485   :  { %v8334_v44 = vpop.f32.mrb[60].mxu1 }
0x1486   :  { %v4862_v47 = vadd.f32 %v8334_v44, %v7255_v43  ;;  %v4844_v48 = vpop.f32.mrb[61].mxu1  ;;  %v7287_v44 = vcombine.high %v7264_v35, %v7272_v36 }
0x1487   :  { %v4861_v49 = vadd.f32 %v7255_v43, %v4844_v48  ;;  %v7266_v48 = vld [vmem:[%s10254_s13 + $0xb0] sm:$0xff] }
0x1488   :  { %v4864_v50 = vadd.f32 %v4862_v47, %v9557_v53  ;;  %v7289_v47 = vcombine.high %v7265_v37, %v7273_v38 }
0x1489   :  { %v4863_v56 = vadd.f32 %v4861_v49, %v9555_v63  ;;  %v7260_v63 = vld [vmem:[%s10254_s13 + $0x80] sm:$0xff]  ;;  %v7274_v49 = vld [vmem:[%s10254_s13 + $0xf0] sm:$0xff] }
0x148a   :  { %v4872_v57 = vsel %vm174_vm2, %v4864_v50, 0.0  ;;  %v7279_v16 = vcombine.high %v7260_v63, %v7268_v2  ;;  %v7278_v4 = vcombine.low %v7260_v63, %v7268_v2  ;;  %v8536_v63 = vld [vmem:[%s10255_s15 + $0x488] sm:$0xff]   ;;  %v8537_v2 = vld [vmem:[%s10255_s15 + $0x450] sm:$0xff]  }
0x148b   :  { %4873 = vadd.xlane.f32.xlu1 %v4872_v57  ;;  %v4869_v55 = vsel %vm174_vm2, %v4863_v56, 0.0  ;;  %v7286_v57 = vcombine.low %v7264_v35, %v7272_v36 }
0x148c   :  { %4870 = vadd.xlane.f32.xlu0 %v4869_v55  ;;  %5097 = vmatprep.subr.bf16.mxu0 %v7279_v16  ;;  %v7288_v55 = vcombine.low %v7265_v37, %v7273_v38  ;;  %v8539_v16 = vld [vmem:[%s10255_s15 + $0x410] sm:$0xff]  }
0x148d   :  { %5098 = vmatpush1.bf16.msra.mxu0 %v7278_v4  ;;  %v8541_v4 = vld [vmem:[%s10255_s15 + $0x458] sm:$0xff]  }
0x148e   :  { %5183 = vmatprep.subr.bf16.mxu0 %v7283_v12  ;;  %v8548_v12 = vld [vmem:[%s10255_s15 + $0x4a0] sm:$0xff]  }
0x1518   :  { %v4874_v54 = vpop.xlane.xlu1 %4873 }
0x1519   :  { %v4876_v62 = vmul.f32 0.0625, %v4874_v54  ;;  %v4871_v52 = vpop.xlane.xlu0 %4870  ;;  %v7291_v54 = vcombine.high %v7266_v48, %v7274_v49 }
0x151a   :  { %v4875_v58 = vmul.f32 0.0625, %v4871_v52  ;;  %v7290_v52 = vcombine.low %v7266_v48, %v7274_v49 }
0x151b   :  { %v4878_v59 = vsub.f32 %v4864_v50, %v4876_v62  ;;  %v7267_v50 = vld [vmem:[%s10254_s13 + $0xb8] sm:$0xff] }
0x151c   :  { %v4877_v60 = vsub.f32 %v4863_v56, %v4875_v58  ;;  %v7275_v56 = vld [vmem:[%s10254_s13 + $0xf8] sm:$0xff] }
0x151d   :  { %v4880_v61 = vmul.f32 %v4878_v59, %v4878_v59  ;;  %v7293_v62 = vcombine.high %v7267_v50, %v7275_v56  ;;  %v7292_v58 = vcombine.low %v7267_v50, %v7275_v56 }
0x151e   :  { %v4879_v0 = vmul.f32 %v4877_v60, %v4877_v60 }
0x151f   :  { %v4884_v1 = vsel %vm174_vm2, %v4880_v61, 0.0  ;;  %v8531_v61 = vld [vmem:[%s10255_s15 + $0x400] sm:$0xff]  }
0x1520   :  { %4885 = vadd.xlane.f32.xlu1 %v4884_v1  ;;  %v4881_v53 = vsel %vm174_vm2, %v4879_v0, 0.0  ;;  %v8532_v0 = vld [vmem:[%s10255_s15 + $0x480] sm:$0xff]   ;;  %v8533_v1 = vld [vmem:[%s10255_s15 + $0x448] sm:$0xff]  }
0x1521   :  { %4882 = vadd.xlane.f32.xlu0 %v4881_v53  ;;  %v8534_v53 = vld [vmem:[%s10255_s15 + $0x4c8] sm:$0xff]  }
0x15ad   :  { %v4886_v18 = vpop.xlane.xlu1 %4885 }
0x15ae   :  { %v4888_v20 = vmul.f32 0.0625, %v4886_v18  ;;  %v4883_v21 = vpop.xlane.xlu0 %4882  ;;  %v8552_v18 = vld [vmem:[%s10255_s15 + $0x4a8] sm:$0xff]  }
0x15af   :  { %v4887_v19 = vmul.f32 0.0625, %v4883_v21  ;;  %v8554_v21 = vld [vmem:[%s10255_s15 + $0x4f0] sm:$0xff]  }
0x15b0   :  { %v4890_v17 = vadd.f32 1e-05, %v4888_v20  ;;  %v8553_v20 = vld [vmem:[%s10255_s15 + $0x470] sm:$0xff]  }
0x15b1   :  { %v4889_v22 = vadd.f32 1e-05, %v4887_v19  ;;  %v8555_v19 = vld [vmem:[%s10255_s15 + $0x430] sm:$0xff]  }
0x15b2   :  { %8697 = vrsqrt.f32 %v4890_v17  ;;  %v8556_v17 = vld [vmem:[%s10255_s15 + $0x4b0] sm:$0xff]  }
0x15b3   :  { %8699 = vrsqrt.f32 %v4889_v22  ;;  %v8557_v22 = vld [vmem:[%s10255_s15 + $0x478] sm:$0xff]  }
0x15bc   :  { %v8698_v23 = vpop.eup %8697 }
0x15bd   :  { %v8700_v42 = vpop.eup %8699  ;;  %v4894_v41 = vmul.f32 %v8698_v23, %v4878_v59  ;;  %v8529_v59 = vld [vmem:[%s10255_s15 + $0x440] sm:$0xff]   ;;  %v8558_v23 = vld [vmem:[%s10255_s15 + $0x4f8] sm:$0xff]  }
0x15be   :  { %v4893_v27 = vmul.f32 %v8700_v42, %v4877_v60  ;;  %v8530_v60 = vld [vmem:[%s10255_s15 + $0x4c0] sm:$0xff]   ;;  %v8560_v42 = vld [vmem:[%s10255_s15 + $0x4b8] sm:$0xff]  }
0x15bf   :  { %v4902_v51 = vmul.f32 %v7258_v24, %v4894_v41  ;;  %v8561_v41 = vld [vmem:[%s10255_s15 + $0x540] sm:$0xff]  }
0x15c0   :  { %v4901_v7 = vmul.f32 %v7258_v24, %v4893_v27  ;;  %v8559_v24 = vld [vmem:[%s10255_s15 + $0x438] sm:$0xff]   ;;  %v7276_v27 = vld [vmem:[%s10258_s14 + $0x10] sm:$0xff] }
0x15c1   :  { %v9719_v26 = vadd.f32 %v7259_v25, %v4902_v51  ;;  %v4937_v51 = vrot.slane %v7276_v27, %v9161_v30  ;;  %v4941_v35 = vrot.slane %v7276_v27, %v9168_v33  ;;  %v4949_v36 = vrot.slane %v7276_v27, %v9170_v34 }
0x15c2   :  { %v9724_v32 = vadd.f32 %v7259_v25, %v4901_v7  ;;  %v8562_v25 = vld [vmem:[%s10255_s15 + $0x5c0] sm:$0xff]   ;;  %v4945_v7 = vrot.slane %v7276_v27, %v9163_v31 }
0x15c4   :  { %v4911_v43 = vpack.c.bf16 %v9719_v26, %v9724_v32 }
0x15c6   :  { %7294 = vmatmul.mubr.msk.bf16.vlgmr.msra.gmra.mrb[64].mxu0 %vm174_vm2, %v4911_v43  ;;  %7295 = vmatmul.mubr.msk.bf16.vlgmr.msra.gmra.mrb[64].mxu1 %vm174_vm2, %v4911_v43 }
0x15c7   :  { %5184 = vmatpush1.bf16.msra.mxu0 %v7282_v28  ;;  %5227 = vmatpush1.bf16.msra.mxu1 %v7284_v13  ;;  %v8547_v28 = vld [vmem:[%s10255_s15 + $0x420] sm:$0xff]   ;;  %v8550_v13 = vld [vmem:[%s10255_s15 + $0x4e8] sm:$0xff]  }
0x15c8   :  { %5215 = vmatprep.mubr.bf16.mxu0 %v8707_v11  ;;  %5258 = vmatprep.mubr.bf16.mxu1 %v8707_v11 }
0x15c9   :  { %5269 = vmatprep.subr.bf16.mxu0 %v7287_v44  ;;  %5312 = vmatprep.subr.bf16.mxu1 %v7289_v47 }
0x15ce   :  { %7296 = vmatmul.mubr.msk.bf16.vlgmr.msra.gmra.mrb[68].mxu0 %vm174_vm2, %v4911_v43  ;;  %7297 = vmatmul.mubr.msk.bf16.vlgmr.msra.gmra.mrb[68].mxu1 %vm174_vm2, %v4911_v43 }
0x15cf   :  { %5270 = vmatpush1.bf16.msra.mxu0 %v7286_v57  ;;  %5313 = vmatpush1.bf16.msra.mxu1 %v7288_v55 }
0x15d0   :  { %5301 = vmatprep.mubr.bf16.mxu0 %v8707_v11  ;;  %5344 = vmatprep.mubr.bf16.mxu1 %v8707_v11 }
0x15d1   :  { %5355 = vmatprep.subr.bf16.mxu0 %v7291_v54  ;;  %5398 = vmatprep.subr.bf16.mxu1 %v7293_v62 }
0x15d6   :  { %7298 = vmatmul.mubr.msk.bf16.vlgmr.msra.gmra.mrb[72].mxu0 %vm174_vm2, %v4911_v43  ;;  %7299 = vmatmul.mubr.msk.bf16.vlgmr.msra.gmra.mrb[72].mxu1 %vm174_vm2, %v4911_v43 }
0x15d7   :  { %5356 = vmatpush1.bf16.msra.mxu0 %v7290_v52  ;;  %5399 = vmatpush1.bf16.msra.mxu1 %v7292_v58  ;;  %v4953_v58 = vrot.slane %v7276_v27, %v9176_v39 }
0x15d8   :  { %5387 = vmatprep.mubr.bf16.mxu0 %v8707_v11  ;;  %5430 = vmatprep.mubr.bf16.mxu1 %v8707_v11  ;;  %v8535_v11 = vld [vmem:[%s10255_s15 + $0x408] sm:$0xff]  }
0x15d9   :  { %7966 = vmatprep.subr.bf16.mxu0 %v8529_v59  ;;  %7988 = vmatprep.subr.bf16.mxu1 %v8530_v60  ;;  %v4961_v59 = vrot.slane %v7276_v27, %v9178_v40 }
0x15de   :  { %7300 = vmatmul.mubr.msk.bf16.vlgmr.msra.gmra.mrb[76].mxu0 %vm174_vm2, %v4911_v43  ;;  %7301 = vmatmul.mubr.msk.bf16.vlgmr.msra.gmra.mrb[76].mxu1 %vm174_vm2, %v4911_v43 }
0x15df   :  { %7967 = vmatpush3.bf16.msra.mxu0 %v8531_v61  ;;  %7989 = vmatpush3.bf16.msra.mxu1 %v8532_v0  ;;  %v4957_v0 = vrot.slane %v7276_v27, %v9180_v45 }
0x15e0   :  { %7968 = vmatprep.subr.bf16.mxu0 %v8533_v1  ;;  %7990 = vmatprep.subr.bf16.mxu1 %v8534_v53  ;;  %v4965_v1 = vrot.slane %v7276_v27, %v9182_v46 }
0x15e3   :  { %7969 = vmatpush3.bf16.msra.mxu0 %v8535_v11  ;;  %7991 = vmatpush3.bf16.msra.mxu1 %v8536_v63 }
0x15e4   :  { %7970 = vmatprep.subr.bf16.mxu0 %v8537_v2  ;;  %7992 = vmatprep.subr.bf16.mxu1 %v8538_v3 }
0x15e7   :  { %7971 = vmatpush3.bf16.msra.mxu0 %v8539_v16  ;;  %7993 = vmatpush3.bf16.msra.mxu1 %v8540_v15 }
0x15e8   :  { %7972 = vmatprep.subr.bf16.mxu0 %v8541_v4  ;;  %7994 = vmatprep.subr.bf16.mxu1 %v8542_v5  ;;  %v9879_v5 = vld [vmem:[%s10258_s14 + $0x18] sm:$0xff] }
0x15eb   :  { %7973 = vmatpush3.bf16.msra.mxu0 %v8543_v6  ;;  %7995 = vmatpush3.bf16.msra.mxu1 %v8544_v8 }
0x15ec   :  { %7974 = vmatprep.subr.bf16.mxu0 %v8545_v9  ;;  %7996 = vmatprep.subr.bf16.mxu1 %v8546_v10 }
0x15ef   :  { %7975 = vmatpush3.bf16.msra.mxu0 %v8547_v28  ;;  %7997 = vmatpush3.bf16.msra.mxu1 %v8548_v12 }
0x15f0   :  { %7976 = vmatprep.subr.bf16.mxu0 %v8549_v29  ;;  %7998 = vmatprep.subr.bf16.mxu1 %v8550_v13  ;;  %v8563_v29 = vld [vmem:[%s10255_s15 + $0x500] sm:$0xff]  }
0x15f1   :  { %v8564_v13 = vld [vmem:[%s10255_s15 + $0x580] sm:$0xff]  }
0x15f3   :  { %7977 = vmatpush3.bf16.msra.mxu0 %v8551_v14  ;;  %7999 = vmatpush3.bf16.msra.mxu1 %v8552_v18 }
0x15f4   :  { %7978 = vmatprep.subr.bf16.mxu0 %v8553_v20  ;;  %8000 = vmatprep.subr.bf16.mxu1 %v8554_v21 }
0x15f7   :  { %7979 = vmatpush3.bf16.msra.mxu0 %v8555_v19  ;;  %8001 = vmatpush3.bf16.msra.mxu1 %v8556_v17  ;;  %v8565_v19 = vld [vmem:[%s10255_s15 + $0x548] sm:$0xff]  }
0x15f8   :  { %7980 = vmatprep.subr.bf16.mxu0 %v8557_v22  ;;  %8002 = vmatprep.subr.bf16.mxu1 %v8558_v23  ;;  %v8566_v17 = vld [vmem:[%s10255_s15 + $0x5c8] sm:$0xff]   ;;  %v4969_v22 = vrot.slane %v9879_v5, %v9161_v30 }
0x15fb   :  { %7981 = vmatpush3.bf16.msra.mxu0 %v8559_v24  ;;  %8003 = vmatpush3.bf16.msra.mxu1 %v8560_v42 }
0x15fc   :  { %8010 = vmatprep.subr.bf16.mxu0 %v8561_v41  ;;  %8032 = vmatprep.subr.bf16.mxu1 %v8562_v25  ;;  %v4977_v25 = vrot.slane %v9879_v5, %v9163_v31  ;;  %v8568_v31 = vld [vmem:[%s10255_s15 + $0x588] sm:$0xff]  }
0x1699   :  { %v5131_v37 = vpop.f32.mrb[64].mxu0  ;;  %v5174_v38 = vpop.f32.mrb[64].mxu1 }
0x169a   :  { %v5132_v43 = vadd.f32 %v5131_v37, %v4937_v51  ;;  %v5175_v44 = vadd.f32 %v5174_v38, %v4945_v7  ;;  %v5133_v47 = vpop.f32.mrb[65].mxu0  ;;  %v5176_v48 = vpop.f32.mrb[65].mxu1  ;;  %v8567_v38 = vld [vmem:[%s10255_s15 + $0x508] sm:$0xff]  }
0x169b   :  { %v5134_v49 = vadd.f32 %v5133_v47, %v4941_v35  ;;  %v5177_v50 = vadd.f32 %v5176_v48, %v4949_v36  ;;  %v5135_v56 = vpop.f32.mrb[66].mxu0  ;;  %v5178_v57 = vpop.f32.mrb[66].mxu1 }
0x169c   :  { %v5136_v55 = vadd.f32 %v5135_v56, %v4937_v51  ;;  %v5179_v54 = vadd.f32 %v5178_v57, %v4945_v7  ;;  %v5137_v62 = vpop.f32.mrb[67].mxu0  ;;  %v5180_v52 = vpop.f32.mrb[67].mxu1  ;;  %v5441_v53 = vmax.f32 %v5132_v43, 0.0  ;;  %v5443_v11 = vmax.f32 %v5175_v44, 0.0 }
0x169d   :  { %v5138_v60 = vadd.f32 %v5137_v62, %v4941_v35  ;;  %v5181_v61 = vadd.f32 %v5180_v52, %v4949_v36  ;;  %v5442_v3 = vmax.f32 %v5134_v49, 0.0  ;;  %v5444_v16 = vmax.f32 %v5177_v50, 0.0  ;;  %v8570_v50 = vld [vmem:[%s10255_s15 + $0x5d0] sm:$0xff]  }
0x169e   :  { %v5457_v63 = vmax.f32 %v5136_v55, 0.0  ;;  %v5459_v2 = vmax.f32 %v5179_v54, 0.0  ;;  %v4973_v36 = vrot.slane %v9879_v5, %v9168_v33  ;;  %v4981_v43 = vrot.slane %v9879_v5, %v9170_v34  ;;  %v8569_v33 = vld [vmem:[%s10255_s15 + $0x550] sm:$0xff]  }
0x169f   :  { %v5458_v15 = vmax.f32 %v5138_v60, 0.0  ;;  %v5460_v4 = vmax.f32 %v5181_v61, 0.0  ;;  %v8571_v61 = vld [vmem:[%s10255_s15 + $0x510] sm:$0xff]  }
0x16a0   :  { %v5473_v6 = vpack.c.bf16 %v5457_v63, %v5441_v53  ;;  %v5475_v8 = vpack.c.bf16 %v5459_v2, %v5443_v11  ;;  %v8573_v2 = vld [vmem:[%s10255_s15 + $0x558] sm:$0xff]  }
0x16a1   :  { %v5474_v9 = vpack.c.bf16 %v5458_v15, %v5442_v3  ;;  %v5476_v10 = vpack.c.bf16 %v5460_v4, %v5444_v16  ;;  %v5217_v28 = vpop.f32.mrb[68].mxu0  ;;  %v5260_v12 = vpop.f32.mrb[68].mxu1  ;;  %v8574_v3 = vld [vmem:[%s10255_s15 + $0x5d8] sm:$0xff]  }
0x16a2   :  { %v5218_v14 = vadd.f32 %v5217_v28, %v4953_v58  ;;  %v5261_v18 = vadd.f32 %v5260_v12, %v4961_v59  ;;  %v5219_v20 = vpop.f32.mrb[69].mxu0  ;;  %v5262_v21 = vpop.f32.mrb[69].mxu1 }
0x16a3   :  { %v5220_v23 = vadd.f32 %v5219_v20, %v4957_v0  ;;  %v5263_v24 = vadd.f32 %v5262_v21, %v4965_v1  ;;  %v5221_v42 = vpop.f32.mrb[70].mxu0  ;;  %v5264_v41 = vpop.f32.mrb[70].mxu1  ;;  %6554 = vmatprep.mubr.bf16.mxu0 %v5474_v9  ;;  %6595 = vmatprep.mubr.bf16.mxu1 %v5476_v10  ;;  %v8575_v20 = vld [vmem:[%s10255_s15 + $0x518] sm:$0xff]   ;;  %v4997_v21 = vrot.slane %v9879_v5, %v9182_v46 }
0x16a4   :  { %v5222_v27 = vadd.f32 %v5221_v42, %v4953_v58  ;;  %v5265_v51 = vadd.f32 %v5264_v41, %v4961_v59  ;;  %v5223_v7 = vpop.f32.mrb[71].mxu0  ;;  %v5266_v35 = vpop.f32.mrb[71].mxu1  ;;  %6555 = vmatmul.mubr.bf16.vlgmr.msra.gmra.mrb[80].mxu0 %v5473_v6  ;;  %6596 = vmatmul.mubr.bf16.vlgmr.msra.gmra.mrb[80].mxu1 %v5475_v8  ;;  %v5445_v44 = vmax.f32 %v5218_v14, 0.0  ;;  %v5447_v47 = vmax.f32 %v5261_v18, 0.0 }
0x16a5   :  { %v5224_v37 = vadd.f32 %v5223_v7, %v4957_v0  ;;  %v5267_v30 = vadd.f32 %v5266_v35, %v4965_v1  ;;  %8011 = vmatpush3.bf16.msra.mxu0 %v8563_v29  ;;  %8033 = vmatpush3.bf16.msra.mxu1 %v8564_v13  ;;  %v5446_v56 = vmax.f32 %v5220_v23, 0.0  ;;  %v5448_v57 = vmax.f32 %v5263_v24, 0.0  ;;  %v8572_v0 = vld [vmem:[%s10255_s15 + $0x590] sm:$0xff]   ;;  %v8578_v23 = vld [vmem:[%s10255_s15 + $0x5e0] sm:$0xff]  }
0x16a6   :  { %v5461_v48 = vmax.f32 %v5222_v27, 0.0  ;;  %v5463_v49 = vmax.f32 %v5265_v51, 0.0  ;;  %8012 = vmatprep.subr.bf16.mxu0 %v8565_v19  ;;  %8034 = vmatprep.subr.bf16.mxu1 %v8566_v17  ;;  %v4985_v8 = vrot.slane %v9879_v5, %v9176_v39  ;;  %v4993_v29 = vrot.slane %v9879_v5, %v9178_v40  ;;  %v8576_v39 = vld [vmem:[%s10255_s15 + $0x598] sm:$0xff]  }
0x16a7   :  { %v5462_v55 = vmax.f32 %v5224_v37, 0.0  ;;  %v5464_v54 = vmax.f32 %v5267_v30, 0.0  ;;  %v4989_v13 = vrot.slane %v9879_v5, %v9180_v45  ;;  %v8577_v45 = vld [vmem:[%s10255_s15 + $0x560] sm:$0xff]  }
0x16a8   :  { %v9913_v62 = vpack.c.bf16 %v5461_v48, %v5445_v44  ;;  %v9915_v34 = vpack.c.bf16 %v5463_v49, %v5447_v47  ;;  %v8580_v37 = vld [vmem:[%s10255_s15 + $0x5a0] sm:$0xff]   ;;  %v8581_v44 = vld [vmem:[%s10255_s15 + $0x568] sm:$0xff]  }
0x16a9   :  { %v5478_v52 = vpack.c.bf16 %v5462_v55, %v5446_v56  ;;  %v5480_v58 = vpack.c.bf16 %v5464_v54, %v5448_v57  ;;  %8013 = vmatpush3.bf16.msra.mxu0 %v8567_v38  ;;  %8035 = vmatpush3.bf16.msra.mxu1 %v8568_v31  ;;  %v5303_v59 = vpop.f32.mrb[72].mxu0  ;;  %v5346_v60 = vpop.f32.mrb[72].mxu1  ;;  %v8582_v47 = vld [vmem:[%s10255_s15 + $0x5e8] sm:$0xff]  }
0x16aa   :  { %v5304_v1 = vadd.f32 %v5303_v59, %v4969_v22  ;;  %v5347_v53 = vadd.f32 %v5346_v60, %v4977_v25  ;;  %v5305_v11 = vpop.f32.mrb[73].mxu0  ;;  %v5348_v63 = vpop.f32.mrb[73].mxu1  ;;  %8014 = vmatprep.subr.bf16.mxu0 %v8569_v33  ;;  %8036 = vmatprep.subr.bf16.mxu1 %v8570_v50  ;;  %v8583_v59 = vld [vmem:[%s10255_s15 + $0x528] sm:$0xff]  }
0x16ab   :  { %v5306_v16 = vadd.f32 %v5305_v11, %v4973_v36  ;;  %v5349_v15 = vadd.f32 %v5348_v63, %v4981_v43  ;;  %v5307_v4 = vpop.f32.mrb[74].mxu0  ;;  %v5350_v6 = vpop.f32.mrb[74].mxu1  ;;  %6636 = vmatprep.mubr.bf16.mxu0 %v5478_v52  ;;  %6677 = vmatprep.mubr.bf16.mxu1 %v5480_v58  ;;  %v8584_v60 = vld [vmem:[%s10255_s15 + $0x5a8] sm:$0xff]   ;;  %v8585_v11 = vld [vmem:[%s10255_s15 + $0x570] sm:$0xff]  }
0x16ac   :  { %v5308_v9 = vadd.f32 %v5307_v4, %v4969_v22  ;;  %v5351_v10 = vadd.f32 %v5350_v6, %v4977_v25  ;;  %v5309_v28 = vpop.f32.mrb[75].mxu0  ;;  %v5352_v12 = vpop.f32.mrb[75].mxu1  ;;  %v5449_v19 = vmax.f32 %v5304_v1, 0.0  ;;  %v5451_v40 = vmax.f32 %v5347_v53, 0.0  ;;  %v8586_v63 = vld [vmem:[%s10255_s15 + $0x5f0] sm:$0xff]  }
0x16ad   :  { %v5310_v14 = vadd.f32 %v5309_v28, %v4973_v36  ;;  %v5353_v18 = vadd.f32 %v5352_v12, %v4981_v43  ;;  %8015 = vmatpush3.bf16.msra.mxu0 %v8571_v61  ;;  %8037 = vmatpush3.bf16.msra.mxu1 %v8572_v0  ;;  %v5450_v24 = vmax.f32 %v5306_v16, 0.0  ;;  %v5452_v42 = vmax.f32 %v5349_v15, 0.0  ;;  %v8579_v36 = vld [vmem:[%s10255_s15 + $0x520] sm:$0xff]   ;;  %v8588_v28 = vld [vmem:[%s10255_s15 + $0x5b0] sm:$0xff]   ;;  %v8589_v12 = vld [vmem:[%s10255_s15 + $0x578] sm:$0xff]  }
0x16ae   :  { %v5465_v17 = vmax.f32 %v5308_v9, 0.0  ;;  %v5467_v22 = vmax.f32 %v5351_v10, 0.0  ;;  %8016 = vmatprep.subr.bf16.mxu0 %v8573_v2  ;;  %8038 = vmatprep.subr.bf16.mxu1 %v8574_v3  ;;  %v8587_v10 = vld [vmem:[%s10255_s15 + $0x530] sm:$0xff]  }
0x16af   :  { %v5466_v41 = vmax.f32 %v5310_v14, 0.0  ;;  %v5468_v25 = vmax.f32 %v5353_v18, 0.0  ;;  %v8592_v14 = vld [vmem:[%s10255_s15 + $0x5b8] sm:$0xff]   ;;  %v8593_v18 = vld [vmem:[%s10255_s15 + $0x640] sm:$0xff]  }
0x16b0   :  { %v9949_v27 = vpack.c.bf16 %v5465_v17, %v5449_v19  ;;  %v9951_v46 = vpack.c.bf16 %v5467_v22, %v5451_v40  ;;  %v8597_v19 = vld [vmem:[%s10255_s15 + $0x648] sm:$0xff]  }
0x16b1   :  { %v9953_v5 = vpack.c.bf16 %v5466_v41, %v5450_v24  ;;  %v9955_v51 = vpack.c.bf16 %v5468_v25, %v5452_v42  ;;  %8017 = vmatpush3.bf16.msra.mxu0 %v8575_v20  ;;  %8039 = vmatpush3.bf16.msra.mxu1 %v8576_v39  ;;  %v5389_v7 = vpop.f32.mrb[76].mxu0  ;;  %v5432_v35 = vpop.f32.mrb[76].mxu1  ;;  %v8594_v20 = vld [vmem:[%s10255_s15 + $0x6c0] sm:$0xff]   ;;  %v8598_v40 = vld [vmem:[%s10255_s15 + $0x6c8] sm:$0xff]   ;;  %v8605_v24 = vld [vmem:[%s10255_s15 + $0x658] sm:$0xff]  }
0x16b2   :  { %v5390_v30 = vadd.f32 %v5389_v7, %v4985_v8  ;;  %v5433_v38 = vadd.f32 %v5432_v35, %v4993_v29  ;;  %v5391_v31 = vpop.f32.mrb[77].mxu0  ;;  %v5434_v43 = vpop.f32.mrb[77].mxu1  ;;  %8018 = vmatprep.subr.bf16.mxu0 %v8577_v45  ;;  %8040 = vmatprep.subr.bf16.mxu1 %v8578_v23  ;;  %v8595_v39 = vld [vmem:[%s10255_s15 + $0x600] sm:$0xff]   ;;  %v8599_v17 = vld [vmem:[%s10255_s15 + $0x608] sm:$0xff]   ;;  %v8603_v45 = vld [vmem:[%s10255_s15 + $0x610] sm:$0xff]  }
0x16b3   :  { %v5392_v48 = vadd.f32 %v5391_v31, %v4989_v13  ;;  %v5435_v49 = vadd.f32 %v5434_v43, %v4997_v21  ;;  %v5393_v33 = vpop.f32.mrb[78].mxu0  ;;  %v5436_v50 = vpop.f32.mrb[78].mxu1  ;;  %v8600_v22 = vld [vmem:[%s10255_s15 + $0x688] sm:$0xff]   ;;  %v8604_v23 = vld [vmem:[%s10255_s15 + $0x690] sm:$0xff]   ;;  %v8606_v42 = vld [vmem:[%s10255_s15 + $0x6d8] sm:$0xff]  }
0x16b4   :  { %v5394_v56 = vadd.f32 %v5393_v33, %v4985_v8  ;;  %v5437_v57 = vadd.f32 %v5436_v50, %v4993_v29  ;;  %v5395_v55 = vpop.f32.mrb[79].mxu0  ;;  %v5438_v54 = vpop.f32.mrb[79].mxu1  ;;  %v5453_v61 = vmax.f32 %v5390_v30, 0.0  ;;  %v5455_v0 = vmax.f32 %v5433_v38, 0.0  ;;  %v8590_v29 = vld [vmem:[%s10255_s15 + $0x5f8] sm:$0xff]   ;;  %v8611_v7 = vld [vmem:[%s10255_s15 + $0x620] sm:$0xff]  }
0x16b5   :  { %v5396_v52 = vadd.f32 %v5395_v55, %v4989_v13  ;;  %v5439_v58 = vadd.f32 %v5438_v54, %v4997_v21  ;;  %8019 = vmatpush3.bf16.msra.mxu0 %v8579_v36  ;;  %8041 = vmatpush3.bf16.msra.mxu1 %v8580_v37  ;;  %v5454_v2 = vmax.f32 %v5392_v48, 0.0  ;;  %v5456_v3 = vmax.f32 %v5435_v49, 0.0  ;;  %v8591_v13 = vld [vmem:[%s10255_s15 + $0x538] sm:$0xff]   ;;  %v8596_v21 = vld [vmem:[%s10255_s15 + $0x680] sm:$0xff]   ;;  %v8613_v36 = vld [vmem:[%s10255_s15 + $0x668] sm:$0xff]  }
0x16b6   :  { %v5469_v1 = vmax.f32 %v5394_v56, 0.0  ;;  %v5471_v53 = vmax.f32 %v5437_v57, 0.0  ;;  %8020 = vmatprep.subr.bf16.mxu0 %v8581_v44  ;;  %8042 = vmatprep.subr.bf16.mxu1 %v8582_v47  ;;  %v8607_v41 = vld [vmem:[%s10255_s15 + $0x618] sm:$0xff]   ;;  %v8612_v35 = vld [vmem:[%s10255_s15 + $0x6a0] sm:$0xff]   ;;  %v8614_v37 = vld [vmem:[%s10255_s15 + $0x6e8] sm:$0xff]  }
0x16b7   :  { %v5470_v16 = vmax.f32 %v5396_v52, 0.0  ;;  %v5472_v15 = vmax.f32 %v5439_v58, 0.0  ;;  %v8608_v25 = vld [vmem:[%s10255_s15 + $0x698] sm:$0xff]   ;;  %v8615_v30 = vld [vmem:[%s10255_s15 + $0x628] sm:$0xff]   ;;  %v8617_v31 = vld [vmem:[%s10255_s15 + $0x670] sm:$0xff]  }
0x16b8   :  { %v9981_v4 = vpack.c.bf16 %v5469_v1, %v5453_v61  ;;  %v9983_v6 = vpack.c.bf16 %v5471_v53, %v5455_v0  ;;  %v8616_v38 = vld [vmem:[%s10255_s15 + $0x6a8] sm:$0xff]   ;;  %v8618_v43 = vld [vmem:[%s10255_s15 + $0x6f0] sm:$0xff]   ;;  %v8621_v48 = vld [vmem:[%s10255_s15 + $0x678] sm:$0xff]  }
0x16b9   :  { %v9985_v8 = vpack.c.bf16 %v5470_v16, %v5454_v2  ;;  %v9987_v9 = vpack.c.bf16 %v5472_v15, %v5456_v3  ;;  %8021 = vmatpush3.bf16.msra.mxu0 %v8583_v59  ;;  %8043 = vmatpush3.bf16.msra.mxu1 %v8584_v60  ;;  %v8619_v44 = vld [vmem:[%s10255_s15 + $0x630] sm:$0xff]   ;;  %v8622_v49 = vld [vmem:[%s10255_s15 + $0x6f8] sm:$0xff]   ;;  %v8625_v56 = vld [vmem:[%s10255_s15 + $0x740] sm:$0xff]  }
0x16ba   :  { %8022 = vmatprep.subr.bf16.mxu0 %v8585_v11  ;;  %8044 = vmatprep.subr.bf16.mxu1 %v8586_v63  ;;  %v8620_v47 = vld [vmem:[%s10255_s15 + $0x6b0] sm:$0xff]   ;;  %v8623_v33 = vld [vmem:[%s10255_s15 + $0x638] sm:$0xff]   ;;  %v8626_v57 = vld [vmem:[%s10255_s15 + $0x7c0] sm:$0xff]  }
0x16bb   :  { %v8624_v50 = vld [vmem:[%s10255_s15 + $0x6b8] sm:$0xff]   ;;  %v8627_v55 = vld [vmem:[%s10255_s15 + $0x700] sm:$0xff]   ;;  %v8629_v52 = vld [vmem:[%s10255_s15 + $0x748] sm:$0xff]  }
0x16bc   :  { %v8628_v54 = vld [vmem:[%s10255_s15 + $0x780] sm:$0xff]   ;;  %v8630_v58 = vld [vmem:[%s10255_s15 + $0x7c8] sm:$0xff]   ;;  %v8635_v61 = vld [vmem:[%s10255_s15 + $0x710] sm:$0xff]  }
0x16bd   :  { %8023 = vmatpush3.bf16.msra.mxu0 %v8587_v10  ;;  %8045 = vmatpush3.bf16.msra.mxu1 %v8588_v28  ;;  %v8631_v59 = vld [vmem:[%s10255_s15 + $0x708] sm:$0xff]   ;;  %v8636_v0 = vld [vmem:[%s10255_s15 + $0x790] sm:$0xff]   ;;  %v8637_v1 = vld [vmem:[%s10255_s15 + $0x758] sm:$0xff]  }
0x16be   :  { %8024 = vmatprep.subr.bf16.mxu0 %v8589_v12  ;;  %8046 = vmatprep.subr.bf16.mxu1 %v8590_v29  ;;  %v8632_v60 = vld [vmem:[%s10255_s15 + $0x788] sm:$0xff]   ;;  %v8638_v53 = vld [vmem:[%s10255_s15 + $0x7d8] sm:$0xff]   ;;  %v8641_v2 = vld [vmem:[%s10255_s15 + $0x760] sm:$0xff]  }
0x16bf   :  { %v8639_v11 = vld [vmem:[%s10255_s15 + $0x718] sm:$0xff]   ;;  %v8642_v3 = vld [vmem:[%s10255_s15 + $0x7e0] sm:$0xff]   ;;  %v8647_v10 = vld [vmem:[%s10255_s15 + $0x728] sm:$0xff]  }
0x16c0   :  { %v8640_v63 = vld [vmem:[%s10255_s15 + $0x798] sm:$0xff]   ;;  %v8643_v16 = vld [vmem:[%s10255_s15 + $0x720] sm:$0xff]   ;;  %v8648_v28 = vld [vmem:[%s10255_s15 + $0x7a8] sm:$0xff]  }
0x16c1   :  { %8025 = vmatpush3.bf16.msra.mxu0 %v8591_v13  ;;  %8047 = vmatpush3.bf16.msra.mxu1 %v8592_v14  ;;  %v8644_v15 = vld [vmem:[%s10255_s15 + $0x7a0] sm:$0xff]   ;;  %v8649_v12 = vld [vmem:[%s10255_s15 + $0x770] sm:$0xff]  }
0x16c2   :  { %8054 = vmatprep.subr.bf16.mxu0 %v8593_v18  ;;  %8076 = vmatprep.subr.bf16.mxu1 %v8594_v20  ;;  %v8650_v29 = vld [vmem:[%s10255_s15 + $0x7f0] sm:$0xff]   ;;  %v8653_v18 = vld [vmem:[%s10255_s15 + $0x778] sm:$0xff]  }
0x16c3   :  { %v8651_v13 = vld [vmem:[%s10255_s15 + $0x730] sm:$0xff]   ;;  %v8654_v20 = vld [vmem:[%s10255_s15 + $0x7f8] sm:$0xff]  }
0x16c4   :  { %6637 = vmatmul.mubr.bf16.vlgmr.msra.gmra.mrb[84].mxu0 %v9913_v62  ;;  %6678 = vmatmul.mubr.bf16.vlgmr.msra.gmra.mrb[84].mxu1 %v9915_v34  ;;  %v8601_v62 = vld [vmem:[%s10255_s15 + $0x650] sm:$0xff]  }
0x16c5   :  { %8055 = vmatpush3.bf16.msra.mxu0 %v8595_v39  ;;  %6718 = vmatprep.mubr.bf16.mxu0 %v9953_v5  ;;  %v8602_v34 = vld [vmem:[%s10255_s15 + $0x6d0] sm:$0xff]   ;;  %v8609_v5 = vld [vmem:[%s10255_s15 + $0x660] sm:$0xff]   ;;  %v8655_v39 = vld [vmem:[%s10255_s15 + $0x738] sm:$0xff]  }
0x16c6   :  { %8077 = vmatpush3.bf16.msra.mxu1 %v8596_v21  ;;  %6759 = vmatprep.mubr.bf16.mxu1 %v9955_v51  ;;  %v8610_v51 = vld [vmem:[%s10255_s15 + $0x6e0] sm:$0xff]   ;;  %v8652_v14 = vld [vmem:[%s10255_s15 + $0x7b0] sm:$0xff]   ;;  %v8656_v21 = vld [vmem:[%s10255_s15 + $0x7b8] sm:$0xff]  }
0x16c7   :  { %8056 = vmatprep.subr.bf16.mxu0 %v8597_v19  ;;  %8078 = vmatprep.subr.bf16.mxu1 %v8598_v40 }
0x16c9   :  { %8057 = vmatpush3.bf16.msra.mxu0 %v8599_v17  ;;  %v7559_v17 = vld [vmem:[%s10259_s16 + $0x1] ss:$0 sm:$0xff] }
0x16ca   :  { %8079 = vmatpush3.bf16.msra.mxu1 %v8600_v22  ;;  %8058 = vmatprep.subr.bf16.mxu0 %v8601_v62 }
0x16cb   :  { %8080 = vmatprep.subr.bf16.mxu1 %v8602_v34 }
0x16cd   :  { %8059 = vmatpush3.bf16.msra.mxu0 %v8603_v45 }
0x16ce   :  { %8081 = vmatpush3.bf16.msra.mxu1 %v8604_v23  ;;  %8060 = vmatprep.subr.bf16.mxu0 %v8605_v24 }
0x16cf   :  { %8082 = vmatprep.subr.bf16.mxu1 %v8606_v42 }
0x16d1   :  { %8061 = vmatpush3.bf16.msra.mxu0 %v8607_v41 }
0x16d2   :  { %8083 = vmatpush3.bf16.msra.mxu1 %v8608_v25  ;;  %8062 = vmatprep.subr.bf16.mxu0 %v8609_v5 }
0x16d3   :  { %8084 = vmatprep.subr.bf16.mxu1 %v8610_v51 }
0x16d5   :  { %8063 = vmatpush3.bf16.msra.mxu0 %v8611_v7 }
0x16d6   :  { %8085 = vmatpush3.bf16.msra.mxu1 %v8612_v35  ;;  %8064 = vmatprep.subr.bf16.mxu0 %v8613_v36 }
0x16d7   :  { %8086 = vmatprep.subr.bf16.mxu1 %v8614_v37 }
0x16d9   :  { %8065 = vmatpush3.bf16.msra.mxu0 %v8615_v30 }
0x16da   :  { %8087 = vmatpush3.bf16.msra.mxu1 %v8616_v38  ;;  %8066 = vmatprep.subr.bf16.mxu0 %v8617_v31 }
0x16db   :  { %8088 = vmatprep.subr.bf16.mxu1 %v8618_v43 }
0x16dd   :  { %8067 = vmatpush3.bf16.msra.mxu0 %v8619_v44 }
0x16de   :  { %8089 = vmatpush3.bf16.msra.mxu1 %v8620_v47  ;;  %8068 = vmatprep.subr.bf16.mxu0 %v8621_v48 }
0x16df   :  { %8090 = vmatprep.subr.bf16.mxu1 %v8622_v49 }
0x16e1   :  { %8069 = vmatpush3.bf16.msra.mxu0 %v8623_v33 }
0x16e2   :  { %8091 = vmatpush3.bf16.msra.mxu1 %v8624_v50  ;;  %8098 = vmatprep.subr.bf16.mxu0 %v8625_v56 }
0x16e3   :  { %8120 = vmatprep.subr.bf16.mxu1 %v8626_v57 }
0x16e4   :  { %6719 = vmatmul.mubr.bf16.vlgmr.msra.gmra.mrb[88].mxu0 %v9949_v27  ;;  %v8633_v27 = vld [vmem:[%s10255_s15 + $0x750] sm:$0xff]  }
0x16e5   :  { %6760 = vmatmul.mubr.bf16.vlgmr.msra.gmra.mrb[88].mxu1 %v9951_v46  ;;  %8099 = vmatpush3.bf16.msra.mxu0 %v8627_v55  ;;  %v8634_v46 = vld [vmem:[%s10255_s15 + $0x7d0] sm:$0xff]  }
0x16e6   :  { %6800 = vmatprep.mubr.bf16.mxu0 %v9985_v8  ;;  %8121 = vmatpush3.bf16.msra.mxu1 %v8628_v54  ;;  %v8645_v8 = vld [vmem:[%s10255_s15 + $0x768] sm:$0xff]  }
0x16e7   :  { %6841 = vmatprep.mubr.bf16.mxu1 %v9987_v9  ;;  %8100 = vmatprep.subr.bf16.mxu0 %v8629_v52  ;;  %v8646_v9 = vld [vmem:[%s10255_s15 + $0x7e8] sm:$0xff]  }
0x16e8   :  { %8122 = vmatprep.subr.bf16.mxu1 %v8630_v58 }
0x16e9   :  { %8101 = vmatpush3.bf16.msra.mxu0 %v8631_v59 }
0x16ea   :  { %8123 = vmatpush3.bf16.msra.mxu1 %v8632_v60  ;;  %8102 = vmatprep.subr.bf16.mxu0 %v8633_v27 }
0x16eb   :  { %8124 = vmatprep.subr.bf16.mxu1 %v8634_v46 }
0x16ed   :  { %8103 = vmatpush3.bf16.msra.mxu0 %v8635_v61 }
0x16ee   :  { %8125 = vmatpush3.bf16.msra.mxu1 %v8636_v0  ;;  %8104 = vmatprep.subr.bf16.mxu0 %v8637_v1 }
0x16ef   :  { %8126 = vmatprep.subr.bf16.mxu1 %v8638_v53 }
0x16f1   :  { %8105 = vmatpush3.bf16.msra.mxu0 %v8639_v11 }
0x16f2   :  { %8127 = vmatpush3.bf16.msra.mxu1 %v8640_v63  ;;  %8106 = vmatprep.subr.bf16.mxu0 %v8641_v2 }
0x16f3   :  { %8128 = vmatprep.subr.bf16.mxu1 %v8642_v3 }
0x16f5   :  { %8107 = vmatpush3.bf16.msra.mxu0 %v8643_v16 }
0x16f6   :  { %8129 = vmatpush3.bf16.msra.mxu1 %v8644_v15  ;;  %8108 = vmatprep.subr.bf16.mxu0 %v8645_v8 }
0x16f7   :  { %8130 = vmatprep.subr.bf16.mxu1 %v8646_v9 }
0x16f9   :  { %8109 = vmatpush3.bf16.msra.mxu0 %v8647_v10 }
0x16fa   :  { %8131 = vmatpush3.bf16.msra.mxu1 %v8648_v28  ;;  %8110 = vmatprep.subr.bf16.mxu0 %v8649_v12 }
0x16fb   :  { %8132 = vmatprep.subr.bf16.mxu1 %v8650_v29 }
0x16fd   :  { %8111 = vmatpush3.bf16.msra.mxu0 %v8651_v13 }
0x16fe   :  { %8133 = vmatpush3.bf16.msra.mxu1 %v8652_v14  ;;  %8112 = vmatprep.subr.bf16.mxu0 %v8653_v18 }
0x16ff   :  { %8134 = vmatprep.subr.bf16.mxu1 %v8654_v20 }
0x1701   :  { %8113 = vmatpush3.bf16.msra.mxu0 %v8655_v39 }
0x1702   :  { %8135 = vmatpush3.bf16.msra.mxu1 %v8656_v21 }
0x1704   :  { %6801 = vmatmul.mubr.bf16.vlgmr.msra.gmra.mrb[92].mxu0 %v9981_v4 }
0x1705   :  { %6842 = vmatmul.mubr.bf16.vlgmr.msra.gmra.mrb[92].mxu1 %v9983_v6 }
0x1777   :  { %v7982_v19 = vpop.f32.mrb[80].mxu0  ;;  %v8004_v40 = vpop.f32.mrb[80].mxu1 }
0x1778   :  { %v7983_v22 = vpop.f32.mrb[81].mxu0  ;;  %v8005_v62 = vpop.f32.mrb[81].mxu1 }
0x1779   :  { %v7984_v34 = vadd.f32 %v7983_v22, %v7982_v19  ;;  %v8006_v45 = vadd.f32 %v8005_v62, %v8004_v40  ;;  %v7985_v23 = vpop.f32.mrb[82].mxu0  ;;  %v8007_v24 = vpop.f32.mrb[82].mxu1 }
0x177a   :  { %v7986_v42 = vpop.f32.mrb[83].mxu0  ;;  %v8008_v41 = vpop.f32.mrb[83].mxu1 }
0x177b   :  { %v6557_v25 = vadd.f32 %v7984_v34, %v7559_v17  ;;  %v7987_v5 = vadd.f32 %v7986_v42, %v7985_v23  ;;  %v8009_v51 = vadd.f32 %v8008_v41, %v8007_v24 }
0x177d   :  { %v6598_v4 = vadd.f32 %v8006_v45, %v6557_v25  ;;  %v6560_v7 = vadd.f32 %v7987_v5, %v7559_v17 }
0x177f   :  { %v6601_v6 = vadd.f32 %v8009_v51, %v6560_v7 }
0x1797   :  { %v8026_v35 = vpop.f32.mrb[84].mxu0  ;;  %v8048_v36 = vpop.f32.mrb[84].mxu1 }
0x1798   :  { %v8027_v37 = vpop.f32.mrb[85].mxu0  ;;  %v8049_v30 = vpop.f32.mrb[85].mxu1 }
0x1799   :  { %v8028_v38 = vadd.f32 %v8027_v37, %v8026_v35  ;;  %v8050_v31 = vadd.f32 %v8049_v30, %v8048_v36  ;;  %v8029_v43 = vpop.f32.mrb[86].mxu0  ;;  %v8051_v44 = vpop.f32.mrb[86].mxu1 }
0x179a   :  { %v8030_v47 = vpop.f32.mrb[87].mxu0  ;;  %v8052_v48 = vpop.f32.mrb[87].mxu1 }
0x179b   :  { %v6639_v49 = vadd.f32 %v8028_v38, %v6598_v4  ;;  %v8031_v33 = vadd.f32 %v8030_v47, %v8029_v43  ;;  %v8053_v50 = vadd.f32 %v8052_v48, %v8051_v44  ;;  %v7690_v47 = vld [vmem:[%s10260_s17 + $0x1] ss:$0 sm:$0xff] }
0x179d   :  { %v6680_v56 = vadd.f32 %v8050_v31, %v6639_v49  ;;  %v6642_v57 = vadd.f32 %v8031_v33, %v6601_v6  ;;  %v6899_v6 = vld [vmem:[%s10262_s19 + $0x8] sm:$0xff]  ;;  %v7691_v33 = vld [vmem:[%s10261_s18 + $0x1] ss:$0 sm:$0xff] }
0x179f   :  { %v6683_v55 = vadd.f32 %v8053_v50, %v6642_v57 }
0x17b7   :  { %v8070_v54 = vpop.f32.mrb[88].mxu0 }
0x17b8   :  { %v8092_v52 = vpop.f32.mrb[88].mxu1  ;;  %v8071_v58 = vpop.f32.mrb[89].mxu0 }
0x17b9   :  { %v8072_v59 = vadd.f32 %v8071_v58, %v8070_v54  ;;  %v8093_v60 = vpop.f32.mrb[89].mxu1  ;;  %v8073_v27 = vpop.f32.mrb[90].mxu0 }
0x17ba   :  { %v8094_v46 = vadd.f32 %v8093_v60, %v8092_v52  ;;  %v8095_v61 = vpop.f32.mrb[90].mxu1  ;;  %v8074_v0 = vpop.f32.mrb[91].mxu0  ;;  %v7692_v52 = vld [vmem:[%s10263_s20] ss:$0 sm:$0xff] }
0x17bb   :  { %v6721_v1 = vadd.f32 %v8072_v59, %v6680_v56  ;;  %v8075_v53 = vadd.f32 %v8074_v0, %v8073_v27  ;;  %v8096_v11 = vpop.f32.mrb[91].mxu1 }
0x17bc   :  { %v8097_v63 = vadd.f32 %v8096_v11, %v8095_v61 }
0x17bd   :  { %v6762_v2 = vadd.f32 %v8094_v46, %v6721_v1  ;;  %v6724_v3 = vadd.f32 %v8075_v53, %v6683_v55 }
0x17bf   :  { %v6765_v16 = vadd.f32 %v8097_v63, %v6724_v3 }
0x17d7   :  { %v8114_v15 = vpop.f32.mrb[92].mxu0 }
0x17d8   :  { %v8136_v8 = vpop.f32.mrb[92].mxu1  ;;  %v8115_v9 = vpop.f32.mrb[93].mxu0 }
0x17d9   :  { %v8116_v10 = vadd.f32 %v8115_v9, %v8114_v15  ;;  %v8137_v28 = vpop.f32.mrb[93].mxu1  ;;  %v8117_v12 = vpop.f32.mrb[94].mxu0 }
0x17da   :  { %v8138_v29 = vadd.f32 %v8137_v28, %v8136_v8  ;;  %v8139_v13 = vpop.f32.mrb[94].mxu1  ;;  %v8118_v14 = vpop.f32.mrb[95].mxu0 }
0x17db   :  { %v6803_v18 = vadd.f32 %v8116_v10, %v6762_v2  ;;  %v8119_v20 = vadd.f32 %v8118_v14, %v8117_v12  ;;  %v8140_v39 = vpop.f32.mrb[95].mxu1 }
0x17dc   :  { %v8141_v21 = vadd.f32 %v8140_v39, %v8139_v13 }
0x17dd   :  { %v6844_v19 = vadd.f32 %v8138_v29, %v6803_v18  ;;  %v6806_v40 = vadd.f32 %v8119_v20, %v6765_v16 }
0x17df   :  { %v6847_v17 = vadd.f32 %v8141_v21, %v6806_v40  ;;  %v6850_v22 = vadd.f32 %v6844_v19, %v9724_v32 }
0x17e1   :  { %v6856_v62 = vsel %vm174_vm2, %v6850_v22, 0.0  ;;  %v6851_v34 = vadd.f32 %v6847_v17, %v9719_v26  ;;  %v6898_v26 = vld [vmem:[%s10262_s19] sm:$0xff] }
0x17e2   :  { %6857 = vadd.xlane.f32.xlu0 %v6856_v62  ;;  %v8390_v35 = vpack.c.bf16 %v6899_v6, %v6898_v26 }
0x17e3   :  { %v6859_v45 = vsel %vm174_vm2, %v6851_v34, 0.0 }
0x17e4   :  { %6860 = vadd.xlane.f32.xlu1 %v6859_v45  ;;  %8391 = vmatprep.subr.bf16.mxu0 %v8390_v35 }
0x17e5   :  { %8393 = vmatpush3.bf16.msra.mxu0 %v8390_v35 }
0x186f   :  { %v6858_v23 = vpop.xlane.xlu0 %6857 }
0x1870   :  { %v6862_v24 = vmul.f32 0.0625, %v6858_v23 }
0x1871   :  { %v6861_v42 = vpop.xlane.xlu1 %6860 }
0x1872   :  { %v6864_v41 = vsub.f32 %v6850_v22, %v6862_v24  ;;  %v6863_v25 = vmul.f32 0.0625, %v6861_v42 }
0x1874   :  { %v6865_v5 = vsub.f32 %v6851_v34, %v6863_v25  ;;  %v6866_v51 = vmul.f32 %v6864_v41, %v6864_v41 }
0x1876   :  { %v6868_v4 = vsel %vm174_vm2, %v6866_v51, 0.0  ;;  %v6867_v7 = vmul.f32 %v6865_v5, %v6865_v5 }
0x1877   :  { %6869 = vadd.xlane.f32.xlu0 %v6868_v4 }
0x1878   :  { %v6871_v32 = vsel %vm174_vm2, %v6867_v7, 0.0 }
0x1879   :  { %6872 = vadd.xlane.f32.xlu1 %v6871_v32 }
0x1904   :  { %v6870_v36 = vpop.xlane.xlu0 %6869 }
0x1905   :  { %v6874_v37 = vmul.f32 0.0625, %v6870_v36 }
0x1906   :  { %v6873_v30 = vpop.xlane.xlu1 %6872 }
0x1907   :  { %v6876_v38 = vadd.f32 1e-05, %v6874_v37  ;;  %v6875_v31 = vmul.f32 0.0625, %v6873_v30 }
0x1909   :  { %8701 = vrsqrt.f32 %v6876_v38  ;;  %v6877_v43 = vadd.f32 1e-05, %v6875_v31 }
0x190b   :  { %8703 = vrsqrt.f32 %v6877_v43 }
0x1913   :  { %v8702_v44 = vpop.eup %8701 }
0x1914   :  { %v6880_v48 = vmul.f32 %v8702_v44, %v6864_v41 }
0x1915   :  { %v8704_v49 = vpop.eup %8703 }
0x1916   :  { %v6881_v50 = vmul.f32 %v8704_v49, %v6865_v5  ;;  %v6888_v56 = vmul.f32 %v7690_v47, %v6880_v48 }
0x1918   :  { %v6889_v57 = vmul.f32 %v7690_v47, %v6881_v50  ;;  %v6896_v55 = vadd.f32 %v7691_v33, %v6888_v56 }
0x191a   :  { %v6897_v54 = vadd.f32 %v7691_v33, %v6889_v57  ;;  %8339 = vmatprep.mubr.msk.f32.mxu0 %vm174_vm2, %v6896_v55 }
0x191c   :  { %8340 = vmatmul.mubr.msk.f32.vlgmr.msra.gmra.mrb[96].mxu0 %vm174_vm2, %v6897_v54 }
0x19ef   :  { %v8341_v58 = vpop.f32.mrb[96].mxu0 }
0x19f0   :  { %v6985_v59 = vadd.f32 %v8341_v58, %v7692_v52  ;;  %v6979_v60 = vpop.f32.mrb[97].mxu0 }
0x19f1   :  { %v6980_v27 = vadd.f32 %v7692_v52, %v6979_v60 }
0x19f2   :  { %6989 = vst.msk [vmem:[%s10264_s21 + $0x8] sm:$0xff] %vm79_vm1, %v6985_v59 }
0x19f3   :  { %6988 = vst.msk [vmem:[%s10264_s21] sm:$0xff] %vm79_vm1, %v6980_v27 }

</bundles_post_ra>
